<compile_context>
chip_gen: v7x
topology: tpu7x:2x2x1
jax: 0.10.0
libtpu: 0.0.40
codegen_flags: <defaults>
</compile_context>

<pallas_src>
import functools

import jax
import jax.numpy as jnp
from jax.experimental import pallas as pl
from jax.experimental.pallas import tpu as pltpu

_EPS = 1e-5
_INV_SQRT2 = 0.7071067811865476
_VMEM_LIMIT_BYTES = 32 * 1024 * 1024   # safe on v5e/v6e/v7x, above scoped defaults
_BATCH_TILE = 1                        # batch elements per grid step (tunable)


def _erf(z):
    # Abramowitz & Stegun 7.1.26 (|err| < 1.5e-7): float32-accurate stand-in
    # for torch.nn.GELU's exact erf; the exp rides the (otherwise idle) EUP slot.
    a1, a2, a3, a4, a5 = 0.254829592, -0.284496736, 1.421413741, -1.453152027, 1.061405429
    p = 0.3275911
    sgn = jnp.where(z >= 0.0, 1.0, -1.0)
    za = jnp.abs(z)
    t = 1.0 / (1.0 + p * za)
    poly = ((((a5 * t + a4) * t + a3) * t + a2) * t + a1) * t
    return sgn * (1.0 - poly * jnp.exp(-za * za))


def _gelu(x):
    return 0.5 * x * (1.0 + _erf(x * _INV_SQRT2))


# ---------------------------------------------------------------------------
# Pass 1: conv1 (3x3, pad=1) fused with 2x2/stride-2 max-pool.
# Inputs are the 4 space-to-depth phases of the zero-padded image, so the conv
# output at (2y+a, 2x+b) is one im2col matmul per pool phase (a, b) and the
# pool is an elementwise max over the 4 phase results.
# ---------------------------------------------------------------------------
def _conv1_pool_kernel(xp00_ref, xp01_ref, xp10_ref, xp11_ref,
                       w1m_ref, b1_ref, pooled_ref):
    tn, php1, pwp1, ic = xp00_ref.shape
    ph, pw = php1 - 1, pwp1 - 1
    m = tn * ph * pw
    phases = {(0, 0): xp00_ref[...], (0, 1): xp01_ref[...],
              (1, 0): xp10_ref[...], (1, 1): xp11_ref[...]}
    w1m = w1m_ref[...]                       # (9*IC, OC), rows ordered (dy, dx, cin)
    pooled = None
    for a in (0, 1):
        for b in (0, 1):
            cols = []
            for dy in range(3):
                for dx in range(3):
                    pr, oy = (a + dy) & 1, (a + dy) >> 1
                    pc, ox = (b + dx) & 1, (b + dx) >> 1
                    sl = phases[(pr, pc)][:, oy:oy + ph, ox:ox + pw, :]
                    cols.append(sl.reshape(m, ic))
            patch = jnp.concatenate(cols, axis=1)                    # (M, 9*IC) im2col
            acc = jnp.dot(patch, w1m, preferred_element_type=jnp.float32)  # MXU
            pooled = acc if pooled is None else jnp.maximum(pooled, acc)
    pooled_ref[...] = pooled + b1_ref[...]   # per-channel bias commutes with the max


# ---------------------------------------------------------------------------
# Pass 2: BN1 (precomputed global scale/shift) + GELU + conv2 (3x3, pad=1).
# ---------------------------------------------------------------------------
def _bn1_gelu_conv2_kernel(pooled_ref, s1_ref, t1_ref, w2m_ref, b2_ref,
                           h_ref, y2_ref, *, tn, ph, pw):
    oc = pooled_ref.shape[-1]
    tm = tn * ph * pw
    h2d = _gelu(pooled_ref[...] * s1_ref[...] + t1_ref[...])     # (TM, OC)
    h_ref[...] = h2d
    # conv2 zero border built at value level (no padded VMEM scratch round-trip)
    h4 = h2d.reshape(tn, ph, pw, oc)
    zr = jnp.zeros((tn, 1, pw, oc), jnp.float32)
    hp = jnp.concatenate([zr, h4, zr], axis=1)                   # (tn, ph+2, pw, oc)
    zc = jnp.zeros((tn, ph + 2, 1, oc), jnp.float32)
    hp = jnp.concatenate([zc, hp, zc], axis=2)                   # (tn, ph+2, pw+2, oc)
    cols = [hp[:, ky:ky + ph, kx:kx + pw, :].reshape(tm, oc)
            for ky in range(3) for kx in range(3)]
    patch = jnp.concatenate(cols, axis=1)                        # (TM, 9*OC) im2col
    y2_ref[...] = (jnp.dot(patch, w2m_ref[...],
                           preferred_element_type=jnp.float32) + b2_ref[...])


# ---------------------------------------------------------------------------
# Pass 3: BN2 + residual + GELU, fully lane-dense (last dim = PW*OC).
# ---------------------------------------------------------------------------
def _bn2_residual_gelu_kernel(h_ref, y2_ref, s2_ref, t2_ref, out_ref):
    out_ref[...] = _gelu(h_ref[...] + (y2_ref[...] * s2_ref[...] + t2_ref[...]))


def _bn_scale_shift(v2d, gamma, beta):
    # training-mode BatchNorm2d: biased per-channel stats over (N, H, W)
    mean = jnp.mean(v2d, axis=0)
    var = jnp.var(v2d, axis=0)
    scale = gamma * jax.lax.rsqrt(var + _EPS)
    return scale, beta - mean * scale


def init_params(key, ic, oc):
    # deterministic synthetic init (shapes match nn.Conv2d / nn.BatchNorm2d)
    k1, k2, k3, k4 = jax.random.split(key, 4)
    s1 = 1.0 / float((ic * 9) ** 0.5)
    s2 = 1.0 / float((oc * 9) ** 0.5)
    # weight layout (KH, KW, IC, OC); w[dy,dx,ic,oc] == torch_weight[oc,ic,dy,dx]
    w1 = jax.random.uniform(k1, (3, 3, ic, oc), jnp.float32, -1.0, 1.0) * s1
    b1 = jax.random.uniform(k2, (oc,), jnp.float32, -1.0, 1.0) * s1
    w2 = jax.random.uniform(k3, (3, 3, oc, oc), jnp.float32, -1.0, 1.0) * s2
    b2 = jax.random.uniform(k4, (oc,), jnp.float32, -1.0, 1.0) * s2
    return dict(w1=w1, b1=b1, g1=jnp.ones((oc,), jnp.float32),
                bt1=jnp.zeros((oc,), jnp.float32),
                w2=w2, b2=b2, g2=jnp.ones((oc,), jnp.float32),
                bt2=jnp.zeros((oc,), jnp.float32))


@jax.jit
def residual_forward(x_nchw, params):
    n, ic, hh, ww = x_nchw.shape
    oc = params["w1"].shape[-1]
    assert hh % 2 == 0 and ww % 2 == 0
    tn = _BATCH_TILE
    assert n % tn == 0
    ph, pw = hh // 2, ww // 2
    tm, m, pwoc = tn * ph * pw, n * ph * pw, pw * oc
    grid = (n // tn,)

    cparams = pltpu.CompilerParams(
        dimension_semantics=("parallel",),          # shards the grid on v7x's 2 TCs
        vmem_limit_bytes=_VMEM_LIMIT_BYTES)

    # glue: NCHW -> NHWC, zero-pad, space-to-depth phase split (keeps the fused
    # conv+pool free of strided in-kernel loads; x is the smallest tensor and
    # XLA fuses pad+slice into one pass over it).
    x = jnp.transpose(x_nchw, (0, 2, 3, 1)).astype(jnp.float32)
    xpad = jnp.pad(x, ((0, 0), (1, 1), (1, 1), (0, 0)))
    phases = [xpad[:, a::2, b::2, :] for a in (0, 1) for b in (0, 1)]

    w1m = params["w1"].reshape(9 * ic, oc)          # rows ordered (dy, dx, cin)
    w2m = params["w2"].reshape(9 * oc, oc)
    b1r = params["b1"].reshape(1, oc)
    b2r = params["b2"].reshape(1, oc)

    rows_spec = pl.BlockSpec((tm, oc), lambda i: (i, 0))
    phase_spec = pl.BlockSpec((tn, ph + 1, pw + 1, ic), lambda i: (i, 0, 0, 0))

    def full2d(shape):
        return pl.BlockSpec(shape, lambda i: (0, 0))

    # ---- pass 1: conv1 + maxpool (pre-BN1 activations) -----------------------
    pooled = pl.pallas_call(
        _conv1_pool_kernel,
        out_shape=jax.ShapeDtypeStruct((m, oc), jnp.float32),
        grid=grid,
        in_specs=[phase_spec] * 4 + [full2d((9 * ic, oc)), full2d((1, oc))],
        out_specs=rows_spec,
        compiler_params=cparams,
    )(phases[0], phases[1], phases[2], phases[3], w1m, b1r)

    # BN1 statistics over the full (N, PH, PW) extent (tiny per-channel reduce;
    # keeps stats global and therefore correct under batch tiling).
    s1, t1 = _bn_scale_shift(pooled, params["g1"], params["bt1"])

    # ---- pass 2: BN1 + GELU + conv2 (pre-BN2 activations) --------------------
    h2d, y2raw = pl.pallas_call(
        functools.partial(_bn1_gelu_conv2_kernel, tn=tn, ph=ph, pw=pw),
        out_shape=(jax.ShapeDtypeStruct((m, oc), jnp.float32),
                   jax.ShapeDtypeStruct((m, oc), jnp.float32)),
        grid=grid,
        in_specs=[rows_spec, full2d((1, oc)), full2d((1, oc)),
                  full2d((9 * oc, oc)), full2d((1, oc))],
        out_specs=(rows_spec, rows_spec),
        compiler_params=cparams,
    )(pooled, s1.reshape(1, oc), t1.reshape(1, oc), w2m, b2r)

    # BN2 statistics
    s2, t2 = _bn_scale_shift(y2raw, params["g2"], params["bt2"])

    # ---- pass 3: BN2 + residual + GELU in a lane-dense layout ----------------
    h_d = h2d.reshape(n, ph, pwoc)                  # free row-major HBM reshapes
    y_d = y2raw.reshape(n, ph, pwoc)
    s2_d = jnp.tile(s2, pw).reshape(1, 1, pwoc)     # channel c sits at lane x*OC+c
    t2_d = jnp.tile(t2, pw).reshape(1, 1, pwoc)

    dense_spec = pl.BlockSpec((tn, ph, pwoc), lambda i: (i, 0, 0))
    vec_spec = pl.BlockSpec((1, 1, pwoc), lambda i: (0, 0, 0))
    out_d = pl.pallas_call(
        _bn2_residual_gelu_kernel,
        out_shape=jax.ShapeDtypeStruct((n, ph, pwoc), jnp.float32),
        grid=grid,
        in_specs=[dense_spec, dense_spec, vec_spec, vec_spec],
        out_specs=dense_spec,
        compiler_params=cparams,
    )(h_d, y_d, s2_d, t2_d)

    return jnp.transpose(out_d.reshape(n, ph, pw, oc), (0, 3, 1, 2))  # NCHW


@jax.jit
def _reference(x_nchw, params):
    # pure-JAX reference of the PyTorch module (training-mode BN, exact GELU)
    x = jnp.transpose(x_nchw, (0, 2, 3, 1)).astype(jnp.float32)
    dn = ("NHWC", "HWIO", "NHWC")
    c1 = jax.lax.conv_general_dilated(x, params["w1"], (1, 1), "SAME",
                                      dimension_numbers=dn) + params["b1"]
    p1 = jax.lax.reduce_window(c1, -jnp.inf, jax.lax.max,
                               (1, 2, 2, 1), (1, 2, 2, 1), "VALID")

    def bn(v, g, b):
        mu = jnp.mean(v, axis=(0, 1, 2))
        va = jnp.var(v, axis=(0, 1, 2))
        return (v - mu) * jax.lax.rsqrt(va + _EPS) * g + b

    h = jax.nn.gelu(bn(p1, params["g1"], params["bt1"]), approximate=False)
    c2 = jax.lax.conv_general_dilated(h, params["w2"], (1, 1), "SAME",
                                      dimension_numbers=dn) + params["b2"]
    out = jax.nn.gelu(h + bn(c2, params["g2"], params["bt2"]), approximate=False)
    return jnp.transpose(out, (0, 3, 1, 2))


if __name__ == "__main__":
    key = jax.random.PRNGKey(0)
    kx, kp = jax.random.split(key)
    N, IC, OC, H, W = 2, 4, 8, 16, 16
    x = jax.random.normal(kx, (N, IC, H, W), jnp.float32)
    params = init_params(kp, IC, OC)

    y = residual_forward(x, params)
    jax.block_until_ready(y)
    assert y.shape == (N, OC, H // 2, W // 2)
    assert bool(jnp.all(jnp.isfinite(y)))

    y_ref = _reference(x, params)
    err = float(jnp.max(jnp.abs(y - y_ref)))
    assert err < 1e-3, f"mismatch vs reference: max abs err = {err}"
    print("KERNEL_OK")
</pallas_src>

<mosaic_0001>
module attributes {stable_mosaic.version = 11 : i64} {
  func.func @_bn1_gelu_conv2_kernel(%arg0: i32, %arg1: memref<64x8xf32, #tpu.memory_space<vmem>>, %arg2: memref<1x8xf32, #tpu.memory_space<vmem>>, %arg3: memref<1x8xf32, #tpu.memory_space<vmem>>, %arg4: memref<72x8xf32, #tpu.memory_space<vmem>>, %arg5: memref<1x8xf32, #tpu.memory_space<vmem>>, %arg6: memref<64x8xf32, #tpu.memory_space<vmem>>, %arg7: memref<64x8xf32, #tpu.memory_space<vmem>>) attributes {dimension_semantics = [#tpu.dimension_semantics<parallel>], iteration_bounds = array<i64: 2>, scalar_prefetch = 0 : i64, scratch_operands = 0 : i64, tpu.core_type = #tpu.core_type<tc>, window_params = [{transform_indices = @transform_0, window_bounds = array<i64: 64, 8>}, {pipeline_mode = #tpu.pipeline_mode<synchronous>, transform_indices = @transform_1, window_bounds = array<i64: 1, 8>}, {pipeline_mode = #tpu.pipeline_mode<synchronous>, transform_indices = @transform_2, window_bounds = array<i64: 1, 8>}, {pipeline_mode = #tpu.pipeline_mode<synchronous>, transform_indices = @transform_3, window_bounds = array<i64: 72, 8>}, {pipeline_mode = #tpu.pipeline_mode<synchronous>, transform_indices = @transform_4, window_bounds = array<i64: 1, 8>}, {transform_indices = @transform_5, window_bounds = array<i64: 64, 8>}, {transform_indices = @transform_6, window_bounds = array<i64: 64, 8>}]} {
    %c0 = arith.constant 0 : index
    %c0_0 = arith.constant 0 : index
    %0 = vector.load %arg1[%c0, %c0_0] : memref<64x8xf32, #tpu.memory_space<vmem>>, vector<64x8xf32>
    %c0_1 = arith.constant 0 : index
    %c0_2 = arith.constant 0 : index
    %1 = vector.load %arg2[%c0_1, %c0_2] : memref<1x8xf32, #tpu.memory_space<vmem>>, vector<1x8xf32>
    %2 = vector.broadcast %1 : vector<1x8xf32> to vector<64x8xf32>
    %3 = arith.mulf %0, %2 : vector<64x8xf32>
    %c0_3 = arith.constant 0 : index
    %c0_4 = arith.constant 0 : index
    %4 = vector.load %arg3[%c0_3, %c0_4] : memref<1x8xf32, #tpu.memory_space<vmem>>, vector<1x8xf32>
    %5 = vector.broadcast %4 : vector<1x8xf32> to vector<64x8xf32>
    %6 = arith.addf %3, %5 : vector<64x8xf32>
    %cst = arith.constant 5.000000e-01 : f32
    %7 = vector.broadcast %cst : f32 to vector<64x8xf32>
    %8 = arith.mulf %7, %6 : vector<64x8xf32>
    %cst_5 = arith.constant 0.707106769 : f32
    %9 = vector.broadcast %cst_5 : f32 to vector<64x8xf32>
    %10 = arith.mulf %6, %9 : vector<64x8xf32>
    %cst_6 = arith.constant 0.000000e+00 : f32
    %11 = vector.broadcast %cst_6 : f32 to vector<64x8xf32>
    %12 = arith.cmpf oge, %10, %11 : vector<64x8xf32>
    %cst_7 = arith.constant 1.000000e+00 : f32
    %cst_8 = arith.constant -1.000000e+00 : f32
    %13 = vector.broadcast %cst_7 : f32 to vector<64x8xf32>
    %14 = vector.broadcast %cst_8 : f32 to vector<64x8xf32>
    %15 = arith.select %12, %13, %14 : vector<64x8xi1>, vector<64x8xf32>
    %16 = math.absf %10 : vector<64x8xf32>
    %cst_9 = arith.constant 0.327591091 : f32
    %17 = vector.broadcast %cst_9 : f32 to vector<64x8xf32>
    %18 = arith.mulf %17, %16 : vector<64x8xf32>
    %cst_10 = arith.constant 1.000000e+00 : f32
    %19 = vector.broadcast %cst_10 : f32 to vector<64x8xf32>
    %20 = arith.addf %19, %18 : vector<64x8xf32>
    %cst_11 = arith.constant 1.000000e+00 : f32
    %21 = vector.broadcast %cst_11 : f32 to vector<64x8xf32>
    %22 = arith.divf %21, %20 : vector<64x8xf32>
    %cst_12 = arith.constant 1.06140542 : f32
    %23 = vector.broadcast %cst_12 : f32 to vector<64x8xf32>
    %24 = arith.mulf %23, %22 : vector<64x8xf32>
    %cst_13 = arith.constant -1.45315206 : f32
    %25 = vector.broadcast %cst_13 : f32 to vector<64x8xf32>
    %26 = arith.addf %24, %25 : vector<64x8xf32>
    %27 = arith.mulf %26, %22 : vector<64x8xf32>
    %cst_14 = arith.constant 1.42141378 : f32
    %28 = vector.broadcast %cst_14 : f32 to vector<64x8xf32>
    %29 = arith.addf %27, %28 : vector<64x8xf32>
    %30 = arith.mulf %29, %22 : vector<64x8xf32>
    %cst_15 = arith.constant -0.284496725 : f32
    %31 = vector.broadcast %cst_15 : f32 to vector<64x8xf32>
    %32 = arith.addf %30, %31 : vector<64x8xf32>
    %33 = arith.mulf %32, %22 : vector<64x8xf32>
    %cst_16 = arith.constant 0.254829586 : f32
    %34 = vector.broadcast %cst_16 : f32 to vector<64x8xf32>
    %35 = arith.addf %33, %34 : vector<64x8xf32>
    %36 = arith.mulf %35, %22 : vector<64x8xf32>
    %cst_17 = arith.constant 0.000000e+00 : f32
    %37 = vector.broadcast %cst_17 : f32 to vector<64x8xf32>
    %38 = arith.subf %37, %16 : vector<64x8xf32>
    %39 = arith.mulf %38, %16 : vector<64x8xf32>
    %40 = math.exp %39 : vector<64x8xf32>
    %41 = arith.mulf %36, %40 : vector<64x8xf32>
    %cst_18 = arith.constant 1.000000e+00 : f32
    %42 = vector.broadcast %cst_18 : f32 to vector<64x8xf32>
    %43 = arith.subf %42, %41 : vector<64x8xf32>
    %44 = arith.mulf %15, %43 : vector<64x8xf32>
    %cst_19 = arith.constant 1.000000e+00 : f32
    %45 = vector.broadcast %cst_19 : f32 to vector<64x8xf32>
    %46 = arith.addf %45, %44 : vector<64x8xf32>
    %47 = arith.mulf %8, %46 : vector<64x8xf32>
    %c0_20 = arith.constant 0 : index
    %c0_21 = arith.constant 0 : index
    %48 = vector.load %arg6[%c0_20, %c0_21] : memref<64x8xf32, #tpu.memory_space<vmem>>, vector<64x8xf32>
    tpu.vector_store %arg6[%c0_20, %c0_21], %47 {strides = array<i32>} : memref<64x8xf32, #tpu.memory_space<vmem>>, vector<64x8xf32>,
    %49 = vector.shape_cast %47 : vector<64x8xf32> to vector<1x8x8x8xf32>
    %cst_22 = arith.constant 0.000000e+00 : f32
    %50 = vector.broadcast %cst_22 : f32 to vector<1x1x8x8xf32>
    %51 = tpu.concatenate %50, %49, %50 in 1 : vector<1x1x8x8xf32>, vector<1x8x8x8xf32>, vector<1x1x8x8xf32> -> vector<1x10x8x8xf32>
    %cst_23 = arith.constant 0.000000e+00 : f32
    %52 = vector.broadcast %cst_23 : f32 to vector<1x10x1x8xf32>
    %53 = tpu.concatenate %52, %51, %52 in 2 : vector<1x10x1x8xf32>, vector<1x10x8x8xf32>, vector<1x10x1x8xf32> -> vector<1x10x10x8xf32>
    %54 = vector.extract_strided_slice %53 {offsets = [0, 0, 0, 0], sizes = [1, 8, 8, 8], strides = [1, 1, 1, 1]} : vector<1x10x10x8xf32> to vector<1x8x8x8xf32>
    %55 = vector.shape_cast %54 : vector<1x8x8x8xf32> to vector<64x8xf32>
    %56 = vector.extract_strided_slice %53 {offsets = [0, 0, 1, 0], sizes = [1, 8, 8, 8], strides = [1, 1, 1, 1]} : vector<1x10x10x8xf32> to vector<1x8x8x8xf32>
    %57 = vector.shape_cast %56 : vector<1x8x8x8xf32> to vector<64x8xf32>
    %58 = vector.extract_strided_slice %53 {offsets = [0, 0, 2, 0], sizes = [1, 8, 8, 8], strides = [1, 1, 1, 1]} : vector<1x10x10x8xf32> to vector<1x8x8x8xf32>
    %59 = vector.shape_cast %58 : vector<1x8x8x8xf32> to vector<64x8xf32>
    %60 = vector.extract_strided_slice %53 {offsets = [0, 1, 0, 0], sizes = [1, 8, 8, 8], strides = [1, 1, 1, 1]} : vector<1x10x10x8xf32> to vector<1x8x8x8xf32>
    %61 = vector.shape_cast %60 : vector<1x8x8x8xf32> to vector<64x8xf32>
    %62 = vector.extract_strided_slice %53 {offsets = [0, 1, 1, 0], sizes = [1, 8, 8, 8], strides = [1, 1, 1, 1]} : vector<1x10x10x8xf32> to vector<1x8x8x8xf32>
    %63 = vector.shape_cast %62 : vector<1x8x8x8xf32> to vector<64x8xf32>
    %64 = vector.extract_strided_slice %53 {offsets = [0, 1, 2, 0], sizes = [1, 8, 8, 8], strides = [1, 1, 1, 1]} : vector<1x10x10x8xf32> to vector<1x8x8x8xf32>
    %65 = vector.shape_cast %64 : vector<1x8x8x8xf32> to vector<64x8xf32>
    %66 = vector.extract_strided_slice %53 {offsets = [0, 2, 0, 0], sizes = [1, 8, 8, 8], strides = [1, 1, 1, 1]} : vector<1x10x10x8xf32> to vector<1x8x8x8xf32>
    %67 = vector.shape_cast %66 : vector<1x8x8x8xf32> to vector<64x8xf32>
    %68 = vector.extract_strided_slice %53 {offsets = [0, 2, 1, 0], sizes = [1, 8, 8, 8], strides = [1, 1, 1, 1]} : vector<1x10x10x8xf32> to vector<1x8x8x8xf32>
    %69 = vector.shape_cast %68 : vector<1x8x8x8xf32> to vector<64x8xf32>
    %70 = vector.extract_strided_slice %53 {offsets = [0, 2, 2, 0], sizes = [1, 8, 8, 8], strides = [1, 1, 1, 1]} : vector<1x10x10x8xf32> to vector<1x8x8x8xf32>
    %71 = vector.shape_cast %70 : vector<1x8x8x8xf32> to vector<64x8xf32>
    %72 = tpu.concatenate %55, %57, %59, %61, %63, %65, %67, %69, %71 in 1 : vector<64x8xf32>, vector<64x8xf32>, vector<64x8xf32>, vector<64x8xf32>, vector<64x8xf32>, vector<64x8xf32>, vector<64x8xf32>, vector<64x8xf32>, vector<64x8xf32> -> vector<64x72xf32>
    %c0_24 = arith.constant 0 : index
    %c0_25 = arith.constant 0 : index
    %73 = vector.load %arg4[%c0_24, %c0_25] : memref<72x8xf32, #tpu.memory_space<vmem>>, vector<72x8xf32>
    %cst_26 = arith.constant dense<0.000000e+00> : vector<64x8xf32>
    %74 = tpu.matmul %72, %73, %cst_26 {dimension_numbers = #tpu.dot_dimension_numbers<[1], [0], [0], [1], [0, 0, 1, 1], [], []>} : vector<64x72xf32>, vector<72x8xf32>, vector<64x8xf32> -> vector<64x8xf32>
    %c0_27 = arith.constant 0 : index
    %c0_28 = arith.constant 0 : index
    %75 = vector.load %arg5[%c0_27, %c0_28] : memref<1x8xf32, #tpu.memory_space<vmem>>, vector<1x8xf32>
    %76 = vector.broadcast %75 : vector<1x8xf32> to vector<64x8xf32>
    %77 = arith.addf %74, %76 : vector<64x8xf32>
    %c0_29 = arith.constant 0 : index
    %c0_30 = arith.constant 0 : index
    %78 = vector.load %arg7[%c0_29, %c0_30] : memref<64x8xf32, #tpu.memory_space<vmem>>, vector<64x8xf32>
    tpu.vector_store %arg7[%c0_29, %c0_30], %77 {strides = array<i32>} : memref<64x8xf32, #tpu.memory_space<vmem>>, vector<64x8xf32>,
    return
  }
  func.func @transform_0(%arg0: i32) -> (i32, i32) {
    %c0_i32 = arith.constant 0 : i32
    %c0_i32_0 = arith.constant 0 : i32
    return %arg0, %c0_i32 : i32, i32
  }
  func.func @transform_1(%arg0: i32) -> (i32, i32) {
    %c0_i32 = arith.constant 0 : i32
    %c0_i32_0 = arith.constant 0 : i32
    %c0_i32_1 = arith.constant 0 : i32
    return %c0_i32, %c0_i32_0 : i32, i32
  }
  func.func @transform_2(%arg0: i32) -> (i32, i32) {
    %c0_i32 = arith.constant 0 : i32
    %c0_i32_0 = arith.constant 0 : i32
    %c0_i32_1 = arith.constant 0 : i32
    return %c0_i32, %c0_i32_0 : i32, i32
  }
  func.func @transform_3(%arg0: i32) -> (i32, i32) {
    %c0_i32 = arith.constant 0 : i32
    %c0_i32_0 = arith.constant 0 : i32
    %c0_i32_1 = arith.constant 0 : i32
    return %c0_i32, %c0_i32_0 : i32, i32
  }
  func.func @transform_4(%arg0: i32) -> (i32, i32) {
    %c0_i32 = arith.constant 0 : i32
    %c0_i32_0 = arith.constant 0 : i32
    %c0_i32_1 = arith.constant 0 : i32
    return %c0_i32, %c0_i32_0 : i32, i32
  }
  func.func @transform_5(%arg0: i32) -> (i32, i32) {
    %c0_i32 = arith.constant 0 : i32
    %c0_i32_0 = arith.constant 0 : i32
    return %arg0, %c0_i32 : i32, i32
  }
  func.func @transform_6(%arg0: i32) -> (i32, i32) {
    %c0_i32 = arith.constant 0 : i32
    %c0_i32_0 = arith.constant 0 : i32
    return %arg0, %c0_i32 : i32, i32
  }
}

module attributes {stable_mosaic.version = 11 : i64} {
  func.func @_conv1_pool_kernel(%arg0: i32, %arg1: memref<1x9x9x4xf32, #tpu.memory_space<vmem>>, %arg2: memref<1x9x9x4xf32, #tpu.memory_space<vmem>>, %arg3: memref<1x9x9x4xf32, #tpu.memory_space<vmem>>, %arg4: memref<1x9x9x4xf32, #tpu.memory_space<vmem>>, %arg5: memref<36x8xf32, #tpu.memory_space<vmem>>, %arg6: memref<1x8xf32, #tpu.memory_space<vmem>>, %arg7: memref<64x8xf32, #tpu.memory_space<vmem>>) attributes {dimension_semantics = [#tpu.dimension_semantics<parallel>], iteration_bounds = array<i64: 2>, scalar_prefetch = 0 : i64, scratch_operands = 0 : i64, tpu.core_type = #tpu.core_type<tc>, window_params = [{transform_indices = @transform_0, window_bounds = array<i64: 1, 9, 9, 4>}, {transform_indices = @transform_1, window_bounds = array<i64: 1, 9, 9, 4>}, {transform_indices = @transform_2, window_bounds = array<i64: 1, 9, 9, 4>}, {transform_indices = @transform_3, window_bounds = array<i64: 1, 9, 9, 4>}, {pipeline_mode = #tpu.pipeline_mode<synchronous>, transform_indices = @transform_4, window_bounds = array<i64: 36, 8>}, {pipeline_mode = #tpu.pipeline_mode<synchronous>, transform_indices = @transform_5, window_bounds = array<i64: 1, 8>}, {transform_indices = @transform_6, window_bounds = array<i64: 64, 8>}]} {
    %c0 = arith.constant 0 : index
    %c0_0 = arith.constant 0 : index
    %c0_1 = arith.constant 0 : index
    %c0_2 = arith.constant 0 : index
    %0 = vector.load %arg1[%c0, %c0_0, %c0_1, %c0_2] : memref<1x9x9x4xf32, #tpu.memory_space<vmem>>, vector<1x9x9x4xf32>
    %c0_3 = arith.constant 0 : index
    %c0_4 = arith.constant 0 : index
    %c0_5 = arith.constant 0 : index
    %c0_6 = arith.constant 0 : index
    %1 = vector.load %arg2[%c0_3, %c0_4, %c0_5, %c0_6] : memref<1x9x9x4xf32, #tpu.memory_space<vmem>>, vector<1x9x9x4xf32>
    %c0_7 = arith.constant 0 : index
    %c0_8 = arith.constant 0 : index
    %c0_9 = arith.constant 0 : index
    %c0_10 = arith.constant 0 : index
    %2 = vector.load %arg3[%c0_7, %c0_8, %c0_9, %c0_10] : memref<1x9x9x4xf32, #tpu.memory_space<vmem>>, vector<1x9x9x4xf32>
    %c0_11 = arith.constant 0 : index
    %c0_12 = arith.constant 0 : index
    %c0_13 = arith.constant 0 : index
    %c0_14 = arith.constant 0 : index
    %3 = vector.load %arg4[%c0_11, %c0_12, %c0_13, %c0_14] : memref<1x9x9x4xf32, #tpu.memory_space<vmem>>, vector<1x9x9x4xf32>
    %c0_15 = arith.constant 0 : index
    %c0_16 = arith.constant 0 : index
    %4 = vector.load %arg5[%c0_15, %c0_16] : memref<36x8xf32, #tpu.memory_space<vmem>>, vector<36x8xf32>
    %5 = vector.extract_strided_slice %0 {offsets = [0, 0, 0, 0], sizes = [1, 8, 8, 4], strides = [1, 1, 1, 1]} : vector<1x9x9x4xf32> to vector<1x8x8x4xf32>
    %6 = vector.shape_cast %5 : vector<1x8x8x4xf32> to vector<64x4xf32>
    %7 = vector.extract_strided_slice %1 {offsets = [0, 0, 0, 0], sizes = [1, 8, 8, 4], strides = [1, 1, 1, 1]} : vector<1x9x9x4xf32> to vector<1x8x8x4xf32>
    %8 = vector.shape_cast %7 : vector<1x8x8x4xf32> to vector<64x4xf32>
    %9 = vector.extract_strided_slice %0 {offsets = [0, 0, 1, 0], sizes = [1, 8, 8, 4], strides = [1, 1, 1, 1]} : vector<1x9x9x4xf32> to vector<1x8x8x4xf32>
    %10 = vector.shape_cast %9 : vector<1x8x8x4xf32> to vector<64x4xf32>
    %11 = vector.extract_strided_slice %2 {offsets = [0, 0, 0, 0], sizes = [1, 8, 8, 4], strides = [1, 1, 1, 1]} : vector<1x9x9x4xf32> to vector<1x8x8x4xf32>
    %12 = vector.shape_cast %11 : vector<1x8x8x4xf32> to vector<64x4xf32>
    %13 = vector.extract_strided_slice %3 {offsets = [0, 0, 0, 0], sizes = [1, 8, 8, 4], strides = [1, 1, 1, 1]} : vector<1x9x9x4xf32> to vector<1x8x8x4xf32>
    %14 = vector.shape_cast %13 : vector<1x8x8x4xf32> to vector<64x4xf32>
    %15 = vector.extract_strided_slice %2 {offsets = [0, 0, 1, 0], sizes = [1, 8, 8, 4], strides = [1, 1, 1, 1]} : vector<1x9x9x4xf32> to vector<1x8x8x4xf32>
    %16 = vector.shape_cast %15 : vector<1x8x8x4xf32> to vector<64x4xf32>
    %17 = vector.extract_strided_slice %0 {offsets = [0, 1, 0, 0], sizes = [1, 8, 8, 4], strides = [1, 1, 1, 1]} : vector<1x9x9x4xf32> to vector<1x8x8x4xf32>
    %18 = vector.shape_cast %17 : vector<1x8x8x4xf32> to vector<64x4xf32>
    %19 = vector.extract_strided_slice %1 {offsets = [0, 1, 0, 0], sizes = [1, 8, 8, 4], strides = [1, 1, 1, 1]} : vector<1x9x9x4xf32> to vector<1x8x8x4xf32>
    %20 = vector.shape_cast %19 : vector<1x8x8x4xf32> to vector<64x4xf32>
    %21 = vector.extract_strided_slice %0 {offsets = [0, 1, 1, 0], sizes = [1, 8, 8, 4], strides = [1, 1, 1, 1]} : vector<1x9x9x4xf32> to vector<1x8x8x4xf32>
    %22 = vector.shape_cast %21 : vector<1x8x8x4xf32> to vector<64x4xf32>
    %23 = tpu.concatenate %6, %8, %10, %12, %14, %16, %18, %20, %22 in 1 : vector<64x4xf32>, vector<64x4xf32>, vector<64x4xf32>, vector<64x4xf32>, vector<64x4xf32>, vector<64x4xf32>, vector<64x4xf32>, vector<64x4xf32>, vector<64x4xf32> -> vector<64x36xf32>
    %cst = arith.constant dense<0.000000e+00> : vector<64x8xf32>
    %24 = tpu.matmul %23, %4, %cst {dimension_numbers = #tpu.dot_dimension_numbers<[1], [0], [0], [1], [0, 0, 1, 1], [], []>} : vector<64x36xf32>, vector<36x8xf32>, vector<64x8xf32> -> vector<64x8xf32>
    %25 = vector.extract_strided_slice %1 {offsets = [0, 0, 0, 0], sizes = [1, 8, 8, 4], strides = [1, 1, 1, 1]} : vector<1x9x9x4xf32> to vector<1x8x8x4xf32>
    %26 = vector.shape_cast %25 : vector<1x8x8x4xf32> to vector<64x4xf32>
    %27 = vector.extract_strided_slice %0 {offsets = [0, 0, 1, 0], sizes = [1, 8, 8, 4], strides = [1, 1, 1, 1]} : vector<1x9x9x4xf32> to vector<1x8x8x4xf32>
    %28 = vector.shape_cast %27 : vector<1x8x8x4xf32> to vector<64x4xf32>
    %29 = vector.extract_strided_slice %1 {offsets = [0, 0, 1, 0], sizes = [1, 8, 8, 4], strides = [1, 1, 1, 1]} : vector<1x9x9x4xf32> to vector<1x8x8x4xf32>
    %30 = vector.shape_cast %29 : vector<1x8x8x4xf32> to vector<64x4xf32>
    %31 = vector.extract_strided_slice %3 {offsets = [0, 0, 0, 0], sizes = [1, 8, 8, 4], strides = [1, 1, 1, 1]} : vector<1x9x9x4xf32> to vector<1x8x8x4xf32>
    %32 = vector.shape_cast %31 : vector<1x8x8x4xf32> to vector<64x4xf32>
    %33 = vector.extract_strided_slice %2 {offsets = [0, 0, 1, 0], sizes = [1, 8, 8, 4], strides = [1, 1, 1, 1]} : vector<1x9x9x4xf32> to vector<1x8x8x4xf32>
    %34 = vector.shape_cast %33 : vector<1x8x8x4xf32> to vector<64x4xf32>
    %35 = vector.extract_strided_slice %3 {offsets = [0, 0, 1, 0], sizes = [1, 8, 8, 4], strides = [1, 1, 1, 1]} : vector<1x9x9x4xf32> to vector<1x8x8x4xf32>
    %36 = vector.shape_cast %35 : vector<1x8x8x4xf32> to vector<64x4xf32>
    %37 = vector.extract_strided_slice %1 {offsets = [0, 1, 0, 0], sizes = [1, 8, 8, 4], strides = [1, 1, 1, 1]} : vector<1x9x9x4xf32> to vector<1x8x8x4xf32>
    %38 = vector.shape_cast %37 : vector<1x8x8x4xf32> to vector<64x4xf32>
    %39 = vector.extract_strided_slice %0 {offsets = [0, 1, 1, 0], sizes = [1, 8, 8, 4], strides = [1, 1, 1, 1]} : vector<1x9x9x4xf32> to vector<1x8x8x4xf32>
    %40 = vector.shape_cast %39 : vector<1x8x8x4xf32> to vector<64x4xf32>
    %41 = vector.extract_strided_slice %1 {offsets = [0, 1, 1, 0], sizes = [1, 8, 8, 4], strides = [1, 1, 1, 1]} : vector<1x9x9x4xf32> to vector<1x8x8x4xf32>
    %42 = vector.shape_cast %41 : vector<1x8x8x4xf32> to vector<64x4xf32>
    %43 = tpu.concatenate %26, %28, %30, %32, %34, %36, %38, %40, %42 in 1 : vector<64x4xf32>, vector<64x4xf32>, vector<64x4xf32>, vector<64x4xf32>, vector<64x4xf32>, vector<64x4xf32>, vector<64x4xf32>, vector<64x4xf32>, vector<64x4xf32> -> vector<64x36xf32>
    %cst_17 = arith.constant dense<0.000000e+00> : vector<64x8xf32>
    %44 = tpu.matmul %43, %4, %cst_17 {dimension_numbers = #tpu.dot_dimension_numbers<[1], [0], [0], [1], [0, 0, 1, 1], [], []>} : vector<64x36xf32>, vector<36x8xf32>, vector<64x8xf32> -> vector<64x8xf32>
    %45 = arith.maximumf %24, %44 : vector<64x8xf32>
    %46 = vector.extract_strided_slice %2 {offsets = [0, 0, 0, 0], sizes = [1, 8, 8, 4], strides = [1, 1, 1, 1]} : vector<1x9x9x4xf32> to vector<1x8x8x4xf32>
    %47 = vector.shape_cast %46 : vector<1x8x8x4xf32> to vector<64x4xf32>
    %48 = vector.extract_strided_slice %3 {offsets = [0, 0, 0, 0], sizes = [1, 8, 8, 4], strides = [1, 1, 1, 1]} : vector<1x9x9x4xf32> to vector<1x8x8x4xf32>
    %49 = vector.shape_cast %48 : vector<1x8x8x4xf32> to vector<64x4xf32>
    %50 = vector.extract_strided_slice %2 {offsets = [0, 0, 1, 0], sizes = [1, 8, 8, 4], strides = [1, 1, 1, 1]} : vector<1x9x9x4xf32> to vector<1x8x8x4xf32>
    %51 = vector.shape_cast %50 : vector<1x8x8x4xf32> to vector<64x4xf32>
    %52 = vector.extract_strided_slice %0 {offsets = [0, 1, 0, 0], sizes = [1, 8, 8, 4], strides = [1, 1, 1, 1]} : vector<1x9x9x4xf32> to vector<1x8x8x4xf32>
    %53 = vector.shape_cast %52 : vector<1x8x8x4xf32> to vector<64x4xf32>
    %54 = vector.extract_strided_slice %1 {offsets = [0, 1, 0, 0], sizes = [1, 8, 8, 4], strides = [1, 1, 1, 1]} : vector<1x9x9x4xf32> to vector<1x8x8x4xf32>
    %55 = vector.shape_cast %54 : vector<1x8x8x4xf32> to vector<64x4xf32>
    %56 = vector.extract_strided_slice %0 {offsets = [0, 1, 1, 0], sizes = [1, 8, 8, 4], strides = [1, 1, 1, 1]} : vector<1x9x9x4xf32> to vector<1x8x8x4xf32>
    %57 = vector.shape_cast %56 : vector<1x8x8x4xf32> to vector<64x4xf32>
    %58 = vector.extract_strided_slice %2 {offsets = [0, 1, 0, 0], sizes = [1, 8, 8, 4], strides = [1, 1, 1, 1]} : vector<1x9x9x4xf32> to vector<1x8x8x4xf32>
    %59 = vector.shape_cast %58 : vector<1x8x8x4xf32> to vector<64x4xf32>
    %60 = vector.extract_strided_slice %3 {offsets = [0, 1, 0, 0], sizes = [1, 8, 8, 4], strides = [1, 1, 1, 1]} : vector<1x9x9x4xf32> to vector<1x8x8x4xf32>
    %61 = vector.shape_cast %60 : vector<1x8x8x4xf32> to vector<64x4xf32>
    %62 = vector.extract_strided_slice %2 {offsets = [0, 1, 1, 0], sizes = [1, 8, 8, 4], strides = [1, 1, 1, 1]} : vector<1x9x9x4xf32> to vector<1x8x8x4xf32>
    %63 = vector.shape_cast %62 : vector<1x8x8x4xf32> to vector<64x4xf32>
    %64 = tpu.concatenate %47, %49, %51, %53, %55, %57, %59, %61, %63 in 1 : vector<64x4xf32>, vector<64x4xf32>, vector<64x4xf32>, vector<64x4xf32>, vector<64x4xf32>, vector<64x4xf32>, vector<64x4xf32>, vector<64x4xf32>, vector<64x4xf32> -> vector<64x36xf32>
    %cst_18 = arith.constant dense<0.000000e+00> : vector<64x8xf32>
    %65 = tpu.matmul %64, %4, %cst_18 {dimension_numbers = #tpu.dot_dimension_numbers<[1], [0], [0], [1], [0, 0, 1, 1], [], []>} : vector<64x36xf32>, vector<36x8xf32>, vector<64x8xf32> -> vector<64x8xf32>
    %66 = arith.maximumf %45, %65 : vector<64x8xf32>
    %67 = vector.extract_strided_slice %3 {offsets = [0, 0, 0, 0], sizes = [1, 8, 8, 4], strides = [1, 1, 1, 1]} : vector<1x9x9x4xf32> to vector<1x8x8x4xf32>
    %68 = vector.shape_cast %67 : vector<1x8x8x4xf32> to vector<64x4xf32>
    %69 = vector.extract_strided_slice %2 {offsets = [0, 0, 1, 0], sizes = [1, 8, 8, 4], strides = [1, 1, 1, 1]} : vector<1x9x9x4xf32> to vector<1x8x8x4xf32>
    %70 = vector.shape_cast %69 : vector<1x8x8x4xf32> to vector<64x4xf32>
    %71 = vector.extract_strided_slice %3 {offsets = [0, 0, 1, 0], sizes = [1, 8, 8, 4], strides = [1, 1, 1, 1]} : vector<1x9x9x4xf32> to vector<1x8x8x4xf32>
    %72 = vector.shape_cast %71 : vector<1x8x8x4xf32> to vector<64x4xf32>
    %73 = vector.extract_strided_slice %1 {offsets = [0, 1, 0, 0], sizes = [1, 8, 8, 4], strides = [1, 1, 1, 1]} : vector<1x9x9x4xf32> to vector<1x8x8x4xf32>
    %74 = vector.shape_cast %73 : vector<1x8x8x4xf32> to vector<64x4xf32>
    %75 = vector.extract_strided_slice %0 {offsets = [0, 1, 1, 0], sizes = [1, 8, 8, 4], strides = [1, 1, 1, 1]} : vector<1x9x9x4xf32> to vector<1x8x8x4xf32>
    %76 = vector.shape_cast %75 : vector<1x8x8x4xf32> to vector<64x4xf32>
    %77 = vector.extract_strided_slice %1 {offsets = [0, 1, 1, 0], sizes = [1, 8, 8, 4], strides = [1, 1, 1, 1]} : vector<1x9x9x4xf32> to vector<1x8x8x4xf32>
    %78 = vector.shape_cast %77 : vector<1x8x8x4xf32> to vector<64x4xf32>
    %79 = vector.extract_strided_slice %3 {offsets = [0, 1, 0, 0], sizes = [1, 8, 8, 4], strides = [1, 1, 1, 1]} : vector<1x9x9x4xf32> to vector<1x8x8x4xf32>
    %80 = vector.shape_cast %79 : vector<1x8x8x4xf32> to vector<64x4xf32>
    %81 = vector.extract_strided_slice %2 {offsets = [0, 1, 1, 0], sizes = [1, 8, 8, 4], strides = [1, 1, 1, 1]} : vector<1x9x9x4xf32> to vector<1x8x8x4xf32>
    %82 = vector.shape_cast %81 : vector<1x8x8x4xf32> to vector<64x4xf32>
    %83 = vector.extract_strided_slice %3 {offsets = [0, 1, 1, 0], sizes = [1, 8, 8, 4], strides = [1, 1, 1, 1]} : vector<1x9x9x4xf32> to vector<1x8x8x4xf32>
    %84 = vector.shape_cast %83 : vector<1x8x8x4xf32> to vector<64x4xf32>
    %85 = tpu.concatenate %68, %70, %72, %74, %76, %78, %80, %82, %84 in 1 : vector<64x4xf32>, vector<64x4xf32>, vector<64x4xf32>, vector<64x4xf32>, vector<64x4xf32>, vector<64x4xf32>, vector<64x4xf32>, vector<64x4xf32>, vector<64x4xf32> -> vector<64x36xf32>
    %cst_19 = arith.constant dense<0.000000e+00> : vector<64x8xf32>
    %86 = tpu.matmul %85, %4, %cst_19 {dimension_numbers = #tpu.dot_dimension_numbers<[1], [0], [0], [1], [0, 0, 1, 1], [], []>} : vector<64x36xf32>, vector<36x8xf32>, vector<64x8xf32> -> vector<64x8xf32>
    %87 = arith.maximumf %66, %86 : vector<64x8xf32>
    %c0_20 = arith.constant 0 : index
    %c0_21 = arith.constant 0 : index
    %88 = vector.load %arg6[%c0_20, %c0_21] : memref<1x8xf32, #tpu.memory_space<vmem>>, vector<1x8xf32>
    %89 = vector.broadcast %88 : vector<1x8xf32> to vector<64x8xf32>
    %90 = arith.addf %87, %89 : vector<64x8xf32>
    %c0_22 = arith.constant 0 : index
    %c0_23 = arith.constant 0 : index
    %91 = vector.load %arg7[%c0_22, %c0_23] : memref<64x8xf32, #tpu.memory_space<vmem>>, vector<64x8xf32>
    tpu.vector_store %arg7[%c0_22, %c0_23], %90 {strides = array<i32>} : memref<64x8xf32, #tpu.memory_space<vmem>>, vector<64x8xf32>,
    return
  }
  func.func @transform_0(%arg0: i32) -> (i32, i32, i32, i32) {
    %c0_i32 = arith.constant 0 : i32
    %c0_i32_0 = arith.constant 0 : i32
    %c0_i32_1 = arith.constant 0 : i32
    %c0_i32_2 = arith.constant 0 : i32
    return %arg0, %c0_i32, %c0_i32_0, %c0_i32_1 : i32, i32, i32, i32
  }
  func.func @transform_1(%arg0: i32) -> (i32, i32, i32, i32) {
    %c0_i32 = arith.constant 0 : i32
    %c0_i32_0 = arith.constant 0 : i32
    %c0_i32_1 = arith.constant 0 : i32
    %c0_i32_2 = arith.constant 0 : i32
    return %arg0, %c0_i32, %c0_i32_0, %c0_i32_1 : i32, i32, i32, i32
  }
  func.func @transform_2(%arg0: i32) -> (i32, i32, i32, i32) {
    %c0_i32 = arith.constant 0 : i32
    %c0_i32_0 = arith.constant 0 : i32
    %c0_i32_1 = arith.constant 0 : i32
    %c0_i32_2 = arith.constant 0 : i32
    return %arg0, %c0_i32, %c0_i32_0, %c0_i32_1 : i32, i32, i32, i32
  }
  func.func @transform_3(%arg0: i32) -> (i32, i32, i32, i32) {
    %c0_i32 = arith.constant 0 : i32
    %c0_i32_0 = arith.constant 0 : i32
    %c0_i32_1 = arith.constant 0 : i32
    %c0_i32_2 = arith.constant 0 : i32
    return %arg0, %c0_i32, %c0_i32_0, %c0_i32_1 : i32, i32, i32, i32
  }
  func.func @transform_4(%arg0: i32) -> (i32, i32) {
    %c0_i32 = arith.constant 0 : i32
    %c0_i32_0 = arith.constant 0 : i32
    %c0_i32_1 = arith.constant 0 : i32
    return %c0_i32, %c0_i32_0 : i32, i32
  }
  func.func @transform_5(%arg0: i32) -> (i32, i32) {
    %c0_i32 = arith.constant 0 : i32
    %c0_i32_0 = arith.constant 0 : i32
    %c0_i32_1 = arith.constant 0 : i32
    return %c0_i32, %c0_i32_0 : i32, i32
  }
  func.func @transform_6(%arg0: i32) -> (i32, i32) {
    %c0_i32 = arith.constant 0 : i32
    %c0_i32_0 = arith.constant 0 : i32
    return %arg0, %c0_i32 : i32, i32
  }
}

module attributes {stable_mosaic.version = 11 : i64} {
  func.func @_bn2_residual_gelu_kernel(%arg0: i32, %arg1: memref<1x8x64xf32, #tpu.memory_space<vmem>>, %arg2: memref<1x8x64xf32, #tpu.memory_space<vmem>>, %arg3: memref<1x1x64xf32, #tpu.memory_space<vmem>>, %arg4: memref<1x1x64xf32, #tpu.memory_space<vmem>>, %arg5: memref<1x8x64xf32, #tpu.memory_space<vmem>>) attributes {dimension_semantics = [#tpu.dimension_semantics<parallel>], iteration_bounds = array<i64: 2>, scalar_prefetch = 0 : i64, scratch_operands = 0 : i64, tpu.core_type = #tpu.core_type<tc>, window_params = [{transform_indices = @transform_0, window_bounds = array<i64: 1, 8, 64>}, {transform_indices = @transform_1, window_bounds = array<i64: 1, 8, 64>}, {pipeline_mode = #tpu.pipeline_mode<synchronous>, transform_indices = @transform_2, window_bounds = array<i64: 1, 1, 64>}, {pipeline_mode = #tpu.pipeline_mode<synchronous>, transform_indices = @transform_3, window_bounds = array<i64: 1, 1, 64>}, {transform_indices = @transform_4, window_bounds = array<i64: 1, 8, 64>}]} {
    %c0 = arith.constant 0 : index
    %c0_0 = arith.constant 0 : index
    %c0_1 = arith.constant 0 : index
    %0 = vector.load %arg1[%c0, %c0_0, %c0_1] : memref<1x8x64xf32, #tpu.memory_space<vmem>>, vector<1x8x64xf32>
    %c0_2 = arith.constant 0 : index
    %c0_3 = arith.constant 0 : index
    %c0_4 = arith.constant 0 : index
    %1 = vector.load %arg2[%c0_2, %c0_3, %c0_4] : memref<1x8x64xf32, #tpu.memory_space<vmem>>, vector<1x8x64xf32>
    %c0_5 = arith.constant 0 : index
    %c0_6 = arith.constant 0 : index
    %c0_7 = arith.constant 0 : index
    %2 = vector.load %arg3[%c0_5, %c0_6, %c0_7] : memref<1x1x64xf32, #tpu.memory_space<vmem>>, vector<1x1x64xf32>
    %3 = vector.broadcast %2 : vector<1x1x64xf32> to vector<1x8x64xf32>
    %4 = arith.mulf %1, %3 : vector<1x8x64xf32>
    %c0_8 = arith.constant 0 : index
    %c0_9 = arith.constant 0 : index
    %c0_10 = arith.constant 0 : index
    %5 = vector.load %arg4[%c0_8, %c0_9, %c0_10] : memref<1x1x64xf32, #tpu.memory_space<vmem>>, vector<1x1x64xf32>
    %6 = vector.broadcast %5 : vector<1x1x64xf32> to vector<1x8x64xf32>
    %7 = arith.addf %4, %6 : vector<1x8x64xf32>
    %8 = arith.addf %0, %7 : vector<1x8x64xf32>
    %cst = arith.constant 5.000000e-01 : f32
    %9 = vector.broadcast %cst : f32 to vector<1x8x64xf32>
    %10 = arith.mulf %9, %8 : vector<1x8x64xf32>
    %cst_11 = arith.constant 0.707106769 : f32
    %11 = vector.broadcast %cst_11 : f32 to vector<1x8x64xf32>
    %12 = arith.mulf %8, %11 : vector<1x8x64xf32>
    %cst_12 = arith.constant 0.000000e+00 : f32
    %13 = vector.broadcast %cst_12 : f32 to vector<1x8x64xf32>
    %14 = arith.cmpf oge, %12, %13 : vector<1x8x64xf32>
    %cst_13 = arith.constant 1.000000e+00 : f32
    %cst_14 = arith.constant -1.000000e+00 : f32
    %15 = vector.broadcast %cst_13 : f32 to vector<1x8x64xf32>
    %16 = vector.broadcast %cst_14 : f32 to vector<1x8x64xf32>
    %17 = arith.select %14, %15, %16 : vector<1x8x64xi1>, vector<1x8x64xf32>
    %18 = math.absf %12 : vector<1x8x64xf32>
    %cst_15 = arith.constant 0.327591091 : f32
    %19 = vector.broadcast %cst_15 : f32 to vector<1x8x64xf32>
    %20 = arith.mulf %19, %18 : vector<1x8x64xf32>
    %cst_16 = arith.constant 1.000000e+00 : f32
    %21 = vector.broadcast %cst_16 : f32 to vector<1x8x64xf32>
    %22 = arith.addf %21, %20 : vector<1x8x64xf32>
    %cst_17 = arith.constant 1.000000e+00 : f32
    %23 = vector.broadcast %cst_17 : f32 to vector<1x8x64xf32>
    %24 = arith.divf %23, %22 : vector<1x8x64xf32>
    %cst_18 = arith.constant 1.06140542 : f32
    %25 = vector.broadcast %cst_18 : f32 to vector<1x8x64xf32>
    %26 = arith.mulf %25, %24 : vector<1x8x64xf32>
    %cst_19 = arith.constant -1.45315206 : f32
    %27 = vector.broadcast %cst_19 : f32 to vector<1x8x64xf32>
    %28 = arith.addf %26, %27 : vector<1x8x64xf32>
    %29 = arith.mulf %28, %24 : vector<1x8x64xf32>
    %cst_20 = arith.constant 1.42141378 : f32
    %30 = vector.broadcast %cst_20 : f32 to vector<1x8x64xf32>
    %31 = arith.addf %29, %30 : vector<1x8x64xf32>
    %32 = arith.mulf %31, %24 : vector<1x8x64xf32>
    %cst_21 = arith.constant -0.284496725 : f32
    %33 = vector.broadcast %cst_21 : f32 to vector<1x8x64xf32>
    %34 = arith.addf %32, %33 : vector<1x8x64xf32>
    %35 = arith.mulf %34, %24 : vector<1x8x64xf32>
    %cst_22 = arith.constant 0.254829586 : f32
    %36 = vector.broadcast %cst_22 : f32 to vector<1x8x64xf32>
    %37 = arith.addf %35, %36 : vector<1x8x64xf32>
    %38 = arith.mulf %37, %24 : vector<1x8x64xf32>
    %cst_23 = arith.constant 0.000000e+00 : f32
    %39 = vector.broadcast %cst_23 : f32 to vector<1x8x64xf32>
    %40 = arith.subf %39, %18 : vector<1x8x64xf32>
    %41 = arith.mulf %40, %18 : vector<1x8x64xf32>
    %42 = math.exp %41 : vector<1x8x64xf32>
    %43 = arith.mulf %38, %42 : vector<1x8x64xf32>
    %cst_24 = arith.constant 1.000000e+00 : f32
    %44 = vector.broadcast %cst_24 : f32 to vector<1x8x64xf32>
    %45 = arith.subf %44, %43 : vector<1x8x64xf32>
    %46 = arith.mulf %17, %45 : vector<1x8x64xf32>
    %cst_25 = arith.constant 1.000000e+00 : f32
    %47 = vector.broadcast %cst_25 : f32 to vector<1x8x64xf32>
    %48 = arith.addf %47, %46 : vector<1x8x64xf32>
    %49 = arith.mulf %10, %48 : vector<1x8x64xf32>
    %c0_26 = arith.constant 0 : index
    %c0_27 = arith.constant 0 : index
    %c0_28 = arith.constant 0 : index
    %50 = vector.load %arg5[%c0_26, %c0_27, %c0_28] : memref<1x8x64xf32, #tpu.memory_space<vmem>>, vector<1x8x64xf32>
    tpu.vector_store %arg5[%c0_26, %c0_27, %c0_28], %49 {strides = array<i32>} : memref<1x8x64xf32, #tpu.memory_space<vmem>>, vector<1x8x64xf32>,
    return
  }
  func.func @transform_0(%arg0: i32) -> (i32, i32, i32) {
    %c0_i32 = arith.constant 0 : i32
    %c0_i32_0 = arith.constant 0 : i32
    %c0_i32_1 = arith.constant 0 : i32
    return %arg0, %c0_i32, %c0_i32_0 : i32, i32, i32
  }
  func.func @transform_1(%arg0: i32) -> (i32, i32, i32) {
    %c0_i32 = arith.constant 0 : i32
    %c0_i32_0 = arith.constant 0 : i32
    %c0_i32_1 = arith.constant 0 : i32
    return %arg0, %c0_i32, %c0_i32_0 : i32, i32, i32
  }
  func.func @transform_2(%arg0: i32) -> (i32, i32, i32) {
    %c0_i32 = arith.constant 0 : i32
    %c0_i32_0 = arith.constant 0 : i32
    %c0_i32_1 = arith.constant 0 : i32
    %c0_i32_2 = arith.constant 0 : i32
    return %c0_i32, %c0_i32_0, %c0_i32_1 : i32, i32, i32
  }
  func.func @transform_3(%arg0: i32) -> (i32, i32, i32) {
    %c0_i32 = arith.constant 0 : i32
    %c0_i32_0 = arith.constant 0 : i32
    %c0_i32_1 = arith.constant 0 : i32
    %c0_i32_2 = arith.constant 0 : i32
    return %c0_i32, %c0_i32_0, %c0_i32_1 : i32, i32, i32
  }
  func.func @transform_4(%arg0: i32) -> (i32, i32, i32) {
    %c0_i32 = arith.constant 0 : i32
    %c0_i32_0 = arith.constant 0 : i32
    %c0_i32_1 = arith.constant 0 : i32
    return %arg0, %c0_i32, %c0_i32_0 : i32, i32, i32
  }
}

</mosaic_0001>

<bundles_post_ra>
// kernel: tile.13
= control target key start
LH: loop header
LB: loop body
LE: loop exit
PB: predicated region body
PF: predicated region fallthrough
CT: control target
= control target key end

     0   :  { %s22_s0 = inlined_call_operand.vmem [shape: f32[8], index: 0, kind: input, shape index: {}]   ;;  %s23_s1 = inlined_call_operand.vmem [shape: f32[8,8], index: 1, kind: output, shape index: {}]  }
   0x1   :  { %v4_v0 = vld [vmem:[%s22_s0] ss:$0 sm:$0xff] }
   0x2   :  { %5 = vst [vmem:[%s23_s1] sm:$0xff] %v4_v0 }

// kernel: tile.14
= control target key start
LH: loop header
LB: loop body
LE: loop exit
PB: predicated region body
PF: predicated region fallthrough
CT: control target
= control target key end

     0   :  { %s67_s10 = smov 56   ;;  %s68_s11 = smov 40   ;;  %vm3_vm0 = vcmask 64512   ;;  %vm9_vm1 = vcmask 523712   ;;  %vm15_vm2 = vcmask 458112   ;;  %vm21_vm3 = vcmask 392512   ;;  %s111_s0 = inlined_call_operand.vmem [shape: f32[8,8], index: 0, kind: input, shape index: {}]   ;;  %s112_s1 = inlined_call_operand.vmem [shape: f32[1,1,64], index: 1, kind: output, shape index: {}]  }
   0x1   :  { %v53_v0 = vld [vmem:[%s111_s0 + $0x7] sm:$0x1]   ;;  %v55_v1 = vld [vmem:[%s111_s0 + $0x5] sm:$0x1]   ;;  %v54_v2 = vld [vmem:[%s111_s0 + $0x6] sm:$0x1]  }
   0x2   :  { %7 = vrot.lane.b32.xlu0 %v53_v0, %s67_s10  ;;  %19 = vrot.lane.b32.xlu1 %v55_v1, %s68_s11  ;;  %v56_v3 = vld [vmem:[%s111_s0 + $0x4] sm:$0x1]   ;;  %v2_v4 = vld [vmem:[%s111_s0] sm:$0x1]   ;;  %s69_s18 = smov 48   ;;  %s70_s19 = smov 32  }
   0x3   :  { %4 = vst.msk [vmem:[#allocation0] sm:$0x1] %vm3_vm0, %v2_v4   ;;  %v57_v5 = vld [vmem:[%s111_s0 + $0x3] sm:$0x1]   ;;  %v58_v6 = vld [vmem:[%s111_s0 + $0x2] sm:$0x1]  }
   0x4   :  { %s71_s24 = smov 24   ;;  %s72_s25 = smov 16   ;;  %v59_v7 = vld [vmem:[%s111_s0 + $0x1] sm:$0x1]   ;;  %vm27_vm4 = vcmask 326912   ;;  %vm33_vm5 = vcmask 261312  }
   0x5   :  { %s73_s0 = smov 8   ;;  %vm39_vm6 = vcmask 195712   ;;  %vm45_vm7 = vcmask 130112  }
   0x6   :  { %13 = vrot.lane.b32.xlu0 %v54_v2, %s69_s18  ;;  %25 = vrot.lane.b32.xlu1 %v56_v3, %s70_s19 }
   0xa   :  { %31 = vrot.lane.b32.xlu0 %v57_v5, %s71_s24  ;;  %37 = vrot.lane.b32.xlu1 %v58_v6, %s72_s25 }
   0xe   :  { %43 = vrot.lane.b32.xlu0 %v59_v7, %s73_s0 }
  0x74   :  { %v8_v8 = vpop.permute.xlu0 %7   ;;  %v20_v9 = vpop.permute.xlu1 %19  }
  0x75   :  { %10 = vst.msk [vmem:[#allocation0] sm:$0x1] %vm9_vm1, %v8_v8  }
  0x78   :  { %v14_v10 = vpop.permute.xlu0 %13   ;;  %v26_v11 = vpop.permute.xlu1 %25  }
  0x79   :  { %16 = vst.msk [vmem:[#allocation0] sm:$0x1] %vm15_vm2, %v14_v10  }
  0x7a   :  { %22 = vst.msk [vmem:[#allocation0] sm:$0x1] %vm21_vm3, %v20_v9  }
  0x7b   :  { %28 = vst.msk [vmem:[#allocation0] sm:$0x1] %vm27_vm4, %v26_v11  }
  0x7c   :  { %v32_v12 = vpop.permute.xlu0 %31   ;;  %v38_v13 = vpop.permute.xlu1 %37  }
  0x7d   :  { %34 = vst.msk [vmem:[#allocation0] sm:$0x1] %vm33_vm5, %v32_v12  }
  0x7e   :  { %40 = vst.msk [vmem:[#allocation0] sm:$0x1] %vm39_vm6, %v38_v13  }
  0x80   :  { %v44_v14 = vpop.permute.xlu0 %43  }
  0x81   :  { %46 = vst.msk [vmem:[#allocation0] sm:$0x1] %vm45_vm7, %v44_v14  }
  0x88   :  { %v50_v15 = vld [vmem:[#allocation0] sm:$0x1] }
  0x89   :  { %52 = vst [vmem:[%s112_s1] sm:$0x1] %v50_v15 }

// kernel: residual_forward.5
= control target key start
LH: loop header
LB: loop body
LE: loop exit
PB: predicated region body
PF: predicated region fallthrough
CT: control target
= control target key end

     0   :  { %s382_s15 = smov 0   ;;  %s413_s0 = inlined_call_operand.vmem [shape: f32[2,8,64], index: 0, kind: input, shape index: {}]   ;;  %s414_s1 = inlined_call_operand.vmem [shape: f32[2,8,64], index: 1, kind: input, shape index: {}]   ;;  %s415_s2 = inlined_call_operand.vmem [shape: f32[1,1,64], index: 2, kind: input, shape index: {}]   ;;  %s416_s3 = inlined_call_operand.vmem [shape: f32[1,1,64], index: 3, kind: input, shape index: {}]   ;;  %s417_s4 = inlined_call_operand.vmem [shape: f32[2,8,64], index: 4, kind: output, shape index: {}]  }
   0x1 LB: > { %s323_s16 = sadd.s32 4294967295, %s354_s15   ;;  %p327_p0 = scmp.ge.s32.totalorder %s354_s15, 1  ;;  %s354_s15 = sphi %s382_s15, %s14_s15  }
   0x2   : > { %p170_p1 = scmp.lt.s32.totalorder %s354_s15, 3 }
   0x4   : > { %p171_p2 = pnand %p327_p0, %p170_p1 }
   0x5   : > { %p198_p3 = scmp.lt.s32.totalorder (!%p171_p2), %s323_s16, 1  ;;  %v331_v0 = vld [vmem:[%s415_s2] ss:$0 sm:$0xff] (!%p171_p2)  ;;  %v356_v26 = vmov (!%p171_p2), -1.0   ;;  %vm256_vm1 = vcmask (!%p171_p2), 523264  }
   0x6   : > { %174 = sbr.rel (%p171_p2) target bundleno = 71 (0x47), region = 36  ;;  %v332_v2 = vld [vmem:[%s416_s3] ss:$0 sm:$0xff] (!%p171_p2) }
   0xd   : > { %s419_s16 = smov (!%p198_p3, %s323_s16), 1 }
   0xe   : > { %s390_s17 = sshll.u32 %s419_s16, 3 }
   0xf   : > { %s201_s22 = scalar_lea.vmem %s413_s0, %s390_s17  ;;  %s205_s25 = scalar_lea.vmem %s414_s1, %s390_s17 }
  0x10   : > { %v211_v1 = vld [vmem:[%s205_s25] sm:$0xff]  ;;  %s209_s30 = scalar_lea.vmem %s417_s4, %s390_s17 }
  0x11   : > { %v219_v3 = vmul.f32 %v331_v0, %v211_v1  ;;  %v210_v4 = vld [vmem:[%s201_s22] sm:$0xff] }
  0x13   : > { %v227_v5 = vadd.f32 %v332_v2, %v219_v3 }
  0x15   : > { %v228_v6 = vadd.f32 %v227_v5, %v210_v4 }
  0x17   : > { %v230_v7 = vmul.f32 0.70710677, %v228_v6  ;;  %v229_v29 = vmul.f32 0.5, %v228_v6 }
  0x19   : > { %v233_v8 = vand.u32 2147483647, %v230_v7  ;;  %vm231_vm0 = vcmp.ge.f32.partialorder %v230_v7, 0.0 }
  0x1a   : > { %v232_v27 = vsel %vm231_vm0, 1.0, %v356_v26 }
  0x1b   : > { %v234_v9 = vmul.f32 0.3275911, %v233_v8  ;;  %v247_v11 = vsub.f32 0.0, %v233_v8 }
  0x1d   : > { %v235_v10 = vadd.f32 1.0, %v234_v9  ;;  %v248_v12 = vmul.f32 %v247_v11, %v233_v8 }
  0x1f   : > { %344 = vrcp.f32 %v235_v10  ;;  %v249_v15 = vmul.f32 1.442695, %v248_v12 }
  0x21   : > { %346 = vpow2.f32 %v249_v15 }
  0x29   : > { %v345_v13 = vpop.eup %344 }
  0x2a   : > { %v238_v14 = vmul.f32 1.0614054, %v345_v13 }
  0x2b   : > { %v347_v23 = vpop.eup %346 }
  0x2c   : > { %v239_v16 = vadd.f32 -1.4531521, %v238_v14 }
  0x2e   : > { %v240_v17 = vmul.f32 %v345_v13, %v239_v16 }
  0x30   : > { %v241_v18 = vadd.f32 1.4214138, %v240_v17 }
  0x32   : > { %v242_v19 = vmul.f32 %v345_v13, %v241_v18 }
  0x34   : > { %v243_v20 = vadd.f32 -0.28449672, %v242_v19 }
  0x36   : > { %v244_v21 = vmul.f32 %v345_v13, %v243_v20 }
  0x38   : > { %v245_v22 = vadd.f32 0.2548296, %v244_v21 }
  0x3a   : > { %v246_v24 = vmul.f32 %v345_v13, %v245_v22 }
  0x3c   : > { %v251_v25 = vmul.f32 %v347_v23, %v246_v24 }
  0x3e   : > { %v252_v28 = vsub.f32 1.0, %v251_v25 }
  0x40   : > { %v253_v30 = vmul.f32 %v252_v28, %v232_v27 }
  0x42   : > { %v254_v31 = vadd.f32 1.0, %v253_v30 }
  0x44   : > { %v255_v32 = vmul.f32 %v254_v31, %v229_v29 }
  0x46   : > { %257 = vst.msk [vmem:[%s209_s30] sm:$0xff] %vm256_vm1, %v255_v32 }
  0x47 PF: > { %s14_s15 = sadd.s32 1, %s354_s15  }
  0x48   : > { %p11_p4 = scmp.ge.s32.totalorder %s14_s15, 4  }
  0x4a   :  { %13 = sbr.rel (!%p11_p4) target bundleno = 1 (0x1), region = 69 }

// kernel: residual_forward.4
= control target key start
LH: loop header
LB: loop body
LE: loop exit
PB: predicated region body
PF: predicated region fallthrough
CT: control target
= control target key end

     0   :  { %s1359_s21 = smov 0   ;;  %s1942_s0 = inlined_call_operand.vmem [shape: f32[128,8], index: 0, kind: input, shape index: {}]   ;;  %s1943_s1 = inlined_call_operand.vmem [shape: f32[1,8], index: 1, kind: input, shape index: {}]   ;;  %s1944_s2 = inlined_call_operand.vmem [shape: f32[1,8], index: 2, kind: input, shape index: {}]   ;;  %s1945_s3 = inlined_call_operand.vmem [shape: f32[72,8], index: 3, kind: input, shape index: {}]   ;;  %s1946_s4 = inlined_call_operand.vmem [shape: f32[1,8], index: 4, kind: input, shape index: {}]   ;;  %s1947_s5 = inlined_call_operand.vmem [shape: f32[128,8], index: 5, kind: output, shape index: {0}]   ;;  %s1948_s6 = inlined_call_operand.vmem [shape: f32[128,8], index: 6, kind: output, shape index: {1}]  }
   0x1 LB: > { %s1159_s22 = sadd.s32 4294967295, %s1312_s21   ;;  %p1163_p0 = scmp.ge.s32.totalorder %s1312_s21, 1  ;;  %s1312_s21 = sphi %s1359_s21, %s17_s21  }
   0x2   : > { %p216_p1 = scmp.lt.s32.totalorder %s1312_s21, 3 }
   0x4   : > { %p217_p2 = pnand %p1163_p0, %p216_p1 }
   0x5   : > { %vm559_vm0 = vcmask (!%p217_p2), 1040384   ;;  %v1314_v0 = vmov (!%p217_p2), 0.0   ;;  %s1164_s23 = sshll.u32 (!%p217_p2), %s1159_s22, 3  ;;  %vm594_vm1 = vcmask (!%p217_p2), 1046528   ;;  %vm619_vm2 = vcmask (!%p217_p2), 1045504   ;;  %s1315_s27 = smov (!%p217_p2), 8  }
   0x6   : > { %220 = sbr.rel (%p217_p2) target bundleno = 527 (0x20f), region = 40  ;;  %v541_v1 = vrot.slane (!%p217_p2), %v1314_v0, 7  ;;  %p252_p3 = scmp.lt.s32.totalorder (!%p217_p2), %s1164_s23, 15  ;;  %v1170_v9 = vld [vmem:[%s1943_s1] ss:$0 sm:$0xff] (!%p217_p2)  ;;  %v1317_v63 = vmov (!%p217_p2), -1.0  }
   0x7   : > { %v1392_v10 = vld [vmem:[%s1944_s2] ss:$0 sm:$0xff] (!%p217_p2)  ;;  %s1316_s9 = smov (!%p217_p2), 16   ;;  %vm523_vm7 = vcmask (!%p217_p2), 64512   ;;  %s1318_s13 = smov (!%p217_p2), 24   ;;  %vm852_vm12 = vcmask (!%p217_p2), 130048  }
   0x8   : > { %v1368_v2 = vsel (!%p217_p2), %vm559_vm0, 0.0, %v541_v1  ;;  %v569_v3 = vsel (!%p217_p2), %vm559_vm0, %v541_v1, 0.0  ;;  %s1319_s14 = smov (!%p217_p2), 48   ;;  %s1320_s15 = smov (!%p217_p2), 32   ;;  %vm861_vm13 = vcmask (!%p217_p2), 195584   ;;  %vm870_vm14 = vcmask (!%p217_p2), 261120  }
   0x9   : > { %v595_v4 = vrot.slane (!%p217_p2), %v1368_v2, 1  ;;  %v596_v5 = vrot.slane (!%p217_p2), %v569_v3, 1  ;;  %v620_v6 = vrot.slane (!%p217_p2), %v1368_v2, 2  ;;  %v621_v7 = vrot.slane (!%p217_p2), %v569_v3, 2  ;;  %s1321_s16 = smov (!%p217_p2), 40   ;;  %s1323_s18 = smov (!%p217_p2), 64  }
   0xa   : > { %vm879_vm15 = vcmask (!%p217_p2), 326656  }
   0xb   : > { %v1374_v8 = vsel (!%p217_p2), %vm594_vm1, %v595_v4, %v596_v5  ;;  %v1395_v11 = vsel (!%p217_p2), %vm619_vm2, %v620_v6, %v621_v7 }
   0xc   : > { %652 = vrot.lane.b32.xlu0 (!%p217_p2), %v1374_v8, %s1315_s27 }
   0xd   : > { %s1950_s23 = smov (!%p252_p3, %s1164_s23), 15 }
   0xe   : > { %s1376_s24 = sshll.u32 %s1950_s23, 3 }
   0xf   : > { %s1387_s30 = scalar_lea.vmem %s1942_s0, %s1376_s24  ;;  %s1531_s12 = scalar_lea.vmem %s1947_s5, %s1376_s24 }
  0x10   : > { %v273_v12 = vld [vmem:[%s1387_s30 + $0x20] sm:$0xff]  ;;  %v274_v14 = vld [vmem:[%s1387_s30 + $0x28] sm:$0xff]  ;;  %676 = vrot.lane.b32.xlu0 %v1395_v11, %s1316_s9  ;;  %v275_v24 = vld [vmem:[%s1387_s30 + $0x30] sm:$0xff]  ;;  %s267_s19 = scalar_lea.vmem %s1948_s6, %s1376_s24 }
  0x11   : > { %v269_v13 = vld [vmem:[%s1387_s30] sm:$0xff]  ;;  %v288_v15 = vmul.f32 %v1170_v9, %v273_v12  ;;  %v289_v17 = vmul.f32 %v1170_v9, %v274_v14  ;;  %v270_v18 = vld [vmem:[%s1387_s30 + $0x8] sm:$0xff]  ;;  %v271_v25 = vld [vmem:[%s1387_s30 + $0x10] sm:$0xff]  ;;  %v290_v31 = vmul.f32 %v1170_v9, %v275_v24 }
  0x12   : > { %v284_v16 = vmul.f32 %v1170_v9, %v269_v13  ;;  %v285_v19 = vmul.f32 %v1170_v9, %v270_v18  ;;  %v286_v32 = vmul.f32 %v1170_v9, %v271_v25  ;;  %v272_v37 = vld [vmem:[%s1387_s30 + $0x18] sm:$0xff] }
  0x13   : > { %v303_v20 = vadd.f32 %v1392_v10, %v288_v15  ;;  %v304_v22 = vadd.f32 %v1392_v10, %v289_v17  ;;  %v1417_v41 = vadd.f32 %v1392_v10, %v290_v31  ;;  %v287_v44 = vmul.f32 %v1170_v9, %v272_v37  ;;  %v276_v46 = vld [vmem:[%s1387_s30 + $0x38] sm:$0xff] }
  0x14   : > { %v299_v21 = vadd.f32 %v1392_v10, %v284_v16  ;;  %v300_v23 = vadd.f32 %v1392_v10, %v285_v19  ;;  %v1420_v42 = vadd.f32 %v1392_v10, %v286_v32  ;;  %v291_v54 = vmul.f32 %v1170_v9, %v276_v46 }
  0x15   : > { %v319_v26 = vmul.f32 0.70710677, %v303_v20  ;;  %v1411_v28 = vmul.f32 0.70710677, %v304_v22  ;;  %v1424_v49 = vmul.f32 0.70710677, %v1417_v41  ;;  %v1432_v53 = vadd.f32 %v1392_v10, %v287_v44 }
  0x16   : > { %v1409_v27 = vmul.f32 0.70710677, %v299_v21  ;;  %v316_v34 = vmul.f32 0.70710677, %v300_v23  ;;  %v1427_v50 = vmul.f32 0.70710677, %v1420_v42  ;;  %v1450_v4 = vadd.f32 %v1392_v10, %v291_v54 }
  0x17   : > { %v343_v29 = vand.u32 2147483647, %v319_v26  ;;  %v344_v33 = vand.u32 2147483647, %v1411_v28  ;;  %v1429_v51 = vmul.f32 0.5, %v303_v20  ;;  %vm327_vm3 = vcmp.ge.f32.partialorder %v319_v26, 0.0 }
  0x18   : > { %v339_v30 = vand.u32 2147483647, %v1409_v27  ;;  %v340_v43 = vand.u32 2147483647, %v316_v34  ;;  %v1434_v55 = vmul.f32 0.5, %v299_v21  ;;  %v1437_v59 = vmul.f32 0.5, %v304_v22 }
  0x19   : > { %v351_v35 = vmul.f32 0.3275911, %v343_v29  ;;  %v352_v38 = vmul.f32 0.3275911, %v344_v33  ;;  %v455_v47 = vsub.f32 0.0, %v343_v29  ;;  %v1439_v60 = vmul.f32 0.5, %v300_v23 }
  0x1a   : > { %v347_v36 = vmul.f32 0.3275911, %v339_v30  ;;  %v348_v48 = vmul.f32 0.3275911, %v340_v43  ;;  %v345_v56 = vand.u32 2147483647, %v1424_v49 }
  0x1b   : > { %v359_v39 = vadd.f32 1.0, %v351_v35  ;;  %v360_v45 = vadd.f32 1.0, %v352_v38  ;;  %v463_v57 = vmul.f32 %v455_v47, %v343_v29  ;;  %v451_v58 = vsub.f32 0.0, %v339_v30 }
  0x1c   : > { %v355_v40 = vadd.f32 1.0, %v347_v36  ;;  %v356_v52 = vadd.f32 1.0, %v348_v48  ;;  %vm323_vm4 = vcmp.ge.f32.partialorder %v1409_v27, 0.0  ;;  %v353_v61 = vmul.f32 0.3275911, %v345_v56 }
  0x1d   : > { %1274 = vrcp.f32 %v359_v39  ;;  %v341_v62 = vand.u32 2147483647, %v1427_v50  ;;  %v1444_v0 = vsel %vm327_vm3, 1.0, %v1317_v63  ;;  %v456_v1 = vsub.f32 0.0, %v344_v33 }
  0x1e   : > { %1276 = vrcp.f32 %v355_v40  ;;  %v1447_v3 = vmul.f32 0.70710677, %v1432_v53  ;;  %vm328_vm5 = vcmp.ge.f32.partialorder %v1411_v28, 0.0  ;;  %v452_v5 = vsub.f32 0.0, %v340_v43 }
  0x1f   : > { %1278 = vrcp.f32 %v360_v45  ;;  %v361_v6 = vadd.f32 1.0, %v353_v61  ;;  %v349_v7 = vmul.f32 0.3275911, %v341_v62  ;;  %v475_v9 = vmul.f32 1.442695, %v463_v57 }
  0x20   : > { %1280 = vrcp.f32 %v356_v52  ;;  %v459_v12 = vmul.f32 %v451_v58, %v339_v30  ;;  %vm324_vm6 = vcmp.ge.f32.partialorder %v316_v34, 0.0  ;;  %v342_v13 = vand.u32 2147483647, %v1447_v3 }
  0x21   : > { %1282 = vrcp.f32 %v361_v6  ;;  %v457_v15 = vsub.f32 0.0, %v345_v56  ;;  %v357_v16 = vadd.f32 1.0, %v349_v7  ;;  %v1457_v17 = vmul.f32 0.70710677, %v1450_v4 }
  0x22   : > { %v1465_v19 = vsel %vm323_vm4, 1.0, %v1317_v63  ;;  %v464_v20 = vmul.f32 %v456_v1, %v344_v33  ;;  %v350_v21 = vmul.f32 0.3275911, %v342_v13  ;;  %v1471_v23 = vsel %vm328_vm5, 1.0, %v1317_v63 }
  0x23   : > { %v1474_v24 = vsel %vm324_vm6, 1.0, %v1317_v63  ;;  %v460_v25 = vmul.f32 %v452_v5, %v340_v43  ;;  %v467_v29 = vmul.f32 1.442695, %v459_v12  ;;  %1284 = vrcp.f32 %v357_v16 }
  0x24   : > { %v358_v30 = vadd.f32 1.0, %v350_v21  ;;  %1286 = vpow2.f32 %v475_v9  ;;  %v465_v32 = vmul.f32 %v457_v15, %v345_v56  ;;  %v1479_v33 = vand.u32 2147483647, %v1457_v17 }
  0x25   : > { %v477_v35 = vmul.f32 1.442695, %v464_v20  ;;  %v469_v38 = vmul.f32 1.442695, %v460_v25  ;;  %v453_v39 = vsub.f32 0.0, %v341_v62  ;;  %v454_v40 = vsub.f32 0.0, %v342_v13 }
  0x26   : > { %1288 = vrcp.f32 %v358_v30  ;;  %v479_v47 = vmul.f32 1.442695, %v465_v32  ;;  %v354_v48 = vmul.f32 0.3275911, %v1479_v33  ;;  %v1496_v15 = vmul.f32 0.5, %v1417_v41 }
  0x27   : > { %v1454_v14 = vpop.eup %1274  ;;  %1290 = vpow2.f32 %v467_v29  ;;  %v461_v61 = vmul.f32 %v453_v39, %v341_v62  ;;  %v462_v1 = vmul.f32 %v454_v40, %v342_v13  ;;  %vm329_vm8 = vcmp.ge.f32.partialorder %v1424_v49, 0.0 }
  0x28   : > { %v1459_v10 = vpop.eup %1276  ;;  %v383_v18 = vmul.f32 1.0614054, %v1454_v14  ;;  %1292 = vpow2.f32 %v477_v35  ;;  %v362_v16 = vadd.f32 1.0, %v354_v48  ;;  %vm325_vm9 = vcmp.ge.f32.partialorder %v1427_v50, 0.0 }
  0x29   : > { %v379_v22 = vmul.f32 1.0614054, %v1459_v10  ;;  %v1476_v27 = vpop.eup %1278  ;;  %1294 = vpow2.f32 %v469_v38  ;;  %v471_v29 = vmul.f32 1.442695, %v461_v61  ;;  %v473_v30 = vmul.f32 1.442695, %v462_v1 }
  0x2a   : > { %v391_v26 = vadd.f32 -1.4531521, %v383_v18  ;;  %v384_v34 = vmul.f32 1.0614054, %v1476_v27  ;;  %v1483_v36 = vpop.eup %1280  ;;  %1296 = vpow2.f32 %v479_v47  ;;  %v333_v49 = vsel %vm325_vm9, 1.0, %v1317_v63 }
  0x2b   : > { %v387_v31 = vadd.f32 -1.4531521, %v379_v22  ;;  %v380_v45 = vmul.f32 1.0614054, %v1483_v36  ;;  %v1490_v57 = vpop.eup %1282  ;;  %1298 = vrcp.f32 %v362_v16  ;;  %vm326_vm10 = vcmp.ge.f32.partialorder %v1447_v3, 0.0 }
  0x2c   : > { %v399_v28 = vmul.f32 %v1454_v14, %v391_v26  ;;  %v392_v44 = vadd.f32 -1.4531521, %v384_v34  ;;  %v385_v9 = vmul.f32 1.0614054, %v1490_v57  ;;  %1300 = vpow2.f32 %v471_v29 }
  0x2d   : > { %v395_v37 = vmul.f32 %v1459_v10, %v387_v31  ;;  %v388_v56 = vadd.f32 -1.4531521, %v380_v45  ;;  %v1498_v18 = vpop.eup %1284  ;;  %1302 = vpow2.f32 %v473_v30  ;;  %vm330_vm11 = vcmp.ge.f32.partialorder %v1457_v17, 0.0 }
  0x2e   : > { %v407_v43 = vadd.f32 1.4214138, %v399_v28  ;;  %v400_v54 = vmul.f32 %v1476_v27, %v392_v44  ;;  %v393_v13 = vadd.f32 -1.4531521, %v385_v9  ;;  %v1287_v22 = vpop.eup %1286  ;;  %v381_v26 = vmul.f32 1.0614054, %v1498_v18 }
  0x2f   : > { %v403_v46 = vadd.f32 1.4214138, %v395_v37  ;;  %v396_v7 = vmul.f32 %v1483_v36, %v388_v56  ;;  %vm931_vm3 = vcmask 588800  }
  0x30   : > { %v415_v52 = vmul.f32 %v1454_v14, %v407_v43  ;;  %v408_v6 = vadd.f32 1.4214138, %v400_v54  ;;  %v1504_v31 = vpop.eup %1288  ;;  %v401_v34 = vmul.f32 %v1490_v57, %v393_v13  ;;  %v389_v37 = vadd.f32 -1.4531521, %v381_v26 }
  0x31   : > { %v411_v58 = vmul.f32 %v1459_v10, %v403_v46  ;;  %v404_v62 = vadd.f32 1.4214138, %v396_v7  ;;  %v382_v38 = vmul.f32 1.0614054, %v1504_v31  ;;  %v1291_v39 = vpop.eup %1290 }
  0x32   : > { %v423_v5 = vadd.f32 -0.28449672, %v415_v52  ;;  %v416_v21 = vmul.f32 %v1476_v27, %v408_v6  ;;  %v409_v45 = vadd.f32 1.4214138, %v401_v34  ;;  %v397_v47 = vmul.f32 %v1498_v18, %v389_v37  ;;  %v1293_v52 = vpop.eup %1292 }
  0x33   : > { %v419_v12 = vadd.f32 -0.28449672, %v411_v58  ;;  %v412_v28 = vmul.f32 %v1483_v36, %v404_v62  ;;  %v390_v48 = vadd.f32 -1.4531521, %v382_v38  ;;  %v1295_v1 = vpop.eup %1294 }
  0x34   : > { %v431_v20 = vmul.f32 %v1454_v14, %v423_v5  ;;  %v424_v32 = vadd.f32 -0.28449672, %v416_v21  ;;  %v417_v61 = vmul.f32 %v1490_v57, %v409_v45  ;;  %v405_v5 = vadd.f32 1.4214138, %v397_v47  ;;  %v1297_v16 = vpop.eup %1296 }
  0x35   : > { %v427_v25 = vmul.f32 %v1459_v10, %v419_v12  ;;  %v420_v44 = vadd.f32 -0.28449672, %v412_v28  ;;  %v398_v6 = vmul.f32 %v1504_v31, %v390_v48 }
  0x36   : > { %v439_v41 = vadd.f32 0.2548296, %v431_v20  ;;  %v432_v43 = vmul.f32 %v1476_v27, %v424_v32  ;;  %v425_v12 = vadd.f32 -0.28449672, %v417_v61  ;;  %v413_v21 = vmul.f32 %v1498_v18, %v405_v5 }
  0x37   : > { %v435_v35 = vadd.f32 0.2548296, %v427_v25  ;;  %v428_v58 = vmul.f32 %v1483_v36, %v420_v44  ;;  %v406_v62 = vadd.f32 1.4214138, %v398_v6 }
  0x38   : > { %v447_v40 = vmul.f32 %v1454_v14, %v439_v41  ;;  %v440_v56 = vadd.f32 0.2548296, %v432_v43  ;;  %v433_v26 = vmul.f32 %v1490_v57, %v425_v12 }
  0x39   : > { %v443_v46 = vmul.f32 %v1459_v10, %v435_v35  ;;  %v436_v9 = vadd.f32 0.2548296, %v428_v58  ;;  %v414_v30 = vmul.f32 %v1504_v31, %v406_v62  ;;  %v1525_v35 = vpop.eup %1298 }
  0x3a   : > { %v487_v54 = vmul.f32 %v1287_v22, %v447_v40  ;;  %v448_v10 = vmul.f32 %v1476_v27, %v440_v56  ;;  %v421_v27 = vadd.f32 -0.28449672, %v413_v21  ;;  %v441_v34 = vadd.f32 0.2548296, %v433_v26  ;;  %v1301_v44 = vpop.eup %1300 }
  0x3b   : > { %v483_v14 = vmul.f32 %v1291_v39, %v443_v46  ;;  %v444_v25 = vmul.f32 %v1483_v36, %v436_v9  ;;  %v422_v37 = vadd.f32 -0.28449672, %v414_v30  ;;  %v386_v56 = vmul.f32 1.0614054, %v1525_v35 }
  0x3c   : > { %v495_v7 = vsub.f32 1.0, %v487_v54  ;;  %v488_v22 = vmul.f32 %v1293_v52, %v448_v10  ;;  %v429_v36 = vmul.f32 %v1498_v18, %v421_v27  ;;  %v449_v43 = vmul.f32 %v1490_v57, %v441_v34  ;;  %v1303_v52 = vpop.eup %1302 }
  0x3d   : > { %v491_v20 = vsub.f32 1.0, %v483_v14  ;;  %v484_v28 = vmul.f32 %v1295_v1, %v444_v25  ;;  %v430_v47 = vmul.f32 %v1504_v31, %v422_v37  ;;  %v458_v10 = vsub.f32 0.0, %v1479_v33 }
  0x3e   : > { %v503_v13 = vmul.f32 %v495_v7, %v1444_v0  ;;  %v496_v32 = vsub.f32 1.0, %v488_v22  ;;  %v437_v46 = vadd.f32 0.2548296, %v429_v36  ;;  %v489_v57 = vmul.f32 %v1297_v16, %v449_v43 }
  0x3f   : > { %v499_v29 = vmul.f32 %v491_v20, %v1465_v19  ;;  %v337_v19 = vsel %vm329_vm8, 1.0, %v1317_v63  ;;  %v492_v40 = vsub.f32 1.0, %v484_v28  ;;  %v438_v54 = vadd.f32 0.2548296, %v430_v47 }
  0x40   : > { %v511_v41 = vadd.f32 1.0, %v503_v13  ;;  %v504_v39 = vmul.f32 %v496_v32, %v1471_v23  ;;  %v445_v50 = vmul.f32 %v1498_v18, %v437_v46  ;;  %v497_v1 = vsub.f32 1.0, %v489_v57 }
  0x41   : > { %v507_v0 = vadd.f32 1.0, %v499_v29  ;;  %v500_v48 = vmul.f32 %v492_v40, %v1474_v24  ;;  %v446_v5 = vmul.f32 %v1504_v31, %v438_v54  ;;  %v394_v16 = vadd.f32 -1.4531521, %v386_v56 }
  0x42   : > { %v1538_v38 = vmul.f32 %v511_v41, %v1429_v51  ;;  %v512_v23 = vadd.f32 1.0, %v504_v39  ;;  %v485_v14 = vmul.f32 %v1301_v44, %v445_v50  ;;  %v505_v7 = vmul.f32 %v497_v1, %v337_v19 }
  0x43   : > { %v1543_v45 = vmul.f32 %v507_v0, %v1434_v55  ;;  %v508_v61 = vadd.f32 1.0, %v500_v48  ;;  %v486_v12 = vmul.f32 %v1303_v52, %v446_v5  ;;  %v309_v21 = vmul.f32 0.5, %v1420_v42 }
  0x44   : > { %v546_v51 = vrot.slane %v1538_v38, 7  ;;  %528 = vst.msk [vmem:[%s1531_s12 + $0x20] sm:$0xff] %vm523_vm7, %v1538_v38  ;;  %v1566_v24 = vmul.f32 %v512_v23, %v1437_v59  ;;  %v493_v9 = vsub.f32 1.0, %v485_v14  ;;  %v513_v20 = vadd.f32 1.0, %v505_v7 }
  0x45   : > { %v542_v55 = vrot.slane %v1543_v45, 7  ;;  %524 = vst.msk [vmem:[%s1531_s12] sm:$0xff] %vm523_vm7, %v1543_v45  ;;  %v1582_v6 = vmul.f32 %v508_v61, %v1439_v60  ;;  %v334_v60 = vsel %vm326_vm10, 1.0, %v1317_v63  ;;  %v494_v13 = vsub.f32 1.0, %v486_v12 }
  0x46   : > { %v1563_v58 = vsel %vm559_vm0, 0.0, %v546_v51  ;;  %529 = vst.msk [vmem:[%s1531_s12 + $0x28] sm:$0xff] %vm523_vm7, %v1566_v24  ;;  %v547_v59 = vrot.slane %v1566_v24, 7  ;;  %v501_v62 = vmul.f32 %v493_v9, %v333_v49  ;;  %v1602_v25 = vmul.f32 %v513_v20, %v1496_v15 }
  0x47   : > { %708 = vrot.lane.b32.xlu1 %v1563_v58, %s1318_s13  ;;  %v1571_v18 = vsel %vm559_vm0, 0.0, %v542_v55  ;;  %525 = vst.msk [vmem:[%s1531_s12 + $0x8] sm:$0xff] %vm523_vm7, %v1582_v6  ;;  %v543_v31 = vrot.slane %v1582_v6, 7  ;;  %v466_v26 = vmul.f32 %v458_v10, %v1479_v33  ;;  %v310_v27 = vmul.f32 0.5, %v1432_v53 }
  0x48   : > { %700 = vrot.lane.b32.xlu0 %v1571_v18, %s1318_s13  ;;  %v1588_v3 = vsel %vm559_vm0, 0.0, %v547_v59  ;;  %v509_v29 = vadd.f32 1.0, %v501_v62  ;;  %v502_v30 = vmul.f32 %v494_v13, %v334_v60  ;;  %v402_v42 = vmul.f32 %v1525_v35, %v394_v16  ;;  %530 = vst.msk [vmem:[%s1531_s12 + $0x30] sm:$0xff] %vm523_vm7, %v1602_v25 }
  0x49   : > { %v1599_v22 = vsel %vm559_vm0, 0.0, %v543_v31  ;;  %v548_v41 = vrot.slane %v1602_v25, 7  ;;  %v481_v32 = vmul.f32 1.442695, %v466_v26  ;;  %v570_v0 = vsel %vm559_vm0, %v542_v55, 0.0 }
  0x4a   : > { %v1615_v33 = vmul.f32 %v509_v29, %v309_v21  ;;  %v510_v15 = vadd.f32 1.0, %v502_v30  ;;  %v410_v19 = vadd.f32 1.4214138, %v402_v42  ;;  %v598_v39 = vrot.slane %v1571_v18, 1 }
  0x4b   : > { %710 = vrot.lane.b32.xlu1 %v1588_v3, %s1318_s13  ;;  %v1620_v53 = vsel %vm559_vm0, 0.0, %v548_v41  ;;  %v599_v40 = vrot.slane %v570_v0, 1  ;;  %1304 = vpow2.f32 %v481_v32  ;;  %v574_v45 = vsel %vm559_vm0, %v546_v51, 0.0 }
  0x4c   : > { %702 = vrot.lane.b32.xlu0 %v1599_v22, %s1318_s13  ;;  %526 = vst.msk [vmem:[%s1531_s12 + $0x10] sm:$0xff] %vm523_vm7, %v1615_v33  ;;  %v544_v28 = vrot.slane %v1615_v33, 7  ;;  %v518_v34 = vmul.f32 %v510_v15, %v310_v27  ;;  %v418_v49 = vmul.f32 %v1525_v35, %v410_v19  ;;  %v610_v48 = vrot.slane %v1563_v58, 1 }
  0x4d   : > { %v600_v23 = vsel %vm594_vm1, %v598_v39, %v599_v40  ;;  %v611_v57 = vrot.slane %v574_v45, 1  ;;  %v623_v51 = vrot.slane %v1571_v18, 2  ;;  %v624_v55 = vrot.slane %v570_v0, 2 }
  0x4e   : > { %v1634_v36 = vsel %vm559_vm0, 0.0, %v544_v28  ;;  %527 = vst.msk [vmem:[%s1531_s12 + $0x18] sm:$0xff] %vm523_vm7, %v518_v34  ;;  %v545_v37 = vrot.slane %v518_v34, 7  ;;  %v426_v52 = vadd.f32 -0.28449672, %v418_v49  ;;  %v571_v6 = vsel %vm559_vm0, %v543_v31, 0.0 }
  0x4f   : > { %780 = vrot.lane.b32.xlu1 %v1588_v3, %s1319_s14  ;;  %v1663_v54 = vsel %vm594_vm1, %v610_v48, %v611_v57  ;;  %v625_v5 = vsel %vm619_vm2, %v623_v51, %v624_v55  ;;  %v635_v9 = vrot.slane %v1563_v58, 2  ;;  %v636_v12 = vrot.slane %v574_v45, 2  ;;  %v917_v55 = vld [vmem:[%s1945_s3 + $0x10] sm:$0xff] }
  0x50   : > { %772 = vrot.lane.b32.xlu0 %v1599_v22, %s1319_s14  ;;  %v1642_v43 = vsel %vm559_vm0, 0.0, %v545_v37  ;;  %v573_v44 = vsel %vm559_vm0, %v545_v37, 0.0  ;;  %v434_v50 = vmul.f32 %v1525_v35, %v426_v52  ;;  %v601_v20 = vrot.slane %v1599_v22, 1 }
  0x51   : > { %v607_v46 = vrot.slane %v1642_v43, 1  ;;  %v608_v47 = vrot.slane %v573_v44, 1  ;;  %v632_v56 = vrot.slane %v1642_v43, 2  ;;  %v633_v61 = vrot.slane %v573_v44, 2 }
  0x52   : > { %v442_v1 = vadd.f32 0.2548296, %v434_v50  ;;  %v602_v60 = vrot.slane %v571_v6, 1  ;;  %v338_v21 = vsel %vm330_vm11, 1.0, %v1317_v63  ;;  %v575_v31 = vsel %vm559_vm0, %v547_v59, 0.0  ;;  %v918_v50 = vld [vmem:[%s1945_s3 + $0x18] sm:$0xff] }
  0x53   : > { %712 = vrot.lane.b32.xlu1 %v1620_v53, %s1318_s13  ;;  %v1657_v38 = vsel %vm594_vm1, %v607_v46, %v608_v47  ;;  %v1675_v10 = vsel %vm619_vm2, %v632_v56, %v633_v61  ;;  %v314_v62 = vmul.f32 0.5, %v1450_v4  ;;  %v613_v29 = vrot.slane %v1588_v3, 1  ;;  %v915_v47 = vld [vmem:[%s1945_s3] sm:$0xff] }
  0x54   : > { %704 = vrot.lane.b32.xlu0 %v1634_v36, %s1318_s13  ;;  %v450_v7 = vmul.f32 %v1525_v35, %v442_v1  ;;  %v1684_v35 = vsel %vm619_vm2, %v635_v9, %v636_v12  ;;  %v603_v63 = vsel %vm594_vm1, %v601_v20, %v602_v60  ;;  %v614_v27 = vrot.slane %v575_v31, 1  ;;  %v921_v12 = vld [vmem:[%s1945_s3 + $0x30] sm:$0xff]  ;;  %v923_v60 = vld [vmem:[%s1945_s3 + $0x40] sm:$0xff] }
  0x55   : > { %v1305_v14 = vpop.eup %1304  ;;  %v572_v4 = vsel %vm559_vm0, %v544_v28, 0.0  ;;  %v604_v59 = vrot.slane %v1634_v36, 1  ;;  %v576_v33 = vsel %vm559_vm0, %v548_v41, 0.0  ;;  %v626_v32 = vrot.slane %v1599_v22, 2 }
  0x56   : > { %v490_v16 = vmul.f32 %v1305_v14, %v450_v7  ;;  %v615_v24 = vsel %vm594_vm1, %v613_v29, %v614_v27  ;;  %v605_v42 = vrot.slane %v572_v4, 1  ;;  %v627_v28 = vrot.slane %v571_v6, 2  ;;  %v920_v6 = vld [vmem:[%s1945_s3 + $0x28] sm:$0xff] }
  0x57   : > { %782 = vrot.lane.b32.xlu1 %v1620_v53, %s1319_s14  ;;  %v616_v34 = vrot.slane %v1620_v53, 1  ;;  %v617_v0 = vrot.slane %v576_v33, 1  ;;  %v638_v41 = vrot.slane %v1588_v3, 2  ;;  %v639_v37 = vrot.slane %v575_v31, 2 }
  0x58   : > { %774 = vrot.lane.b32.xlu0 %v1634_v36, %s1319_s14  ;;  %v498_v17 = vsub.f32 1.0, %v490_v16  ;;  %v1715_v15 = vsel %vm594_vm1, %v604_v59, %v605_v42  ;;  %v1723_v19 = vsel %vm619_vm2, %v626_v32, %v627_v28  ;;  %v629_v39 = vrot.slane %v1634_v36, 2  ;;  %v922_v16 = vld [vmem:[%s1945_s3 + $0x38] sm:$0xff] }
  0x59   : > { %v1728_v25 = vsel %vm594_vm1, %v616_v34, %v617_v0  ;;  %v630_v40 = vrot.slane %v572_v4, 2  ;;  %v1737_v44 = vsel %vm619_vm2, %v638_v41, %v639_v37  ;;  %v641_v49 = vrot.slane %v1620_v53, 2 }
  0x5a   : > { %v506_v13 = vmul.f32 %v498_v17, %v338_v21  ;;  %v642_v46 = vrot.slane %v576_v33, 2  ;;  %v1234_v61 = vpack.c.bf16 %v918_v50, %v917_v55  ;;  %v1242_v20 = vpack.c.bf16 %v922_v16, %v921_v12 }
  0x5b   : > { %654 = vrot.lane.b32.xlu1 %v600_v23, %s1315_s27  ;;  %v1742_v45 = vsel %vm619_vm2, %v629_v39, %v630_v40 }
  0x5c   : > { %660 = vrot.lane.b32.xlu0 %v1657_v38, %s1315_s27  ;;  %v514_v26 = vadd.f32 1.0, %v506_v13  ;;  %v643_v51 = vsel %vm619_vm2, %v641_v49, %v642_v46 }
  0x5e   : > { %v1696_v30 = vmul.f32 %v514_v26, %v314_v62 }
  0x5f   : > { %662 = vrot.lane.b32.xlu1 %v1663_v54, %s1315_s27 }
  0x60   : > { %678 = vrot.lane.b32.xlu0 %v625_v5, %s1316_s9  ;;  %531 = vst.msk [vmem:[%s1531_s12 + $0x38] sm:$0xff] %vm523_vm7, %v1696_v30  ;;  %v549_v14 = vrot.slane %v1696_v30, 7 }
  0x62   : > { %v568_v9 = vsel %vm559_vm0, 0.0, %v549_v14  ;;  %v577_v21 = vsel %vm559_vm0, %v549_v14, 0.0  ;;  %vm888_vm0 = vcmask 392192  }
  0x63   : > { %684 = vrot.lane.b32.xlu1 %v1675_v10, %s1316_s9  ;;  %v646_v17 = vrot.slane %v568_v9, 1  ;;  %v647_v31 = vrot.slane %v577_v21, 1  ;;  %v649_v13 = vrot.slane %v568_v9, 2 }
  0x64   : > { %724 = vrot.lane.b32.xlu0 %v600_v23, %s1320_s15  ;;  %v916_v23 = vld [vmem:[%s1945_s3 + $0x8] sm:$0xff] }
  0x65   : > { %v1230_v57 = vpack.c.bf16 %v916_v23, %v915_v47  ;;  %v648_v62 = vsel %vm594_vm1, %v646_v17, %v647_v31  ;;  %vm897_vm1 = vcmask 457728  }
  0x67   : > { %686 = vrot.lane.b32.xlu1 %v1684_v35, %s1316_s9  ;;  %1231 = vmatprep.subr.bf16.mxu0 %v1230_v57 }
  0x68   : > { %656 = vrot.lane.b32.xlu0 %v603_v63, %s1315_s27  ;;  %1233 = vmatpush3.bf16.msra.mxu0 %v1230_v57 }
  0x69   : > { %1246 = vmatprep.subr.bf16.mxu1 %v1230_v57  ;;  %1235 = vmatprep.subr.bf16.mxu0 %v1234_v61 }
  0x6a   : > { %1251 = vmatpush3.bf16.msra.mxu1 %v1230_v57 }
  0x6b   : > { %732 = vrot.lane.b32.xlu1 %v1663_v54, %s1320_s15  ;;  %1247 = vmatprep.subr.bf16.mxu1 %v1234_v61 }
  0x6c   : > { %726 = vrot.lane.b32.xlu0 %v603_v63, %s1320_s15  ;;  %1237 = vmatpush3.bf16.msra.mxu0 %v1234_v61 }
  0x6e   : > { %1252 = vmatpush3.bf16.msra.mxu1 %v1234_v61 }
  0x6f   : > { %664 = vrot.lane.b32.xlu1 %v615_v24, %s1315_s27 }
  0x70   : > { %748 = vrot.lane.b32.xlu0 %v625_v5, %s1321_s16  ;;  %v919_v5 = vld [vmem:[%s1945_s3 + $0x20] sm:$0xff] }
  0x71   : > { %v1238_v7 = vpack.c.bf16 %v920_v6, %v919_v5 }
  0x73   : > { %734 = vrot.lane.b32.xlu1 %v615_v24, %s1320_s15  ;;  %1239 = vmatprep.subr.bf16.mxu0 %v1238_v7 }
  0x74   : > { %658 = vrot.lane.b32.xlu0 %v1715_v15, %s1315_s27  ;;  %1241 = vmatpush3.bf16.msra.mxu0 %v1238_v7 }
  0x75   : > { %1248 = vmatprep.subr.bf16.mxu1 %v1238_v7  ;;  %1243 = vmatprep.subr.bf16.mxu0 %v1242_v20 }
  0x76   : > { %1253 = vmatpush3.bf16.msra.mxu1 %v1238_v7 }
  0x77   : > { %756 = vrot.lane.b32.xlu1 %v1684_v35, %s1321_s16  ;;  %1249 = vmatprep.subr.bf16.mxu1 %v1242_v20 }
  0x78   : > { %680 = vrot.lane.b32.xlu0 %v1723_v19, %s1316_s9  ;;  %1245 = vmatpush3.bf16.msra.mxu0 %v1242_v20 }
  0x79   : > { %1216 = vmatprep.subr.mxu0 %v923_v60 }
  0x7a   : > { %1254 = vmatpush3.bf16.msra.mxu1 %v1242_v20 }
  0x7b   : > { %666 = vrot.lane.b32.xlu1 %v1728_v25, %s1315_s27  ;;  %s1322_s27 = smov 56   ;;  %1250 = vmatprep.subr.mxu1 %v923_v60 }
  0x7c   : > { %750 = vrot.lane.b32.xlu0 %v1723_v19, %s1321_s16  ;;  %1217 = vmatpush3.msra.mxu0 %v923_v60 }
  0x7e   : > { %v653_v48 = vpop.permute.xlu0 %652  ;;  %1255 = vmatpush3.msra.mxu1 %v923_v60 }
  0x7f   : > { %688 = vrot.lane.b32.xlu1 %v1737_v44, %s1316_s9  ;;  %v844_v52 = vsel %vm523_vm7, %v1368_v2, %v653_v48 }
  0x80   : > { %682 = vrot.lane.b32.xlu0 %v1742_v45, %s1316_s9 }
  0x82   : > { %v677_v56 = vpop.permute.xlu0 %676 }
  0x83   : > { %758 = vrot.lane.b32.xlu1 %v1737_v44, %s1321_s16  ;;  %v1768_v1 = vsel %vm852_vm12, %v844_v52, %v677_v56 }
  0x84   : > { %796 = vrot.lane.b32.xlu0 %v603_v63, %s1322_s27  ;;  %v650_v63 = vrot.slane %v577_v21, 2 }
  0x86   : > { %v651_v26 = vsel %vm619_vm2, %v649_v13, %v650_v63  ;;  %vm906_vm2 = vcmask 523264  }
  0x87   : > { %690 = vrot.lane.b32.xlu1 %v643_v51, %s1316_s9 }
  0x88   : > { %706 = vrot.lane.b32.xlu0 %v1642_v43, %s1318_s13 }
  0x8b   : > { %804 = vrot.lane.b32.xlu1 %v615_v24, %s1322_s27 }
  0x8c   : > { %728 = vrot.lane.b32.xlu0 %v1715_v15, %s1320_s15 }
  0x8f   : > { %714 = vrot.lane.b32.xlu1 %v568_v9, %s1318_s13 }
  0x90   : > { %798 = vrot.lane.b32.xlu0 %v1715_v15, %s1322_s27 }
  0x93   : > { %736 = vrot.lane.b32.xlu1 %v1728_v25, %s1320_s15 }
  0x94   : > { %820 = vrot.lane.b32.xlu0 %v1723_v19, %s1323_s18 }
  0x97   : > { %806 = vrot.lane.b32.xlu1 %v1728_v25, %s1322_s27 }
  0x98   : > { %730 = vrot.lane.b32.xlu0 %v1657_v38, %s1320_s15 }
  0x9b   : > { %828 = vrot.lane.b32.xlu1 %v1737_v44, %s1323_s18 }
  0x9c   : > { %752 = vrot.lane.b32.xlu0 %v1742_v45, %s1321_s16 }
  0x9f   : > { %738 = vrot.lane.b32.xlu1 %v648_v62, %s1320_s15 }
  0xa0   : > { %822 = vrot.lane.b32.xlu0 %v1742_v45, %s1323_s18 }
  0xa3   : > { %760 = vrot.lane.b32.xlu1 %v643_v51, %s1321_s16 }
  0xa4   : > { %754 = vrot.lane.b32.xlu0 %v1675_v10, %s1321_s16 }
  0xa7   : > { %830 = vrot.lane.b32.xlu1 %v643_v51, %s1323_s18 }
  0xa8   : > { %776 = vrot.lane.b32.xlu0 %v1642_v43, %s1319_s14 }
  0xab   : > { %762 = vrot.lane.b32.xlu1 %v651_v26, %s1321_s16 }
  0xac   : > { %778 = vrot.lane.b32.xlu0 %v1563_v58, %s1319_s14 }
  0xaf   : > { %784 = vrot.lane.b32.xlu1 %v568_v9, %s1319_s14 }
  0xb0   : > { %800 = vrot.lane.b32.xlu0 %v1657_v38, %s1322_s27 }
  0xb3   : > { %786 = vrot.lane.b32.xlu1 %v1368_v2, %s1319_s14 }
  0xb4   : > { %802 = vrot.lane.b32.xlu0 %v1663_v54, %s1322_s27 }
  0xb7   : > { %808 = vrot.lane.b32.xlu1 %v648_v62, %s1322_s27 }
  0xb8   : > { %824 = vrot.lane.b32.xlu0 %v1675_v10, %s1323_s18 }
  0xb9   : > { %v709_v29 = vpop.permute.xlu1 %708 }
  0xba   : > { %v701_v27 = vpop.permute.xlu0 %700 }
  0xbb   : > { %v862_v30 = vsel %vm861_vm13, %v1768_v1, %v701_v27  ;;  %810 = vrot.lane.b32.xlu1 %v1374_v8, %s1322_s27 }
  0xbc   : > { %826 = vrot.lane.b32.xlu0 %v1684_v35, %s1323_s18 }
  0xbd   : > { %v711_v2 = vpop.permute.xlu1 %710 }
  0xbe   : > { %v703_v38 = vpop.permute.xlu0 %702 }
  0xbf   : > { %832 = vrot.lane.b32.xlu1 %v651_v26, %s1323_s18 }
  0xc1   : > { %v781_v54 = vpop.permute.xlu1 %780 }
  0xc2   : > { %v773_v4 = vpop.permute.xlu0 %772 }
  0xc3   : > { %834 = vrot.lane.b32.xlu1 %v1395_v11, %s1323_s18 }
  0xc5   : > { %v713_v10 = vpop.permute.xlu1 %712 }
  0xc6   : > { %v705_v24 = vpop.permute.xlu0 %704 }
  0xc9   : > { %v783_v59 = vpop.permute.xlu1 %782 }
  0xca   : > { %v775_v42 = vpop.permute.xlu0 %774 }
  0xcd   : > { %v655_v33 = vpop.permute.xlu1 %654 }
  0xce   : > { %v661_v15 = vpop.permute.xlu0 %660 }
  0xcf   : > { %v848_v40 = vsel %vm523_vm7, %v1642_v43, %v661_v15  ;;  %v845_v43 = vsel %vm523_vm7, %v1571_v18, %v655_v33 }
  0xd1   : > { %v663_v32 = vpop.permute.xlu1 %662 }
  0xd2   : > { %v679_v8 = vpop.permute.xlu0 %678  ;;  %v849_v35 = vsel %vm523_vm7, %v1563_v58, %v663_v32 }
  0xd3   : > { %v854_v55 = vsel %vm852_vm12, %v845_v43, %v679_v8 }
  0xd4   : > { %v863_v6 = vsel %vm861_vm13, %v854_v55, %v703_v38 }
  0xd5   : > { %v685_v28 = vpop.permute.xlu1 %684 }
  0xd6   : > { %v725_v34 = vpop.permute.xlu0 %724  ;;  %v857_v49 = vsel %vm852_vm12, %v848_v40, %v685_v28 }
  0xd7   : > { %v871_v44 = vsel %vm870_vm14, %v862_v30, %v725_v34  ;;  %v866_v48 = vsel %vm861_vm13, %v857_v49, %v709_v29 }
  0xd9   : > { %v687_v0 = vpop.permute.xlu1 %686 }
  0xda   : > { %v858_v19 = vsel %vm852_vm12, %v849_v35, %v687_v0  ;;  %v657_v25 = vpop.permute.xlu0 %656 }
  0xdb   : > { %v867_v41 = vsel %vm861_vm13, %v858_v19, %v711_v2  ;;  %v846_v50 = vsel %vm523_vm7, %v1599_v22, %v657_v25 }
  0xdd   : > { %v733_v11 = vpop.permute.xlu1 %732 }
  0xde   : > { %v727_v37 = vpop.permute.xlu0 %726  ;;  %v875_v57 = vsel %vm870_vm14, %v866_v48, %v733_v11 }
  0xdf   : > { %v872_v18 = vsel %vm870_vm14, %v863_v6, %v727_v37 }
  0xe1   : > { %v665_v39 = vpop.permute.xlu1 %664 }
  0xe2   : > { %v749_v45 = vpop.permute.xlu0 %748  ;;  %v850_v12 = vsel %vm523_vm7, %v1588_v3, %v665_v39 }
  0xe3   : > { %v880_v58 = vsel %vm879_vm15, %v871_v44, %v749_v45 }
  0xe4   : > { %v889_v47 = vsel %vm888_vm0, %v880_v58, %v773_v4 }
  0xe5   : > { %v735_v46 = vpop.permute.xlu1 %734 }
  0xe6   : > { %v1852_v23 = vpop.permute.xlu0 %658  ;;  %v876_v17 = vsel %vm870_vm14, %v867_v41, %v735_v46 }
  0xe9   : > { %v757_v52 = vpop.permute.xlu1 %756 }
  0xea   : > { %v884_v51 = vsel %vm879_vm15, %v875_v57, %v757_v52  ;;  %v681_v56 = vpop.permute.xlu0 %680 }
  0xeb   : > { %v893_v61 = vsel %vm888_vm0, %v884_v51, %v781_v54  ;;  %v855_v1 = vsel %vm852_vm12, %v846_v50, %v681_v56 }
  0xec   : > { %v864_v5 = vsel %vm861_vm13, %v855_v1, %v705_v24 }
  0xed   : > { %v1864_v14 = vpop.permute.xlu1 %666 }
  0xee   : > { %v751_v7 = vpop.permute.xlu0 %750  ;;  %v851_v6 = vsel %vm523_vm7, %v1620_v53, %v1864_v14 }
  0xef   : > { %v881_v9 = vsel %vm879_vm15, %v872_v18, %v751_v7 }
  0xf0   : > { %v890_v16 = vsel %vm888_vm0, %v881_v9, %v775_v42 }
  0xf1   : > { %v689_v22 = vpop.permute.xlu1 %688 }
  0xf2   : > { %v859_v20 = vsel %vm852_vm12, %v850_v12, %v689_v22  ;;  %v683_v60 = vpop.permute.xlu0 %682 }
  0xf3   : > { %v868_v21 = vsel %vm861_vm13, %v859_v20, %v713_v10 }
  0xf5   : > { %v759_v31 = vpop.permute.xlu1 %758 }
  0xf6   : > { %v885_v62 = vsel %vm879_vm15, %v876_v17, %v759_v31  ;;  %v797_v13 = vpop.permute.xlu0 %796 }
  0xf7   : > { %v894_v63 = vsel %vm888_vm0, %v885_v62, %v783_v59  ;;  %v898_v54 = vsel %vm897_vm1, %v889_v47, %v797_v13  ;;  %v847_v47 = vsel %vm523_vm7, %v1634_v36, %v1852_v23 }
  0xf8   : > { %v856_v52 = vsel %vm852_vm12, %v847_v47, %v683_v60 }
  0xf9   : > { %v691_v26 = vpop.permute.xlu1 %690 }
  0xfa   : > { %v707_v29 = vpop.permute.xlu0 %706  ;;  %v860_v12 = vsel %vm852_vm12, %v851_v6, %v691_v26  ;;  %v1172_v26 = vld [vmem:[%s1946_s4] ss:$0 sm:$0xff] }
  0xfb   : > { %v865_v51 = vsel %vm861_vm13, %v856_v52, %v707_v29 }
  0xfd   : > { %v805_v27 = vpop.permute.xlu1 %804 }
  0xfe   : > { %v729_v3 = vpop.permute.xlu0 %728  ;;  %v902_v59 = vsel %vm897_vm1, %v893_v61, %v805_v27 }
  0xff   : > { %v873_v46 = vsel %vm870_vm14, %v864_v5, %v729_v3 }
 0x101   : > { %v715_v30 = vpop.permute.xlu1 %714 }
 0x102   : > { %v799_v2 = vpop.permute.xlu0 %798  ;;  %v869_v20 = vsel %vm861_vm13, %v860_v12, %v715_v30 }
 0x103   : > { %v899_v28 = vsel %vm897_vm1, %v890_v16, %v799_v2 }
 0x105   : > { %v737_v38 = vpop.permute.xlu1 %736 }
 0x106   : > { %v821_v4 = vpop.permute.xlu0 %820  ;;  %v877_v23 = vsel %vm870_vm14, %v868_v21, %v737_v38 }
 0x107   : > { %v907_v10 = vsel %vm906_vm2, %v898_v54, %v821_v4 }
 0x108   : > { %1218 = vmatprep.mubr.msk.f32.mxu0 %vm931_vm3, %v907_v10 }
 0x109   : > { %v807_v24 = vpop.permute.xlu1 %806 }
 0x10a   : > { %v731_v42 = vpop.permute.xlu0 %730  ;;  %v903_v25 = vsel %vm897_vm1, %v894_v63, %v807_v24 }
 0x10b   : > { %v874_v56 = vsel %vm870_vm14, %v865_v51, %v731_v42 }
 0x10d   : > { %v829_v33 = vpop.permute.xlu1 %828 }
 0x10e   : > { %v911_v15 = vsel %vm906_vm2, %v902_v59, %v829_v33  ;;  %v753_v32 = vpop.permute.xlu0 %752 }
 0x10f   : > { %1224 = vmatprep.mubr.msk.f32.mxu1 %vm931_vm3, %v911_v15  ;;  %v882_v48 = vsel %vm879_vm15, %v873_v46, %v753_v32 }
 0x111   : > { %v739_v8 = vpop.permute.xlu1 %738 }
 0x112   : > { %v823_v34 = vpop.permute.xlu0 %822  ;;  %v878_v53 = vsel %vm870_vm14, %v869_v20, %v739_v8 }
 0x113   : > { %v908_v35 = vsel %vm906_vm2, %v899_v28, %v823_v34 }
 0x114   : > { %1219 = vmatmul.mubr.msk.f32.vlgmr.msra.gmra.mrb[0].mxu0 %vm931_vm3, %v908_v35 }
 0x115   : > { %v761_v0 = vpop.permute.xlu1 %760 }
 0x116   : > { %v755_v19 = vpop.permute.xlu0 %754  ;;  %v886_v18 = vsel %vm879_vm15, %v877_v23, %v761_v0 }
 0x117   : > { %v883_v1 = vsel %vm879_vm15, %v874_v56, %v755_v19 }
 0x119   : > { %v831_v41 = vpop.permute.xlu1 %830 }
 0x11a   : > { %v912_v11 = vsel %vm906_vm2, %v903_v25, %v831_v41  ;;  %v777_v37 = vpop.permute.xlu0 %776 }
 0x11b   : > { %1225 = vmatmul.mubr.msk.f32.vlgmr.msra.gmra.mrb[0].mxu1 %vm931_vm3, %v912_v11  ;;  %v891_v43 = vsel %vm888_vm0, %v882_v48, %v777_v37 }
 0x11d   : > { %v763_v39 = vpop.permute.xlu1 %762 }
 0x11e   : > { %v779_v40 = vpop.permute.xlu0 %778  ;;  %v887_v17 = vsel %vm879_vm15, %v878_v53, %v763_v39 }
 0x11f   : > { %v892_v5 = vsel %vm888_vm0, %v883_v1, %v779_v40 }
 0x121   : > { %v785_v44 = vpop.permute.xlu1 %784 }
 0x122   : > { %v801_v45 = vpop.permute.xlu0 %800  ;;  %v895_v22 = vsel %vm888_vm0, %v886_v18, %v785_v44 }
 0x123   : > { %v900_v55 = vsel %vm897_vm1, %v891_v43, %v801_v45 }
 0x125   : > { %v787_v58 = vpop.permute.xlu1 %786 }
 0x126   : > { %v803_v49 = vpop.permute.xlu0 %802  ;;  %v896_v31 = vsel %vm888_vm0, %v887_v17, %v787_v58 }
 0x127   : > { %v901_v7 = vsel %vm897_vm1, %v892_v5, %v803_v49 }
 0x129   : > { %v809_v57 = vpop.permute.xlu1 %808 }
 0x12a   : > { %v825_v50 = vpop.permute.xlu0 %824  ;;  %v904_v60 = vsel %vm897_vm1, %v895_v22, %v809_v57 }
 0x12b   : > { %v909_v61 = vsel %vm906_vm2, %v900_v55, %v825_v50 }
 0x12c   : > { %1221 = vmatprep.mubr.msk.f32.mxu0 %vm931_vm3, %v909_v61 }
 0x12d   : > { %v811_v36 = vpop.permute.xlu1 %810 }
 0x12e   : > { %v827_v9 = vpop.permute.xlu0 %826  ;;  %v905_v62 = vsel %vm897_vm1, %v896_v31, %v811_v36 }
 0x12f   : > { %v910_v16 = vsel %vm906_vm2, %v901_v7, %v827_v9 }
 0x130   : > { %1222 = vmatmul.mubr.msk.f32.gmra.mrb[2].mxu0 %vm931_vm3, %v910_v16 }
 0x131   : > { %v833_v21 = vpop.permute.xlu1 %832 }
 0x132   : > { %v913_v14 = vsel %vm906_vm2, %v904_v60, %v833_v21 }
 0x133   : > { %1227 = vmatprep.mubr.msk.f32.mxu1 %vm931_vm3, %v913_v14 }
 0x135   : > { %v835_v13 = vpop.permute.xlu1 %834 }
 0x136   : > { %v914_v63 = vsel %vm906_vm2, %v905_v62, %v835_v13 }
 0x137   : > { %1228 = vmatmul.mubr.msk.f32.gmra.mrb[2].mxu1 %vm931_vm3, %v914_v63 }
 0x1e7   : > { %v1220_v29 = vpop.f32.mrb[0].mxu0 }
 0x1e8   : > { %v1028_v27 = vadd.f32 %v1220_v29, %v1172_v26  ;;  %v1022_v3 = vpop.f32.mrb[1].mxu0 }
 0x1e9   : > { %v1023_v30 = vadd.f32 %v1172_v26, %v1022_v3 }
 0x1ea   : > { %1062 = vst.msk [vmem:[%s267_s19 + $0x8] sm:$0xff] %vm523_vm7, %v1028_v27 }
 0x1eb   : > { %1061 = vst.msk [vmem:[%s267_s19] sm:$0xff] %vm523_vm7, %v1023_v30 }
 0x1ee   : > { %v1226_v2 = vpop.f32.mrb[0].mxu1 }
 0x1ef   : > { %v1048_v38 = vadd.f32 %v1226_v2, %v1172_v26  ;;  %v1042_v54 = vpop.f32.mrb[1].mxu1 }
 0x1f0   : > { %v1043_v4 = vadd.f32 %v1172_v26, %v1042_v54 }
 0x1f1   : > { %1066 = vst.msk [vmem:[%s267_s19 + $0x28] sm:$0xff] %vm523_vm7, %v1048_v38 }
 0x1f2   : > { %1065 = vst.msk [vmem:[%s267_s19 + $0x20] sm:$0xff] %vm523_vm7, %v1043_v4 }
 0x203   : > { %v1223_v10 = vpop.f32.mrb[2].mxu0 }
 0x204   : > { %v1038_v24 = vadd.f32 %v1223_v10, %v1172_v26  ;;  %v1032_v42 = vpop.f32.mrb[3].mxu0 }
 0x205   : > { %v1033_v59 = vadd.f32 %v1172_v26, %v1032_v42 }
 0x206   : > { %1064 = vst.msk [vmem:[%s267_s19 + $0x18] sm:$0xff] %vm523_vm7, %v1038_v24 }
 0x207   : > { %1063 = vst.msk [vmem:[%s267_s19 + $0x10] sm:$0xff] %vm523_vm7, %v1033_v59 }
 0x20a   : > { %v1229_v33 = vpop.f32.mrb[2].mxu1 }
 0x20b   : > { %v1058_v15 = vadd.f32 %v1229_v33, %v1172_v26  ;;  %v1052_v32 = vpop.f32.mrb[3].mxu1 }
 0x20c   : > { %v1053_v8 = vadd.f32 %v1172_v26, %v1052_v32 }
 0x20d   : > { %1068 = vst.msk [vmem:[%s267_s19 + $0x38] sm:$0xff] %vm523_vm7, %v1058_v15 }
 0x20e   : > { %1067 = vst.msk [vmem:[%s267_s19 + $0x30] sm:$0xff] %vm523_vm7, %v1053_v8 }
 0x20f PF: > { %s17_s21 = sadd.s32 1, %s1312_s21  }
 0x210   : > { %p14_p4 = scmp.ge.s32.totalorder %s17_s21, 4  }
 0x212   :  { %16 = sbr.rel (!%p14_p4) target bundleno = 1 (0x1), region = 82 }

// kernel: residual_forward.3
= control target key start
LH: loop header
LB: loop body
LE: loop exit
PB: predicated region body
PF: predicated region fallthrough
CT: control target
= control target key end

     0   :  { %s2582_s21 = smov 0   ;;  %s4276_s0 = inlined_call_operand.vmem [shape: f32[2,9,9,4], index: 0, kind: input, shape index: {}]   ;;  %s4277_s1 = inlined_call_operand.vmem [shape: f32[2,9,9,4], index: 1, kind: input, shape index: {}]   ;;  %s4278_s2 = inlined_call_operand.vmem [shape: f32[2,9,9,4], index: 2, kind: input, shape index: {}]   ;;  %s4279_s3 = inlined_call_operand.vmem [shape: f32[2,9,9,4], index: 3, kind: input, shape index: {}]   ;;  %s4280_s4 = inlined_call_operand.vmem [shape: f32[36,8], index: 4, kind: input, shape index: {}]   ;;  %s4281_s5 = inlined_call_operand.vmem [shape: f32[1,8], index: 5, kind: input, shape index: {}]   ;;  %s4282_s6 = inlined_call_operand.vmem [shape: f32[128,8], index: 6, kind: output, shape index: {}]  }
   0x1 LB: > { %s2588_s22 = sadd.s32 4294967295, %s2537_s21   ;;  %p2267_p0 = scmp.ge.s32.totalorder %s2537_s21, 1  ;;  %s2537_s21 = sphi %s2582_s21, %s16_s21  }
   0x2   : > { %p242_p1 = scmp.lt.s32.totalorder %s2537_s21, 3 }
   0x4   : > { %p243_p2 = pnand %p2267_p0, %p242_p1 }
   0x6   : > { %246 = sbr.rel (%p243_p2) target bundleno = 865 (0x361), region = 44 }
   0xd   : > { %p287_p3 = scmp.lt.s32.totalorder %s2588_s22, 1  ;;  %s2539_s28 = smov 4   ;;  %vm406_vm0 = vcmask 1046528   ;;  %vm782_vm1 = vcmask 1043456   ;;  %vm685_vm2 = vcmask 31744   ;;  %vm694_vm3 = vcmask 64512  }
   0xe   : > { %s2540_s8 = smov 8   ;;  %s2541_s12 = smov 12   ;;  %vm703_vm4 = vcmask 97280   ;;  %vm712_vm5 = vcmask 130048   ;;  %vm721_vm6 = vcmask 162816   ;;  %vm730_vm7 = vcmask 195584  }
   0xf   : > { %s288_s23 = scalar_select %p287_p3, %s2588_s22, 1  ;;  %vm739_vm8 = vcmask 228352   ;;  %vm748_vm9 = vcmask 261120   ;;  %vm757_vm10 = vcmask 293888  }
  0x10   : > { %s2542_s16 = smov 16   ;;  %s2543_s17 = smov 20  }
  0x11   : > { %s2594_s24 = smul.u32 144, %s288_s23  ;;  %s2544_s18 = smov 24  }
  0x12   : > { %s2545_s9 = smov 28   ;;  %s2546_s14 = smov 32  }
  0x13   : > { %s2600_s27 = scalar_lea.vmem %s4277_s1, %s2594_s24  ;;  %s2622_s7 = scalar_lea.vmem %s4276_s0, %s2594_s24 }
  0x14   : > { %v2603_v0 = vld [vmem:[%s2600_s27 + $0x20] sm:$0xff]  ;;  %v2613_v2 = vld [vmem:[%s2600_s27 + $0x30] sm:$0xff]  ;;  %v316_v7 = vld [vmem:[%s2622_s7 + $0x18] sm:$0x1]  ;;  %s2728_s11 = scalar_lea.vmem %s4278_s2, %s2594_s24  ;;  %s2758_s15 = scalar_lea.vmem %s4279_s3, %s2594_s24 }
  0x15   : > { %v2606_v1 = vld [vmem:[%s2600_s27] sm:$0xff]  ;;  %488 = vrot.lane.b32.xlu1 %v2603_v0, %s2539_s28  ;;  %v2616_v3 = vld [vmem:[%s2600_s27 + $0x10] sm:$0xff]  ;;  %v314_v9 = vld [vmem:[%s2622_s7 + $0x8] sm:$0x1]  ;;  %v411_v13 = vrot.slane %v316_v7, 1 }
  0x16   : > { %484 = vrot.lane.b32.xlu0 %v2606_v1, %s2539_s28  ;;  %v2629_v4 = vld [vmem:[%s2600_s27 + $0x50] sm:$0xff]  ;;  %v2632_v5 = vld [vmem:[%s2600_s27 + $0x40] sm:$0xff]  ;;  %v408_v15 = vrot.slane %v314_v9, 1  ;;  %v320_v17 = vld [vmem:[%s2622_s7 + $0x38] sm:$0x1] }
  0x17   : > { %4348 = vst [vmem:[#allocation2_spill] sm:$0xff] %v2629_v4  ;;  %v2635_v6 = vld [vmem:[%s2622_s7 + $0x10] sm:$0xff]  ;;  %v2639_v8 = vld [vmem:[%s2622_s7] sm:$0xff]  ;;  %v318_v19 = vld [vmem:[%s2622_s7 + $0x28] sm:$0x1]  ;;  %v417_v21 = vrot.slane %v320_v17, 1 }
  0x18   : > { %v2647_v10 = vld [vmem:[%s2600_s27 + $0x70] sm:$0xff]  ;;  %v2650_v11 = vld [vmem:[%s2600_s27 + $0x60] sm:$0xff]  ;;  %v410_v12 = vrot.slane %v2635_v6, 1  ;;  %v407_v14 = vrot.slane %v2639_v8, 1  ;;  %v414_v25 = vrot.slane %v318_v19, 1 }
  0x19   : > { %490 = vrot.lane.b32.xlu1 %v2613_v2, %s2539_s28  ;;  %4349 = vst [vmem:[#allocation3_spill] sm:$0xff] %v2647_v10  ;;  %4350 = vst [vmem:[#allocation4_spill] sm:$0xff] %v2650_v11  ;;  %v2655_v16 = vld [vmem:[%s2622_s7 + $0x30] sm:$0xff]  ;;  %v2659_v18 = vld [vmem:[%s2622_s7 + $0x20] sm:$0xff] }
  0x1a   : > { %486 = vrot.lane.b32.xlu0 %v2616_v3, %s2539_s28  ;;  %v416_v20 = vrot.slane %v2655_v16, 1  ;;  %v2668_v22 = vsel %vm406_vm0, %v410_v12, %v411_v13  ;;  %v2671_v23 = vsel %vm406_vm0, %v407_v14, %v408_v15  ;;  %v413_v24 = vrot.slane %v2659_v18, 1  ;;  %v2675_v26 = vld [vmem:[%s2622_s7 + $0x50] sm:$0xff]  ;;  %v324_v27 = vld [vmem:[%s2622_s7 + $0x58] sm:$0x1]  ;;  %v2679_v28 = vld [vmem:[%s2622_s7 + $0x40] sm:$0xff] }
  0x1b   : > { %v322_v29 = vld [vmem:[%s2622_s7 + $0x48] sm:$0x1]  ;;  %v422_v31 = vrot.slane %v2675_v26, 1  ;;  %v423_v33 = vrot.slane %v324_v27, 1  ;;  %v419_v34 = vrot.slane %v2679_v28, 1  ;;  %v2695_v36 = vld [vmem:[%s2622_s7 + $0x70] sm:$0xff] }
  0x1c   : > { %v2687_v30 = vsel %vm406_vm0, %v416_v20, %v417_v21  ;;  %v2691_v32 = vsel %vm406_vm0, %v413_v24, %v414_v25  ;;  %v420_v35 = vrot.slane %v322_v29, 1  ;;  %v328_v37 = vld [vmem:[%s2622_s7 + $0x78] sm:$0x1]  ;;  %v2699_v38 = vld [vmem:[%s2622_s7 + $0x60] sm:$0xff]  ;;  %v326_v39 = vld [vmem:[%s2622_s7 + $0x68] sm:$0x1] }
  0x1d   : > { %494 = vrot.lane.b32.xlu1 %v2629_v4, %s2539_s28  ;;  %4351 = vst [vmem:[#allocation5_spill] sm:$0xff] %v2699_v38  ;;  %v428_v40 = vrot.slane %v2695_v36, 1  ;;  %v429_v41 = vrot.slane %v328_v37, 1  ;;  %v2708_v42 = vsel %vm406_vm0, %v422_v31, %v423_v33  ;;  %v425_v44 = vrot.slane %v2699_v38, 1  ;;  %v2735_v48 = vld [vmem:[%s2728_s11 + $0x10] sm:$0xff]  ;;  %v349_v49 = vld [vmem:[%s2728_s11] sm:$0xff] }
  0x1e   : > { %492 = vrot.lane.b32.xlu0 %v2632_v5, %s2539_s28  ;;  %4352 = vst [vmem:[#allocation6_spill] sm:$0xff] %v2708_v42  ;;  %v2711_v43 = vsel %vm406_vm0, %v419_v34, %v420_v35  ;;  %v426_v45 = vrot.slane %v326_v39, 1  ;;  %4355 = vst [vmem:[#allocation9_spill] sm:$0xff] %v2735_v48  ;;  %v355_v50 = vld [vmem:[%s2728_s11 + $0x30] sm:$0xff]  ;;  %v2743_v51 = vld [vmem:[%s2728_s11 + $0x20] sm:$0xff]  ;;  %v450_v7 = vrot.slane %v2735_v48, 1 }
  0x1f   : > { %v2719_v46 = vsel %vm406_vm0, %v428_v40, %v429_v41  ;;  %4356 = vst [vmem:[#allocation10_spill] sm:$0xff] %v2743_v51  ;;  %v359_v52 = vld [vmem:[%s2728_s11 + $0x50] sm:$0xff]  ;;  %v357_v53 = vld [vmem:[%s2728_s11 + $0x40] sm:$0xff]  ;;  %v352_v62 = vld [vmem:[%s2728_s11 + $0x18] sm:$0x1]  ;;  %v447_v9 = vrot.slane %v349_v49, 1 }
  0x20   : > { %4353 = vst [vmem:[#allocation7_spill] sm:$0xff] %v2719_v46  ;;  %v2722_v47 = vsel %vm406_vm0, %v425_v44, %v426_v45  ;;  %v363_v54 = vld [vmem:[%s2728_s11 + $0x70] sm:$0xff]  ;;  %v361_v55 = vld [vmem:[%s2728_s11 + $0x60] sm:$0xff]  ;;  %v350_v63 = vld [vmem:[%s2728_s11 + $0x8] sm:$0x1]  ;;  %v451_v14 = vrot.slane %v352_v62, 1 }
  0x21   : > { %498 = vrot.lane.b32.xlu1 %v2647_v10, %s2539_s28  ;;  %4354 = vst [vmem:[#allocation8_spill] sm:$0xff] %v2722_v47  ;;  %v2763_v56 = vld [vmem:[%s2758_s15 + $0x10] sm:$0xff]  ;;  %v2766_v57 = vld [vmem:[%s2758_s15] sm:$0xff]  ;;  %v448_v15 = vrot.slane %v350_v63, 1  ;;  %v356_v17 = vld [vmem:[%s2728_s11 + $0x38] sm:$0x1] }
  0x22   : > { %496 = vrot.lane.b32.xlu0 %v2650_v11, %s2539_s28  ;;  %4357 = vst [vmem:[#allocation11_spill] sm:$0xff] %v2763_v56  ;;  %4358 = vst [vmem:[#allocation12_spill] sm:$0xff] %v2766_v57  ;;  %v2773_v58 = vld [vmem:[%s2758_s15 + $0x30] sm:$0xff]  ;;  %v2776_v59 = vld [vmem:[%s2758_s15 + $0x20] sm:$0xff]  ;;  %v456_v20 = vrot.slane %v355_v50, 1  ;;  %v453_v21 = vrot.slane %v2743_v51, 1  ;;  %v2809_v24 = vsel %vm406_vm0, %v450_v7, %v451_v14 }
  0x23   : > { %4359 = vst [vmem:[#allocation13_spill] sm:$0xff] %v2773_v58  ;;  %v2783_v60 = vld [vmem:[%s2758_s15 + $0x50] sm:$0xff]  ;;  %v2786_v61 = vld [vmem:[%s2758_s15 + $0x40] sm:$0xff]  ;;  %v354_v19 = vld [vmem:[%s2728_s11 + $0x28] sm:$0x1]  ;;  %v2812_v25 = vsel %vm406_vm0, %v447_v9, %v448_v15  ;;  %v457_v27 = vrot.slane %v356_v17, 1 }
  0x24   : > { %4360 = vst [vmem:[#allocation14_spill] sm:$0xff] %v2786_v61  ;;  %v2796_v12 = vld [vmem:[%s2758_s15 + $0x70] sm:$0xff]  ;;  %v2799_v13 = vld [vmem:[%s2758_s15 + $0x60] sm:$0xff]  ;;  %4362 = vst [vmem:[#allocation16_spill] sm:$0xff] %v2809_v24  ;;  %v454_v29 = vrot.slane %v354_v19, 1  ;;  %v462_v34 = vrot.slane %v359_v52, 1 }
  0x25   : > { %510 = vrot.lane.b32.xlu1 %v2668_v22, %s2540_s8  ;;  %4361 = vst [vmem:[#allocation15_spill] sm:$0xff] %v2796_v12  ;;  %4363 = vst [vmem:[#allocation17_spill] sm:$0xff] %v2812_v25  ;;  %v360_v31 = vld [vmem:[%s2728_s11 + $0x58] sm:$0x1]  ;;  %v358_v33 = vld [vmem:[%s2728_s11 + $0x48] sm:$0x1]  ;;  %v2821_v37 = vsel %vm406_vm0, %v456_v20, %v457_v27 }
  0x26   : > { %508 = vrot.lane.b32.xlu0 %v2671_v23, %s2540_s8  ;;  %v459_v35 = vrot.slane %v357_v53, 1  ;;  %4364 = vst [vmem:[#allocation18_spill] sm:$0xff] %v2821_v37  ;;  %v2824_v39 = vsel %vm406_vm0, %v453_v21, %v454_v29  ;;  %v463_v40 = vrot.slane %v360_v31, 1  ;;  %v460_v41 = vrot.slane %v358_v33, 1  ;;  %v364_v44 = vld [vmem:[%s2728_s11 + $0x78] sm:$0x1] }
  0x27   : > { %4365 = vst [vmem:[#allocation19_spill] sm:$0xff] %v2824_v39  ;;  %v362_v45 = vld [vmem:[%s2728_s11 + $0x68] sm:$0x1]  ;;  %v469_v62 = vrot.slane %v364_v44, 1  ;;  %v385_v7 = vld [vmem:[%s4280_s4] sm:$0xff]  ;;  %v387_v17 = vld [vmem:[%s4280_s4 + $0x10] sm:$0xff] }
  0x28   : > { %v466_v63 = vrot.slane %v362_v45, 1  ;;  %v386_v9 = vld [vmem:[%s4280_s4 + $0x8] sm:$0xff]  ;;  %v329_v14 = vld [vmem:[%s2622_s7 + $0x80] sm:$0xff]  ;;  %v388_v19 = vld [vmem:[%s4280_s4 + $0x18] sm:$0xff] }
  0x29   : > { %514 = vrot.lane.b32.xlu1 %v2687_v30, %s2540_s8  ;;  %v2871_v15 = vpack.c.bf16 %v386_v9, %v385_v7  ;;  %v2885_v20 = vpack.c.bf16 %v388_v19, %v387_v17  ;;  %v2899_v21 = vld [vmem:[%s4280_s4 + $0x20] sm:$0xf]  ;;  %v330_v33 = vld [vmem:[%s2622_s7 + $0x88] sm:$0x1]  ;;  %v334_v9 = vld [vmem:[%s2600_s27 + $0x18] sm:$0x1] }
  0x2a   : > { %512 = vrot.lane.b32.xlu0 %v2691_v32, %s2540_s8  ;;  %4372 = vst [vmem:[#allocation26_spill] sm:$0xff] %v2899_v21  ;;  %v2920_v27 = vld [vmem:[%s2600_s27 + $0x80] sm:$0xff]  ;;  %v332_v19 = vld [vmem:[%s2600_s27 + $0x8] sm:$0x1] }
  0x2b   : > { %4370 = vst [vmem:[#allocation24_spill] sm:$0xff] %v2871_v15  ;;  %2454 = vmatprep.subr.bf16.mxu0 %v2871_v15  ;;  %2462 = vmatprep.subr.bf16.mxu1 %v2871_v15  ;;  %4371 = vst [vmem:[#allocation25_spill] sm:$0xff] %v2885_v20 }
  0x2c   : > { %2456 = vmatpush3.bf16.msra.mxu0 %v2871_v15  ;;  %2464 = vmatpush3.bf16.msra.mxu1 %v2871_v15  ;;  %4373 = vst [vmem:[#allocation27_spill] sm:$0xff] %v2920_v27 }
  0x2d   : > { %518 = vrot.lane.b32.xlu1 %v2708_v42, %s2540_s8  ;;  %2458 = vmatprep.subr.bf16.mxu0 %v2885_v20 }
  0x2e   : > { %516 = vrot.lane.b32.xlu0 %v2711_v43, %s2540_s8  ;;  %2466 = vmatprep.subr.bf16.mxu1 %v2885_v20 }
  0x30   : > { %2460 = vmatpush3.bf16.msra.mxu0 %v2885_v20  ;;  %2468 = vmatpush3.bf16.msra.mxu1 %v2885_v20  ;;  %v905_v20 = vrot.slane %v2603_v0, 1 }
  0x31   : > { %522 = vrot.lane.b32.xlu1 %v2719_v46, %s2540_s8  ;;  %2373 = vmatprep.subr.msk.mxu0 %vm782_vm1, %v2899_v21 }
  0x32   : > { %520 = vrot.lane.b32.xlu0 %v2722_v47, %s2540_s8  ;;  %2395 = vmatprep.subr.msk.mxu1 %vm782_vm1, %v2899_v21 }
  0x34   : > { %2374 = vmatpush3.msk.msra.mxu0 %vm782_vm1, %v2899_v21  ;;  %2396 = vmatpush3.msk.msra.mxu1 %vm782_vm1, %v2899_v21 }
  0x35   : > { %534 = vrot.lane.b32.xlu1 %v2735_v48, %s2541_s12  ;;  %2470 = vmatprep.subr.bf16.mxu0 %v2871_v15 }
  0x36   : > { %532 = vrot.lane.b32.xlu0 %v349_v49, %s2541_s12  ;;  %v468_v49 = vrot.slane %v363_v54, 1  ;;  %2478 = vmatprep.subr.bf16.mxu1 %v2871_v15  ;;  %v342_v15 = vld [vmem:[%s2600_s27 + $0x58] sm:$0x1] }
  0x39   : > { %538 = vrot.lane.b32.xlu1 %v355_v50, %s2541_s12  ;;  %v465_v50 = vrot.slane %v361_v55, 1 }
  0x3a   : > { %536 = vrot.lane.b32.xlu0 %v2743_v51, %s2541_s12 }
  0x3d   : > { %542 = vrot.lane.b32.xlu1 %v359_v52, %s2541_s12  ;;  %v2833_v52 = vsel %vm406_vm0, %v462_v34, %v463_v40  ;;  %v473_v34 = vrot.slane %v329_v14, 1 }
  0x3e   : > { %540 = vrot.lane.b32.xlu0 %v357_v53, %s2541_s12  ;;  %4366 = vst [vmem:[#allocation20_spill] sm:$0xff] %v2833_v52  ;;  %v2836_v53 = vsel %vm406_vm0, %v459_v35, %v460_v41  ;;  %v474_v35 = vrot.slane %v330_v33, 1  ;;  %v903_v33 = vrot.slane %v334_v9, 1  ;;  %v908_v9 = vrot.slane %v2613_v2, 1 }
  0x3f   : > { %4367 = vst [vmem:[#allocation21_spill] sm:$0xff] %v2836_v53 }
  0x40   : > { %v2948_v44 = vsel %vm406_vm0, %v473_v34, %v474_v35  ;;  %v899_v34 = vrot.slane %v2606_v1, 1  ;;  %v900_v35 = vrot.slane %v332_v19, 1 }
  0x41   : > { %546 = vrot.lane.b32.xlu1 %v363_v54, %s2541_s12  ;;  %v2843_v54 = vsel %vm406_vm0, %v468_v49, %v469_v62  ;;  %4374 = vst [vmem:[#allocation28_spill] sm:$0xff] %v2948_v44 }
  0x42   : > { %544 = vrot.lane.b32.xlu0 %v361_v55, %s2541_s12  ;;  %4368 = vst [vmem:[#allocation22_spill] sm:$0xff] %v2843_v54  ;;  %v2846_v55 = vsel %vm406_vm0, %v465_v50, %v466_v63  ;;  %v901_v1 = vsel %vm406_vm0, %v899_v34, %v900_v35  ;;  %v911_v34 = vrot.slane %v2632_v5, 1 }
  0x43   : > { %4369 = vst [vmem:[#allocation23_spill] sm:$0xff] %v2846_v55 }
  0x45   : > { %566 = vrot.lane.b32.xlu1 %v2763_v56, %s2542_s16 }
  0x46   : > { %564 = vrot.lane.b32.xlu0 %v2766_v57, %s2542_s16 }
  0x49   : > { %570 = vrot.lane.b32.xlu1 %v2773_v58, %s2542_s16 }
  0x4a   : > { %568 = vrot.lane.b32.xlu0 %v2776_v59, %s2542_s16 }
  0x4d   : > { %574 = vrot.lane.b32.xlu1 %v2783_v60, %s2542_s16 }
  0x4e   : > { %572 = vrot.lane.b32.xlu0 %v2786_v61, %s2542_s16 }
  0x51   : > { %578 = vrot.lane.b32.xlu1 %v2796_v12, %s2542_s16 }
  0x52   : > { %576 = vrot.lane.b32.xlu0 %v2799_v13, %s2542_s16 }
  0x55   : > { %590 = vrot.lane.b32.xlu1 %v2809_v24, %s2543_s17 }
  0x56   : > { %588 = vrot.lane.b32.xlu0 %v2812_v25, %s2543_s17 }
  0x59   : > { %594 = vrot.lane.b32.xlu1 %v2821_v37, %s2543_s17 }
  0x5a   : > { %592 = vrot.lane.b32.xlu0 %v2824_v39, %s2543_s17 }
  0x5d   : > { %598 = vrot.lane.b32.xlu1 %v2833_v52, %s2543_s17 }
  0x5e   : > { %596 = vrot.lane.b32.xlu0 %v2836_v53, %s2543_s17 }
  0x61   : > { %602 = vrot.lane.b32.xlu1 %v2843_v54, %s2543_s17 }
  0x62   : > { %600 = vrot.lane.b32.xlu0 %v2846_v55, %s2543_s17 }
  0x65   : > { %614 = vrot.lane.b32.xlu1 %v2659_v18, %s2544_s18 }
  0x66   : > { %612 = vrot.lane.b32.xlu0 %v2635_v6, %s2544_s18 }
  0x69   : > { %618 = vrot.lane.b32.xlu1 %v2679_v28, %s2544_s18 }
  0x6a   : > { %616 = vrot.lane.b32.xlu0 %v2655_v16, %s2544_s18 }
  0x6d   : > { %622 = vrot.lane.b32.xlu1 %v2699_v38, %s2544_s18  ;;  %v344_v38 = vld [vmem:[%s2600_s27 + $0x68] sm:$0x1] }
  0x6e   : > { %620 = vrot.lane.b32.xlu0 %v2675_v26, %s2544_s18 }
  0x71   : > { %626 = vrot.lane.b32.xlu1 %v329_v14, %s2544_s18 }
  0x72   : > { %624 = vrot.lane.b32.xlu0 %v2695_v36, %s2544_s18 }
  0x75   : > { %639 = vrot.lane.b32.xlu1 %v2603_v0, %s2545_s9 }
  0x76   : > { %637 = vrot.lane.b32.xlu0 %v2616_v3, %s2545_s9 }
  0x79   : > { %643 = vrot.lane.b32.xlu1 %v2632_v5, %s2545_s9 }
  0x7a   : > { %641 = vrot.lane.b32.xlu0 %v2613_v2, %s2545_s9 }
  0x7d   : > { %647 = vrot.lane.b32.xlu1 %v2650_v11, %s2545_s9 }
  0x7e   : > { %645 = vrot.lane.b32.xlu0 %v2629_v4, %s2545_s9 }
  0x81   : > { %651 = vrot.lane.b32.xlu1 %v2920_v27, %s2545_s9  ;;  %v336_v27 = vld [vmem:[%s2600_s27 + $0x28] sm:$0x1] }
  0x82   : > { %649 = vrot.lane.b32.xlu0 %v2647_v10, %s2545_s9 }
  0x85   : > { %663 = vrot.lane.b32.xlu1 %v2691_v32, %s2546_s14 }
  0x86   : > { %661 = vrot.lane.b32.xlu0 %v2668_v22, %s2546_s14 }
  0x87   : > { %v2930_v29 = vpop.permute.xlu1 %488 }
  0x88   : > { %v2932_v31 = vpop.permute.xlu0 %484 }
  0x89   : > { %667 = vrot.lane.b32.xlu1 %v2711_v43, %s2546_s14 }
  0x8a   : > { %665 = vrot.lane.b32.xlu0 %v2687_v30, %s2546_s14 }
  0x8b   : > { %v2939_v40 = vpop.permute.xlu1 %490 }
  0x8c   : > { %v2941_v41 = vpop.permute.xlu0 %486 }
  0x8d   : > { %671 = vrot.lane.b32.xlu1 %v2722_v47, %s2546_s14 }
  0x8e   : > { %669 = vrot.lane.b32.xlu0 %v2708_v42, %s2546_s14 }
  0x8f   : > { %v2950_v45 = vpop.permute.xlu1 %494 }
  0x90   : > { %v2952_v49 = vpop.permute.xlu0 %492 }
  0x91   : > { %675 = vrot.lane.b32.xlu1 %v2948_v44, %s2546_s14  ;;  %v338_v44 = vld [vmem:[%s2600_s27 + $0x38] sm:$0x1] }
  0x92   : > { %673 = vrot.lane.b32.xlu0 %v2719_v46, %s2546_s14  ;;  %v909_v19 = vrot.slane %v338_v44, 1 }
  0x93   : > { %v2958_v50 = vpop.permute.xlu1 %498 }
  0x94   : > { %v2960_v62 = vpop.permute.xlu0 %496  ;;  %v3013_v44 = vsel %vm406_vm0, %v908_v9, %v909_v19  ;;  %v917_v9 = vrot.slane %v2650_v11, 1 }
  0x95   : > { %961 = vrot.lane.b32.xlu1 %v2668_v22, %s2539_s28 }
  0x96   : > { %959 = vrot.lane.b32.xlu0 %v2671_v23, %s2539_s28  ;;  %v902_v23 = vrot.slane %v2616_v3, 1 }
  0x97   : > { %v2966_v63 = vpop.permute.xlu1 %510 }
  0x98   : > { %v2968_v7 = vpop.permute.xlu0 %508  ;;  %v2997_v21 = vsel %vm406_vm0, %v902_v23, %v903_v33  ;;  %v914_v23 = vrot.slane %v2629_v4, 1  ;;  %v915_v33 = vrot.slane %v342_v15, 1 }
  0x99   : > { %965 = vrot.lane.b32.xlu1 %v2687_v30, %s2539_s28 }
  0x9a   : > { %963 = vrot.lane.b32.xlu0 %v2691_v32, %s2539_s28  ;;  %v3030_v15 = vsel %vm406_vm0, %v914_v23, %v915_v33 }
  0x9b   : > { %v2975_v14 = vpop.permute.xlu1 %514  ;;  %4379 = vst [vmem:[#allocation33_spill] sm:$0xff] %v3030_v15 }
  0x9c   : > { %v2977_v17 = vpop.permute.xlu0 %512 }
  0x9d   : > { %969 = vrot.lane.b32.xlu1 %v2708_v42, %s2539_s28  ;;  %v906_v42 = vrot.slane %v336_v27, 1 }
  0x9e   : > { %967 = vrot.lane.b32.xlu0 %v2711_v43, %s2539_s28 }
  0x9f   : > { %v2986_v51 = vpop.permute.xlu1 %518  ;;  %v3016_v27 = vsel %vm406_vm0, %v905_v20, %v906_v42  ;;  %v920_v42 = vrot.slane %v2647_v10, 1 }
  0xa0   : > { %4375 = vst [vmem:[#allocation29_spill] sm:$0xff] %v2986_v51  ;;  %v2988_v48 = vpop.permute.xlu0 %516  ;;  %v340_v51 = vld [vmem:[%s2600_s27 + $0x48] sm:$0x1] }
  0xa1   : > { %4376 = vst [vmem:[#allocation30_spill] sm:$0xff] %v2988_v48  ;;  %973 = vrot.lane.b32.xlu1 %v2719_v46, %s2539_s28  ;;  %v912_v35 = vrot.slane %v340_v51, 1 }
  0xa2   : > { %971 = vrot.lane.b32.xlu0 %v2722_v47, %s2539_s28 }
  0xa3   : > { %v3003_v48 = vpop.permute.xlu1 %522  ;;  %v3034_v20 = vsel %vm406_vm0, %v911_v34, %v912_v35 }
  0xa4   : > { %4377 = vst [vmem:[#allocation31_spill] sm:$0xff] %v3003_v48  ;;  %v3005_v46 = vpop.permute.xlu0 %520  ;;  %v346_v48 = vld [vmem:[%s2600_s27 + $0x78] sm:$0x1]  ;;  %4380 = vst [vmem:[#allocation34_spill] sm:$0xff] %v3034_v20 }
  0xa5   : > { %4378 = vst [vmem:[#allocation32_spill] sm:$0xff] %v3005_v46  ;;  %985 = vrot.lane.b32.xlu1 %v2997_v21, %s2540_s8  ;;  %v921_v51 = vrot.slane %v346_v48, 1 }
  0xa6   : > { %983 = vrot.lane.b32.xlu0 %v901_v1, %s2540_s8  ;;  %v918_v1 = vrot.slane %v344_v38, 1 }
  0xa7   : > { %v3019_v47 = vpop.permute.xlu1 %534  ;;  %v3046_v23 = vsel %vm406_vm0, %v920_v42, %v921_v51 }
  0xa8   : > { %v3021_v46 = vpop.permute.xlu0 %532  ;;  %4381 = vst [vmem:[#allocation35_spill] sm:$0xff] %v3046_v23  ;;  %v3049_v33 = vsel %vm406_vm0, %v917_v9, %v918_v1 }
  0xa9   : > { %989 = vrot.lane.b32.xlu1 %v3013_v44, %s2540_s8  ;;  %4382 = vst [vmem:[#allocation36_spill] sm:$0xff] %v3049_v33 }
  0xaa   : > { %987 = vrot.lane.b32.xlu0 %v3016_v27, %s2540_s8 }
  0xab   : > { %v3037_v19 = vpop.permute.xlu1 %538 }
  0xac   : > { %v3039_v4 = vpop.permute.xlu0 %536 }
  0xad   : > { %993 = vrot.lane.b32.xlu1 %v3030_v15, %s2540_s8 }
  0xae   : > { %991 = vrot.lane.b32.xlu0 %v3034_v20, %s2540_s8  ;;  %v376_v20 = vld [vmem:[%s2758_s15 + $0x48] sm:$0x1] }
  0xaf   : > { %v3051_v48 = vpop.permute.xlu1 %542 }
  0xb0   : > { %4383 = vst [vmem:[#allocation37_spill] sm:$0xff] %v3051_v48  ;;  %v3053_v34 = vpop.permute.xlu0 %540 }
  0xb1   : > { %4384 = vst [vmem:[#allocation38_spill] sm:$0xff] %v3053_v34  ;;  %997 = vrot.lane.b32.xlu1 %v3046_v23, %s2540_s8 }
  0xb2   : > { %995 = vrot.lane.b32.xlu0 %v3049_v33, %s2540_s8 }
  0xb3   : > { %v3059_v38 = vpop.permute.xlu1 %546 }
  0xb4   : > { %4385 = vst [vmem:[#allocation39_spill] sm:$0xff] %v3059_v38  ;;  %v3061_v35 = vpop.permute.xlu0 %544 }
  0xb5   : > { %4386 = vst [vmem:[#allocation40_spill] sm:$0xff] %v3061_v35  ;;  %1009 = vrot.lane.b32.xlu1 %v2763_v56, %s2541_s12 }
  0xb6   : > { %1007 = vrot.lane.b32.xlu0 %v2766_v57, %s2541_s12 }
  0xb7   : > { %v3067_v42 = vpop.permute.xlu1 %566 }
  0xb8   : > { %v3069_v51 = vpop.permute.xlu0 %564 }
  0xb9   : > { %1013 = vrot.lane.b32.xlu1 %v2773_v58, %s2541_s12 }
  0xba   : > { %1011 = vrot.lane.b32.xlu0 %v2776_v59, %s2541_s12 }
  0xbb   : > { %v3075_v9 = vpop.permute.xlu1 %570 }
  0xbc   : > { %v3077_v1 = vpop.permute.xlu0 %568 }
  0xbd   : > { %1017 = vrot.lane.b32.xlu1 %v2783_v60, %s2541_s12 }
  0xbe   : > { %1015 = vrot.lane.b32.xlu0 %v2786_v61, %s2541_s12 }
  0xbf   : > { %v3083_v23 = vpop.permute.xlu1 %574 }
  0xc0   : > { %4387 = vst [vmem:[#allocation41_spill] sm:$0xff] %v3083_v23  ;;  %v3085_v10 = vpop.permute.xlu0 %572  ;;  %v372_v23 = vld [vmem:[%s2758_s15 + $0x28] sm:$0x1] }
  0xc1   : > { %4388 = vst [vmem:[#allocation42_spill] sm:$0xff] %v3085_v10  ;;  %1021 = vrot.lane.b32.xlu1 %v2796_v12, %s2541_s12  ;;  %v370_v12 = vld [vmem:[%s2758_s15 + $0x18] sm:$0x1] }
  0xc2   : > { %1019 = vrot.lane.b32.xlu0 %v2799_v13, %s2541_s12  ;;  %v935_v11 = vrot.slane %v370_v12, 1 }
  0xc3   : > { %v3091_v33 = vpop.permute.xlu1 %578 }
  0xc4   : > { %4389 = vst [vmem:[#allocation43_spill] sm:$0xff] %v3091_v33  ;;  %v3093_v15 = vpop.permute.xlu0 %576 }
  0xc5   : > { %4390 = vst [vmem:[#allocation44_spill] sm:$0xff] %v3093_v15  ;;  %1033 = vrot.lane.b32.xlu1 %v2809_v24, %s2542_s16  ;;  %v368_v24 = vld [vmem:[%s2758_s15 + $0x8] sm:$0x1] }
  0xc6   : > { %1031 = vrot.lane.b32.xlu0 %v2812_v25, %s2542_s16  ;;  %v934_v25 = vrot.slane %v2763_v56, 1  ;;  %v932_v10 = vrot.slane %v368_v24, 1  ;;  %v938_v56 = vrot.slane %v372_v23, 1  ;;  %v944_v23 = vrot.slane %v376_v20, 1 }
  0xc7   : > { %v3099_v35 = vpop.permute.xlu1 %590 }
  0xc8   : > { %v3101_v38 = vpop.permute.xlu0 %588  ;;  %v3132_v24 = vsel %vm406_vm0, %v934_v25, %v935_v11 }
  0xc9   : > { %1037 = vrot.lane.b32.xlu1 %v2821_v37, %s2542_s16  ;;  %v931_v37 = vrot.slane %v2766_v57, 1  ;;  %4393 = vst [vmem:[#allocation47_spill] sm:$0xff] %v3132_v24 }
  0xca   : > { %1035 = vrot.lane.b32.xlu0 %v2824_v39, %s2542_s16  ;;  %v374_v39 = vld [vmem:[%s2758_s15 + $0x38] sm:$0x1] }
  0xcb   : > { %v3108_v15 = vpop.permute.xlu1 %594  ;;  %v941_v12 = vrot.slane %v374_v39, 1  ;;  %v3135_v57 = vsel %vm406_vm0, %v931_v37, %v932_v10  ;;  %v946_v10 = vrot.slane %v2783_v60, 1  ;;  %v943_v37 = vrot.slane %v2786_v61, 1 }
  0xcc   : > { %v3110_v33 = vpop.permute.xlu0 %592 }
  0xcd   : > { %1041 = vrot.lane.b32.xlu1 %v2833_v52, %s2542_s16  ;;  %v940_v52 = vrot.slane %v2773_v58, 1  ;;  %v3168_v60 = vsel %vm406_vm0, %v943_v37, %v944_v23 }
  0xce   : > { %1039 = vrot.lane.b32.xlu0 %v2836_v53, %s2542_s16  ;;  %v937_v53 = vrot.slane %v2776_v59, 1  ;;  %4396 = vst [vmem:[#allocation50_spill] sm:$0xff] %v3168_v60 }
  0xcf   : > { %v3121_v34 = vpop.permute.xlu1 %598  ;;  %v3148_v39 = vsel %vm406_vm0, %v940_v52, %v941_v12  ;;  %v949_v52 = vrot.slane %v2799_v13, 1 }
  0xd0   : > { %4391 = vst [vmem:[#allocation45_spill] sm:$0xff] %v3121_v34  ;;  %v3123_v48 = vpop.permute.xlu0 %596  ;;  %4394 = vst [vmem:[#allocation48_spill] sm:$0xff] %v3148_v39  ;;  %v3151_v11 = vsel %vm406_vm0, %v937_v53, %v938_v56 }
  0xd1   : > { %4392 = vst [vmem:[#allocation46_spill] sm:$0xff] %v3123_v48  ;;  %1045 = vrot.lane.b32.xlu1 %v2843_v54, %s2542_s16  ;;  %v378_v54 = vld [vmem:[%s2758_s15 + $0x58] sm:$0x1] }
  0xd2   : > { %1043 = vrot.lane.b32.xlu0 %v2846_v55, %s2542_s16  ;;  %v947_v25 = vrot.slane %v378_v54, 1 }
  0xd3   : > { %v3137_v48 = vpop.permute.xlu1 %602 }
  0xd4   : > { %v3139_v34 = vpop.permute.xlu0 %600  ;;  %v3165_v56 = vsel %vm406_vm0, %v946_v10, %v947_v25 }
  0xd5   : > { %1057 = vrot.lane.b32.xlu1 %v3132_v24, %s2543_s17  ;;  %v380_v24 = vld [vmem:[%s2758_s15 + $0x68] sm:$0x1]  ;;  %4395 = vst [vmem:[#allocation49_spill] sm:$0xff] %v3165_v56 }
  0xd6   : > { %1055 = vrot.lane.b32.xlu0 %v3135_v57, %s2543_s17  ;;  %v950_v53 = vrot.slane %v380_v24, 1 }
  0xd7   : > { %v3155_v55 = vpop.permute.xlu1 %614 }
  0xd8   : > { %v3157_v58 = vpop.permute.xlu0 %612  ;;  %v3180_v12 = vsel %vm406_vm0, %v949_v52, %v950_v53 }
  0xd9   : > { %1061 = vrot.lane.b32.xlu1 %v3148_v39, %s2543_s17  ;;  %4397 = vst [vmem:[#allocation51_spill] sm:$0xff] %v3180_v12  ;;  %v687_v39 = vsel %vm685_vm2, %v2635_v6, %v2941_v41 }
  0xda   : > { %1059 = vrot.lane.b32.xlu0 %v3151_v11, %s2543_s17 }
  0xdb   : > { %v3171_v54 = vpop.permute.xlu1 %618 }
  0xdc   : > { %v3173_v20 = vpop.permute.xlu0 %616 }
  0xdd   : > { %1065 = vrot.lane.b32.xlu1 %v3165_v56, %s2543_s17 }
  0xde   : > { %1063 = vrot.lane.b32.xlu0 %v3168_v60, %s2543_s17  ;;  %v686_v60 = vsel %vm685_vm2, %v2639_v8, %v2932_v31  ;;  %v688_v8 = vsel %vm685_vm2, %v2659_v18, %v2930_v29  ;;  %v689_v31 = vsel %vm685_vm2, %v2655_v16, %v2939_v40  ;;  %v690_v29 = vsel %vm685_vm2, %v2679_v28, %v2952_v49 }
  0xdf   : > { %v3182_v10 = vpop.permute.xlu1 %622  ;;  %v695_v61 = vsel %vm694_vm3, %v686_v60, %v2968_v7  ;;  %v691_v7 = vsel %vm685_vm2, %v2675_v26, %v2950_v45  ;;  %v698_v45 = vsel %vm694_vm3, %v689_v31, %v2975_v14  ;;  %v697_v49 = vsel %vm694_vm3, %v688_v8, %v2977_v17  ;;  %v4399_v8 = vld [vmem:[#allocation2_spill] sm:$0xff] }
  0xe0   : > { %v3184_v25 = vpop.permute.xlu0 %620 }
  0xe1   : > { %1079 = vrot.lane.b32.xlu1 %v2616_v3, %s2544_s18 }
  0xe2   : > { %1067 = vrot.lane.b32.xlu0 %v3180_v12, %s2543_s17 }
  0xe3   : > { %v3190_v13 = vpop.permute.xlu1 %626 }
  0xe4   : > { %v3192_v24 = vpop.permute.xlu0 %624 }
  0xe5   : > { %1103 = vrot.lane.b32.xlu1 %v2668_v22, %s2545_s9 }
  0xe6   : > { %1081 = vrot.lane.b32.xlu0 %v2603_v0, %s2544_s18 }
  0xe7   : > { %v640_v37 = vpop.permute.xlu1 %639 }
  0xe8   : > { %v638_v23 = vpop.permute.xlu0 %637 }
  0xe9   : > { %1127 = vrot.lane.b32.xlu1 %v2997_v21, %s2546_s14 }
  0xea   : > { %1105 = vrot.lane.b32.xlu0 %v2691_v32, %s2545_s9 }
  0xeb   : > { %v3202_v52 = vpop.permute.xlu1 %643 }
  0xec   : > { %v3204_v53 = vpop.permute.xlu0 %641 }
  0xed   : > { %1083 = vrot.lane.b32.xlu1 %v2613_v2, %s2544_s18  ;;  %v696_v2 = vsel %vm694_vm3, %v687_v39, %v2966_v63 }
  0xee   : > { %1129 = vrot.lane.b32.xlu0 %v3016_v27, %s2546_s14  ;;  %v705_v41 = vsel %vm703_vm4, %v696_v2, %v3019_v47 }
  0xef   : > { %v3210_v12 = vpop.permute.xlu1 %647  ;;  %v714_v40 = vsel %vm712_vm5, %v705_v41, %v3067_v42  ;;  %v4402_v41 = vld [vmem:[#allocation30_spill] sm:$0xff] }
  0xf0   : > { %v3212_v56 = vpop.permute.xlu0 %645 }
  0xf1   : > { %1107 = vrot.lane.b32.xlu1 %v2687_v30, %s2545_s9 }
  0xf2   : > { %1085 = vrot.lane.b32.xlu0 %v2632_v5, %s2544_s18  ;;  %v704_v5 = vsel %vm703_vm4, %v695_v61, %v3021_v46  ;;  %v693_v46 = vsel %vm685_vm2, %v2695_v36, %v2958_v50  ;;  %v723_v61 = vsel %vm721_vm6, %v714_v40, %v3099_v35  ;;  %v706_v35 = vsel %vm703_vm4, %v697_v49, %v3039_v4  ;;  %v4406_v49 = vld [vmem:[#allocation42_spill] sm:$0xff] }
  0xf3   : > { %v3238_v63 = vpop.permute.xlu1 %651  ;;  %v713_v47 = vsel %vm712_vm5, %v704_v5, %v3069_v51  ;;  %v732_v36 = vsel %vm730_vm7, %v723_v61, %v3155_v55  ;;  %v715_v55 = vsel %vm712_vm5, %v706_v35, %v3077_v1  ;;  %v4401_v1 = vld [vmem:[#allocation29_spill] sm:$0xff]  ;;  %v699_v5 = vsel %vm694_vm3, %v690_v29, %v4402_v41  ;;  %v4407_v35 = vld [vmem:[#allocation24_spill] sm:$0xff] }
  0xf4   : > { %v3240_v39 = vpop.permute.xlu0 %649  ;;  %v722_v26 = vsel %vm721_vm6, %v713_v47, %v3101_v38  ;;  %v707_v38 = vsel %vm703_vm4, %v698_v45, %v3037_v19  ;;  %v741_v42 = vsel %vm739_vm8, %v732_v36, %v640_v37  ;;  %v4398_v19 = vld [vmem:[#allocation5_spill] sm:$0xff]  ;;  %v700_v31 = vsel %vm694_vm3, %v691_v7, %v4401_v1  ;;  %v4404_v47 = vld [vmem:[#allocation38_spill] sm:$0xff]  ;;  %v4416_v1 = vld [vmem:[#allocation40_spill] sm:$0xff] }
  0xf5   : > { %1131 = vrot.lane.b32.xlu1 %v3013_v44, %s2546_s14  ;;  %v731_v50 = vsel %vm730_vm7, %v722_v26, %v3157_v58  ;;  %v716_v17 = vsel %vm712_vm5, %v707_v38, %v3075_v9  ;;  %v692_v4 = vsel %vm685_vm2, %v4398_v19, %v2960_v62  ;;  %v4400_v9 = vld [vmem:[#allocation34_spill] sm:$0xff]  ;;  %v708_v61 = vsel %vm703_vm4, %v699_v5, %v4404_v47  ;;  %v4405_v45 = vld [vmem:[#allocation41_spill] sm:$0xff]  ;;  %v4417_v5 = vld [vmem:[#allocation43_spill] sm:$0xff] }
  0xf6   : > { %1109 = vrot.lane.b32.xlu0 %v2711_v43, %s2545_s9  ;;  %v740_v51 = vsel %vm739_vm8, %v731_v50, %v638_v23  ;;  %v725_v37 = vsel %vm721_vm6, %v716_v17, %v3108_v15  ;;  %v724_v23 = vsel %vm721_vm6, %v715_v55, %v3110_v33  ;;  %v4403_v33 = vld [vmem:[#allocation37_spill] sm:$0xff]  ;;  %v717_v36 = vsel %vm712_vm5, %v708_v61, %v4406_v49  ;;  %v4411_v17 = vld [vmem:[#allocation6_spill] sm:$0xff]  ;;  %v4412_v55 = vld [vmem:[#allocation4_spill] sm:$0xff] }
  0xf7   : > { %v664_v14 = vpop.permute.xlu1 %663  ;;  %v734_v62 = vsel %vm730_vm7, %v725_v37, %v3171_v54  ;;  %v733_v15 = vsel %vm730_vm7, %v724_v23, %v3173_v20  ;;  %v709_v40 = vsel %vm703_vm4, %v700_v31, %v4403_v33  ;;  %v4414_v37 = vld [vmem:[#allocation25_spill] sm:$0xff]  ;;  %v4415_v23 = vld [vmem:[#allocation39_spill] sm:$0xff]  ;;  %v4419_v61 = vld [vmem:[#allocation8_spill] sm:$0xff] }
  0xf8   : > { %v662_v60 = vpop.permute.xlu0 %661  ;;  %v750_v58 = vsel %vm748_vm9, %v741_v42, %v664_v14  ;;  %v743_v7 = vsel %vm739_vm8, %v734_v62, %v3202_v52  ;;  %v742_v29 = vsel %vm739_vm8, %v733_v15, %v3204_v53  ;;  %v718_v20 = vsel %vm712_vm5, %v709_v40, %v4405_v45  ;;  %v4408_v52 = vld [vmem:[#allocation31_spill] sm:$0xff]  ;;  %v4409_v53 = vld [vmem:[#allocation45_spill] sm:$0xff]  ;;  %v4410_v14 = vld [vmem:[#allocation46_spill] sm:$0xff] }
  0xf9   : > { %v749_v2 = vsel %vm748_vm9, %v740_v51, %v662_v60  ;;  %1087 = vrot.lane.b32.xlu1 %v4399_v8, %s2544_s18  ;;  %v702_v42 = vsel %vm694_vm3, %v693_v46, %v4408_v52  ;;  %v727_v51 = vsel %vm721_vm6, %v718_v20, %v4409_v53  ;;  %v726_v60 = vsel %vm721_vm6, %v717_v36, %v4410_v14  ;;  %v4418_v15 = vld [vmem:[#allocation44_spill] sm:$0xff]  ;;  %v4422_v49 = vld [vmem:[#allocation11_spill] sm:$0xff]  ;;  %v4423_v36 = vld [vmem:[#allocation33_spill] sm:$0xff] }
  0xfa   : > { %1133 = vrot.lane.b32.xlu0 %v4400_v9, %s2546_s14  ;;  %2375 = vmatprep.mubr.msk.f32.mxu0 %vm757_vm10, %v749_v2  ;;  %v736_v19 = vsel %vm730_vm7, %v727_v51, %v3182_v10  ;;  %v735_v46 = vsel %vm730_vm7, %v726_v60, %v3184_v25  ;;  %v711_v8 = vsel %vm703_vm4, %v702_v42, %v4415_v23  ;;  %v4425_v52 = vld [vmem:[#allocation17_spill] sm:$0xff]  ;;  %v4426_v42 = vld [vmem:[#allocation15_spill] sm:$0xff] }
  0xfb   : > { %2376 = vmatmul.mubr.msk.f32.vlgmr.msra.gmra.mrb[0].mxu0 %vm757_vm10, %v750_v58  ;;  %v668_v54 = vpop.permute.xlu1 %667  ;;  %v4413_v58 = vld [vmem:[#allocation32_spill] sm:$0xff]  ;;  %v745_v41 = vsel %vm739_vm8, %v736_v19, %v3210_v12  ;;  %v720_v62 = vsel %vm712_vm5, %v711_v8, %v4417_v5  ;;  %v952_v53 = vrot.slane %v4426_v42, 1 }
  0xfc   : > { %v666_v26 = vpop.permute.xlu0 %665  ;;  %v752_v50 = vsel %vm748_vm9, %v743_v7, %v668_v54  ;;  %2472 = vmatpush3.bf16.msra.mxu0 %v4407_v35  ;;  %v701_v2 = vsel %vm694_vm3, %v692_v4, %v4413_v58  ;;  %v744_v4 = vsel %vm739_vm8, %v735_v46, %v3212_v56  ;;  %v729_v12 = vsel %vm721_vm6, %v720_v62, %v3137_v48  ;;  %v4420_v7 = vld [vmem:[#allocation12_spill] sm:$0xff] }
  0xfd   : > { %v751_v38 = vsel %vm748_vm9, %v742_v29, %v666_v26  ;;  %1111 = vrot.lane.b32.xlu1 %v4411_v17, %s2545_s9  ;;  %2474 = vmatprep.subr.bf16.mxu0 %v4414_v37  ;;  %v710_v31 = vsel %vm703_vm4, %v701_v2, %v4416_v1  ;;  %v738_v29 = vsel %vm730_vm7, %v729_v12, %v3190_v13  ;;  %v4421_v26 = vld [vmem:[#allocation26_spill] sm:$0xff]  ;;  %v4433_v12 = vld [vmem:[#allocation35_spill] sm:$0xff] }
  0xfe   : > { %1089 = vrot.lane.b32.xlu0 %v4412_v55, %s2544_s18  ;;  %2378 = vmatprep.mubr.msk.f32.mxu0 %vm757_vm10, %v751_v38  ;;  %v719_v33 = vsel %vm712_vm5, %v710_v31, %v4418_v15  ;;  %v747_v48 = vsel %vm739_vm8, %v738_v29, %v3238_v63  ;;  %v4424_v38 = vld [vmem:[#allocation36_spill] sm:$0xff]  ;;  %v4436_v29 = vld [vmem:[#allocation13_spill] sm:$0xff] }
  0xff   : > { %2379 = vmatmul.mubr.msk.f32.gmra.mrb[2].mxu0 %vm757_vm10, %v752_v50  ;;  %v672_v10 = vpop.permute.xlu1 %671  ;;  %v728_v56 = vsel %vm721_vm6, %v719_v33, %v3139_v34  ;;  %v382_v50 = vld [vmem:[%s2758_s15 + $0x78] sm:$0x1]  ;;  %v4427_v55 = vld [vmem:[#allocation16_spill] sm:$0xff]  ;;  %v4432_v33 = vld [vmem:[#allocation47_spill] sm:$0xff] }
 0x100   : > { %v670_v25 = vpop.permute.xlu0 %669  ;;  %v754_v40 = vsel %vm748_vm9, %v745_v41, %v672_v10  ;;  %2476 = vmatpush3.bf16.msra.mxu0 %v4414_v37  ;;  %v737_v54 = vsel %vm730_vm7, %v728_v56, %v3192_v24  ;;  %v953_v51 = vrot.slane %v382_v50, 1  ;;  %v4434_v56 = vld [vmem:[#allocation28_spill] sm:$0xff] }
 0x101   : > { %v753_v47 = vsel %vm748_vm9, %v744_v4, %v670_v25  ;;  %1113 = vrot.lane.b32.xlu1 %v4419_v61, %s2545_s9  ;;  %2417 = vmatprep.subr.msk.mxu0 %vm782_vm1, %v4421_v26  ;;  %v746_v34 = vsel %vm739_vm8, %v737_v54, %v3240_v39  ;;  %v4430_v4 = vld [vmem:[#allocation27_spill] sm:$0xff] }
 0x102   : > { %1357 = vrot.lane.b32.xlu0 %v4420_v7, %s2539_s28  ;;  %2381 = vmatprep.mubr.msk.f32.mxu0 %vm757_vm10, %v753_v47  ;;  %v3402_v58 = vsel %vm406_vm0, %v952_v53, %v953_v51  ;;  %v4431_v25 = vld [vmem:[#allocation7_spill] sm:$0xff] }
 0x103   : > { %2382 = vmatmul.mubr.msk.f32.gmra.mrb[4].mxu0 %vm757_vm10, %v754_v40  ;;  %v676_v45 = vpop.permute.xlu1 %675  ;;  %4428 = vst [vmem:[#allocation5_spill] sm:$0xff] %v3402_v58 }
 0x104   : > { %v674_v20 = vpop.permute.xlu0 %673  ;;  %v756_v13 = vsel %vm748_vm9, %v747_v48, %v676_v45  ;;  %2418 = vmatpush3.msk.msra.mxu0 %vm782_vm1, %v4421_v26  ;;  %v4437_v45 = vld [vmem:[#allocation9_spill] sm:$0xff] }
 0x105   : > { %v755_v24 = vsel %vm748_vm9, %v746_v34, %v674_v20  ;;  %1359 = vrot.lane.b32.xlu1 %v4422_v49, %s2539_s28  ;;  %v348_v34 = vld [vmem:[%s2600_s27 + $0x88] sm:$0x1]  ;;  %v956_v20 = vrot.slane %v4430_v4, 1 }
 0x106   : > { %1135 = vrot.lane.b32.xlu0 %v4423_v36, %s2546_s14  ;;  %2384 = vmatprep.mubr.msk.f32.mxu0 %vm757_vm10, %v755_v24 }
 0x107   : > { %2385 = vmatmul.mubr.msk.f32.gmra.mrb[6].mxu0 %vm757_vm10, %v756_v13  ;;  %v3383_v63 = vpop.permute.xlu1 %961  ;;  %v957_v13 = vrot.slane %v348_v34, 1 }
 0x108   : > { %v3385_v39 = vpop.permute.xlu0 %959 }
 0x109   : > { %1137 = vrot.lane.b32.xlu1 %v4424_v38, %s2546_s14  ;;  %v3492_v42 = vsel %vm406_vm0, %v956_v20, %v957_v13 }
 0x10a   : > { %1381 = vrot.lane.b32.xlu0 %v4425_v52, %s2540_s8  ;;  %4438 = vst [vmem:[#allocation2_spill] sm:$0xff] %v3492_v42 }
 0x10b   : > { %v3393_v14 = vpop.permute.xlu1 %965 }
 0x10c   : > { %v3395_v60 = vpop.permute.xlu0 %963 }
 0x10d   : > { %1405 = vrot.lane.b32.xlu1 %v2635_v6, %s2541_s12  ;;  %v4429_v6 = vld [vmem:[#allocation3_spill] sm:$0xff] }
 0x10e   : > { %1383 = vrot.lane.b32.xlu0 %v4427_v55, %s2540_s8 }
 0x10f   : > { %v3404_v2 = vpop.permute.xlu1 %969 }
 0x110   : > { %v3406_v19 = vpop.permute.xlu0 %967 }
 0x111   : > { %1069 = vrot.lane.b32.xlu1 %v3402_v58, %s2543_s17  ;;  %v2504_v58 = vld [vmem:[%s2600_s27] sm:$0xff] }
 0x112   : > { %1755 = vrot.lane.b32.xlu0 %v4425_v52, %s2539_s28  ;;  %v3487_v52 = vld [vmem:[%s2600_s27 + $0x20] sm:$0xff] }
 0x113   : > { %v3412_v46 = vpop.permute.xlu1 %973 }
 0x114   : > { %v3414_v23 = vpop.permute.xlu0 %971 }
 0x115   : > { %1407 = vrot.lane.b32.xlu1 %v2659_v18, %s2541_s12 }
 0x116   : > { %1091 = vrot.lane.b32.xlu0 %v4429_v6, %s2544_s18  ;;  %v4439_v6 = vld [vmem:[#allocation18_spill] sm:$0xff] }
 0x117   : > { %v3420_v8 = vpop.permute.xlu1 %985 }
 0x118   : > { %v3422_v1 = vpop.permute.xlu0 %983 }
 0x119   : > { %1757 = vrot.lane.b32.xlu1 %v4427_v55, %s2539_s28 }
 0x11a   : > { %1429 = vrot.lane.b32.xlu0 %v2616_v3, %s2542_s16 }
 0x11b   : > { %v3428_v31 = vpop.permute.xlu1 %989 }
 0x11c   : > { %v3430_v41 = vpop.permute.xlu0 %987 }
 0x11d   : > { %1093 = vrot.lane.b32.xlu1 %v4430_v4, %s2544_s18 }
 0x11e   : > { %1779 = vrot.lane.b32.xlu0 %v3135_v57, %s2540_s8 }
 0x11f   : > { %v3436_v18 = vpop.permute.xlu1 %993 }
 0x120   : > { %v3438_v10 = vpop.permute.xlu0 %991 }
 0x121   : > { %1361 = vrot.lane.b32.xlu1 %v2776_v59, %s2539_s28 }
 0x122   : > { %1115 = vrot.lane.b32.xlu0 %v4431_v25, %s2545_s9  ;;  %v1151_v25 = vsel %vm685_vm2, %v2504_v58, %v3385_v39 }
 0x123   : > { %v3444_v5 = vpop.permute.xlu1 %997 }
 0x124   : > { %v3446_v62 = vpop.permute.xlu0 %995 }
 0x125   : > { %1453 = vrot.lane.b32.xlu1 %v2668_v22, %s2543_s17 }
 0x126   : > { %1431 = vrot.lane.b32.xlu0 %v2603_v0, %s2542_s16 }
 0x127   : > { %v3452_v57 = vpop.permute.xlu1 %1009 }
 0x128   : > { %v1008_v15 = vpop.permute.xlu0 %1007 }
 0x129   : > { %1803 = vrot.lane.b32.xlu1 %v2616_v3, %s2541_s12  ;;  %v4435_v3 = vld [vmem:[#allocation19_spill] sm:$0xff] }
 0x12a   : > { %1781 = vrot.lane.b32.xlu0 %v4432_v33, %s2540_s8 }
 0x12b   : > { %v3458_v40 = vpop.permute.xlu1 %1013 }
 0x12c   : > { %v3460_v47 = vpop.permute.xlu0 %1011 }
 0x12d   : > { %1139 = vrot.lane.b32.xlu1 %v4433_v12, %s2546_s14 }
 0x12e   : > { %1117 = vrot.lane.b32.xlu0 %v4434_v56, %s2545_s9 }
 0x12f   : > { %v3466_v0 = vpop.permute.xlu1 %1017 }
 0x130   : > { %v3468_v7 = vpop.permute.xlu0 %1015 }
 0x131   : > { %1385 = vrot.lane.b32.xlu1 %v4435_v3, %s2540_s8 }
 0x132   : > { %1363 = vrot.lane.b32.xlu0 %v4436_v29, %s2539_s28  ;;  %v4440_v29 = vld [vmem:[#allocation10_spill] sm:$0xff] }
 0x133   : > { %v3474_v54 = vpop.permute.xlu1 %1021 }
 0x134   : > { %v3476_v48 = vpop.permute.xlu0 %1019 }
 0x135   : > { %1477 = vrot.lane.b32.xlu1 %v4437_v45, %s2544_s18 }
 0x136   : > { %1455 = vrot.lane.b32.xlu0 %v2691_v32, %s2543_s17 }
 0x137   : > { %v1034_v24 = vpop.permute.xlu1 %1033 }
 0x138   : > { %v1032_v50 = vpop.permute.xlu0 %1031 }
 0x139   : > { %1827 = vrot.lane.b32.xlu1 %v2668_v22, %s2542_s16 }
 0x13a   : > { %1805 = vrot.lane.b32.xlu0 %v3487_v52, %s2541_s12 }
 0x13b   : > { %v3494_v53 = vpop.permute.xlu1 %1037 }
 0x13c   : > { %v3496_v51 = vpop.permute.xlu0 %1035 }
 0x13d   : > { %1387 = vrot.lane.b32.xlu1 %v4439_v6, %s2540_s8 }
 0x13e   : > { %1141 = vrot.lane.b32.xlu0 %v3492_v42, %s2546_s14  ;;  %v2503_v42 = vld [vmem:[%s2600_s27 + $0x30] sm:$0xff] }
 0x13f   : > { %v3502_v22 = vpop.permute.xlu1 %1041 }
 0x140   : > { %v3504_v4 = vpop.permute.xlu0 %1039 }
 0x141   : > { %1479 = vrot.lane.b32.xlu1 %v4440_v29, %s2544_s18 }
 0x142   : > { %1409 = vrot.lane.b32.xlu0 %v2655_v16, %s2541_s12 }
 0x143   : > { %v3510_v34 = vpop.permute.xlu1 %1045 }
 0x144   : > { %4441 = vst [vmem:[#allocation34_spill] sm:$0xff] %v3510_v34  ;;  %v3512_v45 = vpop.permute.xlu0 %1043  ;;  %v2505_v34 = vld [vmem:[%s2600_s27 + $0x10] sm:$0xff] }
 0x145   : > { %1759 = vrot.lane.b32.xlu1 %v4435_v3, %s2539_s28  ;;  %v1152_v39 = vsel %vm685_vm2, %v2505_v34, %v3383_v63 }
 0x146   : > { %1502 = vrot.lane.b32.xlu0 %v4422_v49, %s2545_s9 }
 0x147   : > { %v1058_v20 = vpop.permute.xlu1 %1057 }
 0x148   : > { %v1056_v13 = vpop.permute.xlu0 %1055 }
 0x149   : > { %1851 = vrot.lane.b32.xlu1 %v2997_v21, %s2543_s17 }
 0x14a   : > { %1829 = vrot.lane.b32.xlu0 %v2691_v32, %s2542_s16 }
 0x14b   : > { %v3522_v16 = vpop.permute.xlu1 %1061 }
 0x14c   : > { %v1060_v29 = vpop.permute.xlu0 %1059 }
 0x14d   : > { %1433 = vrot.lane.b32.xlu1 %v2503_v42, %s2542_s16 }
 0x14e   : > { %1411 = vrot.lane.b32.xlu0 %v2679_v28, %s2541_s12  ;;  %v1159_v28 = vsel %vm694_vm3, %v1151_v25, %v3422_v1  ;;  %v1160_v1 = vsel %vm694_vm3, %v1152_v39, %v3420_v8 }
 0x14f   : > { %v3528_v12 = vpop.permute.xlu1 %1065  ;;  %v1167_v38 = vsel %vm703_vm4, %v1159_v28, %v1008_v15 }
 0x150   : > { %v3530_v56 = vpop.permute.xlu0 %1063  ;;  %v1175_v61 = vsel %vm712_vm5, %v1167_v38, %v1032_v50  ;;  %v1168_v38 = vsel %vm703_vm4, %v1160_v1, %v3452_v57  ;;  %v4443_v1 = vld [vmem:[#allocation48_spill] sm:$0xff] }
 0x151   : > { %1526 = vrot.lane.b32.xlu1 %v4427_v55, %s2546_s14  ;;  %v1183_v58 = vsel %vm721_vm6, %v1175_v61, %v1056_v13  ;;  %v1176_v61 = vsel %vm712_vm5, %v1168_v38, %v1034_v24  ;;  %v3567_v13 = vld [vmem:[%s2600_s27 + $0x40] sm:$0xff] }
 0x152   : > { %1504 = vrot.lane.b32.xlu0 %v2776_v59, %s2545_s9 }
 0x153   : > { %v1080_v32 = vpop.permute.xlu1 %1079 }
 0x154   : > { %v3536_v21 = vpop.permute.xlu0 %1067  ;;  %v1191_v25 = vsel %vm730_vm7, %v1183_v58, %v1080_v32 }
 0x155   : > { %1783 = vrot.lane.b32.xlu1 %v3151_v11, %s2540_s8 }
 0x156   : > { %1761 = vrot.lane.b32.xlu0 %v4439_v6, %s2539_s28 }
 0x157   : > { %v1104_v36 = vpop.permute.xlu1 %1103 }
 0x158   : > { %v1082_v59 = vpop.permute.xlu0 %1081  ;;  %v1199_v15 = vsel %vm739_vm8, %v1191_v25, %v1104_v36 }
 0x159   : > { %1875 = vrot.lane.b32.xlu1 %v4422_v49, %s2544_s18  ;;  %v1184_v49 = vsel %vm721_vm6, %v1176_v61, %v1058_v20  ;;  %v1153_v20 = vsel %vm685_vm2, %v3487_v52, %v3395_v60  ;;  %v1154_v52 = vsel %vm685_vm2, %v2503_v42, %v3393_v14 }
 0x15a   : > { %1853 = vrot.lane.b32.xlu0 %v3016_v27, %s2543_s17  ;;  %v4442_v27 = vld [vmem:[#allocation14_spill] sm:$0xff]  ;;  %v1192_v8 = vsel %vm730_vm7, %v1184_v49, %v1082_v59  ;;  %v1161_v28 = vsel %vm694_vm3, %v1153_v20, %v3430_v41  ;;  %v1155_v49 = vsel %vm685_vm2, %v3567_v13, %v3406_v19 }
 0x15b   : > { %v1128_v50 = vpop.permute.xlu1 %1127  ;;  %v1169_v59 = vsel %vm703_vm4, %v1161_v28, %v3460_v47  ;;  %v1162_v47 = vsel %vm694_vm3, %v1154_v52, %v3428_v31  ;;  %v3697_v52 = vld [vmem:[%s2758_s15 + $0x30] sm:$0xff] }
 0x15c   : > { %v1106_v63 = vpop.permute.xlu0 %1105  ;;  %v1207_v34 = vsel %vm748_vm9, %v1199_v15, %v1128_v50  ;;  %v1177_v60 = vsel %vm712_vm5, %v1169_v59, %v3496_v51  ;;  %v1170_v51 = vsel %vm703_vm4, %v1162_v47, %v3458_v40  ;;  %v3616_v40 = vld [vmem:[%s2758_s15 + $0x20] sm:$0xff] }
 0x15d   : > { %1435 = vrot.lane.b32.xlu1 %v3567_v13, %s2542_s16  ;;  %2397 = vmatprep.mubr.msk.f32.mxu1 %vm757_vm10, %v1207_v34  ;;  %v1200_v36 = vsel %vm739_vm8, %v1192_v8, %v1106_v63  ;;  %v1185_v41 = vsel %vm721_vm6, %v1177_v60, %v1060_v29  ;;  %v3629_v63 = vld [vmem:[%s2758_s15 + $0x50] sm:$0xff] }
 0x15e   : > { %1365 = vrot.lane.b32.xlu0 %v4442_v27, %s2539_s28  ;;  %v1163_v27 = vsel %vm694_vm3, %v1155_v49, %v3438_v10  ;;  %v2511_v60 = vld [vmem:[%s2622_s7 + $0x50] sm:$0xff] }
 0x15f   : > { %v1084_v57 = vpop.permute.xlu1 %1083  ;;  %v1171_v8 = vsel %vm703_vm4, %v1163_v27, %v3468_v7 }
 0x160   : > { %v1130_v24 = vpop.permute.xlu0 %1129  ;;  %v1179_v19 = vsel %vm712_vm5, %v1171_v8, %v3504_v4 }
 0x161   : > { %v1208_v32 = vsel %vm748_vm9, %v1200_v36, %v1130_v24  ;;  %1528 = vrot.lane.b32.xlu1 %v4435_v3, %s2546_s14  ;;  %v3653_v24 = vld [vmem:[%s2600_s27 + $0x50] sm:$0xff]  ;;  %v1187_v20 = vsel %vm721_vm6, %v1179_v19, %v3530_v56 }
 0x162   : > { %1457 = vrot.lane.b32.xlu0 %v2687_v30, %s2543_s17  ;;  %2398 = vmatmul.mubr.msk.f32.vlgmr.msra.gmra.mrb[0].mxu1 %vm757_vm10, %v1208_v32  ;;  %v1156_v32 = vsel %vm685_vm2, %v3653_v24, %v3404_v2 }
 0x163   : > { %v1108_v39 = vpop.permute.xlu1 %1107  ;;  %2480 = vmatpush3.bf16.msra.mxu1 %v4407_v35  ;;  %v1193_v35 = vsel %vm730_vm7, %v1185_v41, %v1084_v57  ;;  %v1164_v10 = vsel %vm694_vm3, %v1156_v32, %v3436_v18  ;;  %v3702_v41 = vld [vmem:[%s2728_s11 + $0x40] sm:$0xff] }
 0x164   : > { %v1086_v58 = vpop.permute.xlu0 %1085  ;;  %2482 = vmatprep.subr.bf16.mxu1 %v4414_v37  ;;  %v1201_v25 = vsel %vm739_vm8, %v1193_v35, %v1108_v39  ;;  %v1172_v4 = vsel %vm703_vm4, %v1164_v10, %v3466_v0 }
 0x165   : > { %1807 = vrot.lane.b32.xlu1 %v2503_v42, %s2541_s12  ;;  %v1178_v42 = vsel %vm712_vm5, %v1170_v51, %v3494_v53 }
 0x166   : > { %1785 = vrot.lane.b32.xlu0 %v4443_v1, %s2540_s8  ;;  %v1186_v31 = vsel %vm721_vm6, %v1178_v42, %v3522_v16 }
 0x167   : > { %v1132_v38 = vpop.permute.xlu1 %1131  ;;  %2484 = vmatpush3.bf16.msra.mxu1 %v4414_v37  ;;  %v1194_v37 = vsel %vm730_vm7, %v1186_v31, %v1086_v58 }
 0x168   : > { %v1110_v14 = vpop.permute.xlu0 %1109  ;;  %v1209_v29 = vsel %vm748_vm9, %v1201_v25, %v1132_v38  ;;  %2439 = vmatprep.subr.msk.mxu1 %vm782_vm1, %v4421_v26 }
 0x169   : > { %1899 = vrot.lane.b32.xlu1 %v4427_v55, %s2545_s9  ;;  %2400 = vmatprep.mubr.msk.f32.mxu1 %vm757_vm10, %v1209_v29  ;;  %v1202_v53 = vsel %vm739_vm8, %v1194_v37, %v1110_v14  ;;  %v4444_v55 = vld [vmem:[#allocation21_spill] sm:$0xff]  ;;  %v4446_v37 = vld [vmem:[#allocation50_spill] sm:$0xff] }
 0x16a   : > { %1877 = vrot.lane.b32.xlu0 %v3616_v40, %s2544_s18 }
 0x16b   : > { %v1088_v15 = vpop.permute.xlu1 %1087  ;;  %2440 = vmatpush3.msk.msra.mxu1 %vm782_vm1, %v4421_v26  ;;  %v3638_v26 = vld [vmem:[%s2728_s11 + $0x30] sm:$0xff] }
 0x16c   : > { %v1134_v50 = vpop.permute.xlu0 %1133  ;;  %v1195_v7 = vsel %vm730_vm7, %v1187_v20, %v1088_v15  ;;  %v4447_v20 = vld [vmem:[#allocation49_spill] sm:$0xff] }
 0x16d   : > { %v1210_v16 = vsel %vm748_vm9, %v1202_v53, %v1134_v50  ;;  %1389 = vrot.lane.b32.xlu1 %v4444_v55, %s2540_s8  ;;  %v2516_v50 = vld [vmem:[%s2600_s27 + $0x60] sm:$0xff] }
 0x16e   : > { %1367 = vrot.lane.b32.xlu0 %v3629_v63, %s2539_s28  ;;  %2401 = vmatmul.mubr.msk.f32.gmra.mrb[2].mxu1 %vm757_vm10, %v1210_v16  ;;  %v1157_v16 = vsel %vm685_vm2, %v2516_v50, %v3414_v23 }
 0x16f   : > { %v1112_v61 = vpop.permute.xlu1 %1111 }
 0x170   : > { %v1090_v34 = vpop.permute.xlu0 %1089  ;;  %v1203_v2 = vsel %vm739_vm8, %v1195_v7, %v1112_v61  ;;  %v1165_v61 = vsel %vm694_vm3, %v1157_v16, %v3446_v62 }
 0x171   : > { %1481 = vrot.lane.b32.xlu1 %v3638_v26, %s2544_s18 }
 0x172   : > { %1459 = vrot.lane.b32.xlu0 %v2711_v43, %s2543_s17 }
 0x173   : > { %v1114_v36 = vpop.permute.xlu1 %1113 }
 0x174   : > { %v3648_v57 = vpop.permute.xlu0 %1357 }
 0x175   : > { %1831 = vrot.lane.b32.xlu1 %v2687_v30, %s2542_s16  ;;  %v1180_v30 = vsel %vm712_vm5, %v1172_v4, %v3502_v22  ;;  %v3789_v4 = vld [vmem:[%s2600_s27 + $0x70] sm:$0xff] }
 0x176   : > { %1809 = vrot.lane.b32.xlu0 %v3567_v13, %s2541_s12  ;;  %v1188_v18 = vsel %vm721_vm6, %v1180_v30, %v3528_v12 }
 0x177   : > { %v3670_v28 = vpop.permute.xlu1 %1359  ;;  %v1196_v0 = vsel %vm730_vm7, %v1188_v18, %v1090_v34  ;;  %v1173_v34 = vsel %vm703_vm4, %v1165_v61, %v3476_v48  ;;  %v4448_v18 = vld [vmem:[#allocation34_spill] sm:$0xff] }
 0x178   : > { %v1136_v56 = vpop.permute.xlu0 %1135  ;;  %v1204_v13 = vsel %vm739_vm8, %v1196_v0, %v1114_v36  ;;  %v1181_v8 = vsel %vm712_vm5, %v1173_v34, %v3512_v45  ;;  %v3766_v36 = vld [vmem:[%s2758_s15 + $0x60] sm:$0xff] }
 0x179   : > { %v1211_v59 = vsel %vm748_vm9, %v1203_v2, %v1136_v56  ;;  %1923 = vrot.lane.b32.xlu1 %v4432_v33, %s2546_s14  ;;  %v4445_v33 = vld [vmem:[#allocation20_spill] sm:$0xff]  ;;  %v1189_v23 = vsel %vm721_vm6, %v1181_v8, %v3536_v21  ;;  %v1158_v2 = vsel %vm685_vm2, %v3789_v4, %v3412_v46  ;;  %v2521_v8 = vld [vmem:[%s2728_s11] sm:$0xff] }
 0x17a   : > { %1901 = vrot.lane.b32.xlu0 %v4435_v3, %s2545_s9  ;;  %2403 = vmatprep.mubr.msk.f32.mxu1 %vm757_vm10, %v1211_v59 }
 0x17b   : > { %v1138_v22 = vpop.permute.xlu1 %1137 }
 0x17c   : > { %v3684_v39 = vpop.permute.xlu0 %1381  ;;  %v1212_v58 = vsel %vm748_vm9, %v1204_v13, %v1138_v22  ;;  %v3812_v13 = vld [vmem:[%s2758_s15 + $0x70] sm:$0xff] }
 0x17d   : > { %1413 = vrot.lane.b32.xlu1 %v2511_v60, %s2541_s12  ;;  %2404 = vmatmul.mubr.msk.f32.gmra.mrb[4].mxu1 %vm757_vm10, %v1212_v58 }
 0x17e   : > { %1391 = vrot.lane.b32.xlu0 %v4445_v33, %s2540_s8 }
 0x17f   : > { %v3692_v12 = vpop.permute.xlu1 %1405 }
 0x180   : > { %v3694_v3 = vpop.permute.xlu0 %1383 }
 0x181   : > { %1506 = vrot.lane.b32.xlu1 %v3697_v52, %s2545_s9 }
 0x182   : > { %1483 = vrot.lane.b32.xlu0 %v3702_v41, %s2544_s18 }
 0x183   : > { %v1070_v47 = vpop.permute.xlu1 %1069 }
 0x184   : > { %v3706_v35 = vpop.permute.xlu0 %1755 }
 0x185   : > { %1833 = vrot.lane.b32.xlu1 %v2711_v43, %s2542_s16  ;;  %v2514_v43 = vld [vmem:[%s2622_s7 + $0x60] sm:$0xff] }
 0x186   : > { %1763 = vrot.lane.b32.xlu0 %v4444_v55, %s2539_s28 }
 0x187   : > { %v3712_v51 = vpop.permute.xlu1 %1407 }
 0x188   : > { %v1092_v25 = vpop.permute.xlu0 %1091 }
 0x189   : > { %1925 = vrot.lane.b32.xlu1 %v3151_v11, %s2546_s14  ;;  %v3731_v11 = vld [vmem:[%s2758_s15 + $0x40] sm:$0xff] }
 0x18a   : > { %1855 = vrot.lane.b32.xlu0 %v3013_v44, %s2543_s17 }
 0x18b   : > { %v3718_v38 = vpop.permute.xlu1 %1757 }
 0x18c   : > { %v3720_v14 = vpop.permute.xlu0 %1429 }
 0x18d   : > { %1437 = vrot.lane.b32.xlu1 %v3653_v24, %s2542_s16 }
 0x18e   : > { %1415 = vrot.lane.b32.xlu0 %v2514_v43, %s2541_s12 }
 0x18f   : > { %v1094_v42 = vpop.permute.xlu1 %1093 }
 0x190   : > { %v3726_v29 = vpop.permute.xlu0 %1779 }
 0x191   : > { %1530 = vrot.lane.b32.xlu1 %v4439_v6, %s2546_s14 }
 0x192   : > { %1508 = vrot.lane.b32.xlu0 %v3731_v11, %s2545_s9 }
 0x193   : > { %v3735_v44 = vpop.permute.xlu1 %1361 }
 0x194   : > { %v1116_v31 = vpop.permute.xlu0 %1115 }
 0x195   : > { %1787 = vrot.lane.b32.xlu1 %v4446_v37, %s2540_s8 }
 0x196   : > { %1765 = vrot.lane.b32.xlu0 %v4445_v33, %s2539_s28 }
 0x197   : > { %v3741_v53 = vpop.permute.xlu1 %1453 }
 0x198   : > { %v3743_v15 = vpop.permute.xlu0 %1431 }
 0x199   : > { %1879 = vrot.lane.b32.xlu1 %v3697_v52, %s2544_s18 }
 0x19a   : > { %1857 = vrot.lane.b32.xlu0 %v4400_v9, %s2543_s17  ;;  %v1197_v9 = vsel %vm730_vm7, %v1189_v23, %v1092_v25  ;;  %v3822_v25 = vld [vmem:[%s2728_s11 + $0x50] sm:$0xff]  ;;  %v1550_v23 = vsel %vm685_vm2, %v2521_v8, %v3648_v57 }
 0x19b   : > { %v3756_v49 = vpop.permute.xlu1 %1803  ;;  %v1205_v62 = vsel %vm739_vm8, %v1197_v9, %v1116_v31 }
 0x19c   : > { %v3758_v27 = vpop.permute.xlu0 %1781 }
 0x19d   : > { %1439 = vrot.lane.b32.xlu1 %v2516_v50, %s2542_s16 }
 0x19e   : > { %1369 = vrot.lane.b32.xlu0 %v3766_v36, %s2539_s28 }
 0x19f   : > { %v1140_v48 = vpop.permute.xlu1 %1139 }
 0x1a0   : > { %v1118_v19 = vpop.permute.xlu0 %1117  ;;  %v1213_v32 = vsel %vm748_vm9, %v1205_v62, %v1140_v48 }
 0x1a1   : > { %1532 = vrot.lane.b32.xlu1 %v4444_v55, %s2546_s14  ;;  %2406 = vmatprep.mubr.msk.f32.mxu1 %vm757_vm10, %v1213_v32 }
 0x1a2   : > { %1461 = vrot.lane.b32.xlu0 %v4411_v17, %s2543_s17 }
 0x1a3   : > { %v3778_v45 = vpop.permute.xlu1 %1385 }
 0x1a4   : > { %v3780_v21 = vpop.permute.xlu0 %1363 }
 0x1a5   : > { %1811 = vrot.lane.b32.xlu1 %v3653_v24, %s2541_s12  ;;  %v1166_v24 = vsel %vm694_vm3, %v1158_v2, %v3444_v5 }
 0x1a6   : > { %1789 = vrot.lane.b32.xlu0 %v4447_v20, %s2540_s8  ;;  %v1174_v56 = vsel %vm703_vm4, %v1166_v24, %v3474_v54 }
 0x1a7   : > { %v1478_v10 = vpop.permute.xlu1 %1477  ;;  %v1182_v46 = vsel %vm712_vm5, %v1174_v56, %v4448_v18 }
 0x1a8   : > { %v3786_v7 = vpop.permute.xlu0 %1455  ;;  %v1190_v0 = vsel %vm721_vm6, %v1182_v46, %v1070_v47  ;;  %v4450_v47 = vld [vmem:[#allocation8_spill] sm:$0xff] }
 0x1a9   : > { %1903 = vrot.lane.b32.xlu1 %v4439_v6, %s2545_s9  ;;  %v4449_v6 = vld [vmem:[#allocation23_spill] sm:$0xff]  ;;  %v1198_v5 = vsel %vm730_vm7, %v1190_v0, %v1094_v42  ;;  %v2524_v46 = vld [vmem:[%s2728_s11 + $0x10] sm:$0xff] }
 0x1aa   : > { %1881 = vrot.lane.b32.xlu0 %v3731_v11, %s2544_s18  ;;  %v1206_v54 = vsel %vm739_vm8, %v1198_v5, %v1118_v19  ;;  %v3864_v19 = vld [vmem:[%s2728_s11 + $0x60] sm:$0xff]  ;;  %v1551_v0 = vsel %vm685_vm2, %v2524_v46, %v3670_v28 }
 0x1ab   : > { %v3802_v30 = vpop.permute.xlu1 %1827  ;;  %v2525_v5 = vld [vmem:[%s2622_s7 + $0x80] sm:$0xff] }
 0x1ac   : > { %v3804_v59 = vpop.permute.xlu0 %1805 }
 0x1ad   : > { %1393 = vrot.lane.b32.xlu1 %v4449_v6, %s2540_s8 }
 0x1ae   : > { %1371 = vrot.lane.b32.xlu0 %v3812_v13, %s2539_s28 }
 0x1af   : > { %v3818_v22 = vpop.permute.xlu1 %1387 }
 0x1b0   : > { %v1142_v58 = vpop.permute.xlu0 %1141 }
 0x1b1   : > { %v1214_v60 = vsel %vm748_vm9, %v1206_v54, %v1142_v58  ;;  %1485 = vrot.lane.b32.xlu1 %v3822_v25, %s2544_s18 }
 0x1b2   : > { %1463 = vrot.lane.b32.xlu0 %v4450_v47, %s2543_s17  ;;  %2407 = vmatmul.mubr.msk.f32.gmra.mrb[6].mxu1 %vm757_vm10, %v1214_v60 }
 0x1b3   : > { %v1480_v43 = vpop.permute.xlu1 %1479 }
 0x1b4   : > { %v3829_v42 = vpop.permute.xlu0 %1409 }
 0x1b5   : > { %1835 = vrot.lane.b32.xlu1 %v4411_v17, %s2542_s16  ;;  %v2522_v17 = vld [vmem:[%s2622_s7 + $0x70] sm:$0xff] }
 0x1b6   : > { %1813 = vrot.lane.b32.xlu0 %v2516_v50, %s2541_s12  ;;  %v4451_v50 = vld [vmem:[#allocation22_spill] sm:$0xff] }
 0x1b7   : > { %v1760_v31 = vpop.permute.xlu1 %1759 }
 0x1b8   : > { %v1503_v16 = vpop.permute.xlu0 %1502 }
 0x1b9   : > { %1927 = vrot.lane.b32.xlu1 %v4443_v1, %s2546_s14  ;;  %v1558_v1 = vsel %vm694_vm3, %v1550_v23, %v3684_v39 }
 0x1ba   : > { %1905 = vrot.lane.b32.xlu0 %v4444_v55, %s2545_s9  ;;  %v1566_v55 = vsel %vm703_vm4, %v1558_v1, %v3692_v12 }
 0x1bb   : > { %v3838_v61 = vpop.permute.xlu1 %1851  ;;  %v1574_v48 = vsel %vm712_vm5, %v1566_v55, %v3720_v14 }
 0x1bc   : > { %v3840_v34 = vpop.permute.xlu0 %1829  ;;  %v1582_v57 = vsel %vm721_vm6, %v1574_v48, %v3741_v53 }
 0x1bd   : > { %1417 = vrot.lane.b32.xlu1 %v2522_v17, %s2541_s12  ;;  %v1590_v39 = vsel %vm730_vm7, %v1582_v57, %v1478_v10  ;;  %v4452_v10 = vld [vmem:[#allocation33_spill] sm:$0xff] }
 0x1be   : > { %1395 = vrot.lane.b32.xlu0 %v4451_v50, %s2540_s8  ;;  %v1598_v12 = vsel %vm739_vm8, %v1590_v39, %v1503_v16 }
 0x1bf   : > { %v3853_v9 = vpop.permute.xlu1 %1433 }
 0x1c0   : > { %v3855_v62 = vpop.permute.xlu0 %1411 }
 0x1c1   : > { %1510 = vrot.lane.b32.xlu1 %v3629_v63, %s2545_s9 }
 0x1c2   : > { %1487 = vrot.lane.b32.xlu0 %v3864_v19, %s2544_s18 }
 0x1c3   : > { %v1527_v32 = vpop.permute.xlu1 %1526 }
 0x1c4   : > { %v1505_v2 = vpop.permute.xlu0 %1504  ;;  %v1606_v14 = vsel %vm748_vm9, %v1598_v12, %v1527_v32 }
 0x1c5   : > { %1837 = vrot.lane.b32.xlu1 %v4450_v47, %s2542_s16  ;;  %2419 = vmatprep.mubr.msk.f32.mxu0 %vm757_vm10, %v1606_v14 }
 0x1c6   : > { %1767 = vrot.lane.b32.xlu0 %v4449_v6, %s2539_s28 }
 0x1c7   : > { %v1784_v53 = vpop.permute.xlu1 %1783 }
 0x1c8   : > { %v1762_v24 = vpop.permute.xlu0 %1761 }
 0x1c9   : > { %1929 = vrot.lane.b32.xlu1 %v4446_v37, %s2546_s14  ;;  %v1559_v37 = vsel %vm694_vm3, %v1551_v0, %v3694_v3  ;;  %v1950_v32 = vsel %vm685_vm2, %v3697_v52, %v1762_v24  ;;  %v4455_v52 = vld [vmem:[#allocation7_spill] sm:$0xff]  ;;  %v2526_v24 = vld [vmem:[%s2600_s27 + $0x80] sm:$0xff]  ;;  %s2272_s27 = sshll.u32 %s2588_s22, 3 }
 0x1ca   : > { %1859 = vrot.lane.b32.xlu0 %v4452_v10, %s2543_s17  ;;  %v1567_v58 = vsel %vm703_vm4, %v1559_v37, %v3712_v51  ;;  %p308_p4 = scmp.lt.s32.totalorder %s2272_s27, 15 }
 0x1cb   : > { %v3880_v56 = vpop.permute.xlu1 %1875  ;;  %v1575_v28 = vsel %vm712_vm5, %v1567_v58, %v3743_v15 }
 0x1cc   : > { %v3882_v18 = vpop.permute.xlu0 %1853  ;;  %v1583_v8 = vsel %vm721_vm6, %v1575_v28, %v3786_v7  ;;  %v4453_v7 = vld [vmem:[#allocation51_spill] sm:$0xff]  ;;  %s4461_s27 = smov (!%p308_p4, %s2272_s27), 15 }
 0x1cd   : > { %1441 = vrot.lane.b32.xlu1 %v3789_v4, %s2542_s16  ;;  %v1591_v3 = vsel %vm730_vm7, %v1583_v8, %v1480_v43  ;;  %v1949_v43 = vsel %vm685_vm2, %v3616_v40, %v1760_v31  ;;  %v4454_v40 = vld [vmem:[#allocation36_spill] sm:$0xff]  ;;  %v4456_v8 = vld [vmem:[#allocation5_spill] sm:$0xff] }
 0x1ce   : > { %1419 = vrot.lane.b32.xlu0 %v2525_v5, %s2541_s12  ;;  %v3893_v54 = vpop.f32.mrb[0].mxu0  ;;  %v1599_v23 = vsel %vm739_vm8, %v1591_v3, %v1505_v2  ;;  %v1957_v57 = vsel %vm694_vm3, %v1949_v43, %v1784_v53 }
 0x1cf   : > { %v3897_v60 = vpop.f32.mrb[1].mxu0  ;;  %v3899_v47 = vpop.permute.xlu1 %1435 }
 0x1d0   : > { %v1366_v16 = vpop.permute.xlu0 %1365 }
 0x1d1   : > { %1534 = vrot.lane.b32.xlu1 %v4445_v33, %s2546_s14  ;;  %v1554_v5 = vsel %vm685_vm2, %v3702_v41, %v1366_v16 }
 0x1d2   : > { %1512 = vrot.lane.b32.xlu0 %v3766_v36, %s2545_s9  ;;  %v3910_v51 = vpop.f32.mrb[2].mxu0 }
 0x1d3   : > { %v3913_v17 = vpop.f32.mrb[3].mxu0  ;;  %v1529_v1 = vpop.permute.xlu1 %1528 }
 0x1d4   : > { %v1607_v15 = vsel %vm748_vm9, %v1599_v23, %v1529_v1  ;;  %v3916_v55 = vpop.permute.xlu0 %1457  ;;  %v2527_v1 = vld [vmem:[%s2758_s15] sm:$0xff] }
 0x1d5   : > { %1791 = vrot.lane.b32.xlu1 %v4453_v7, %s2540_s8  ;;  %2420 = vmatmul.mubr.msk.f32.vlgmr.msra.gmra.mrb[8].mxu0 %vm757_vm10, %v1607_v15  ;;  %v1947_v15 = vsel %vm685_vm2, %v2527_v1, %v3706_v35 }
 0x1d6   : > { %1769 = vrot.lane.b32.xlu0 %v4451_v50, %s2539_s28  ;;  %v3924_v48 = vpop.f32.mrb[4].mxu0  ;;  %v1955_v41 = vsel %vm694_vm3, %v1947_v15, %v3726_v29  ;;  %v2529_v15 = vld [vmem:[%s2758_s15 + $0x10] sm:$0xff]  ;;  %s2273_s28 = sshll.u32 %s4461_s27, 3 }
 0x1d7   : > { %v3928_v39 = vpop.f32.mrb[5].mxu0  ;;  %v1808_v12 = vpop.permute.xlu1 %1807  ;;  %v1963_v16 = vsel %vm703_vm4, %v1955_v41, %v3756_v49  ;;  %v1948_v41 = vsel %vm685_vm2, %v2529_v15, %v3718_v38 }
 0x1d8   : > { %v1965_v2 = vsel %vm703_vm4, %v1957_v57, %v1808_v12  ;;  %v1786_v14 = vpop.permute.xlu0 %1785  ;;  %v1971_v57 = vsel %vm712_vm5, %v1963_v16, %v3802_v30 }
 0x1d9   : > { %v1958_v10 = vsel %vm694_vm3, %v1950_v32, %v1786_v14  ;;  %1883 = vrot.lane.b32.xlu1 %v3629_v63, %s2544_s18  ;;  %v1979_v32 = vsel %vm721_vm6, %v1971_v57, %v3838_v61  ;;  %v4457_v14 = vld [vmem:[#allocation28_spill] sm:$0xff]  ;;  %v2530_v57 = vld [vmem:[%s2728_s11 + $0x20] sm:$0xff] }
 0x1da   : > { %1861 = vrot.lane.b32.xlu0 %v4454_v40, %s2543_s17  ;;  %v3938_v31 = vpop.f32.mrb[6].mxu0  ;;  %v1987_v29 = vsel %vm730_vm7, %v1979_v32, %v3880_v56  ;;  %v3986_v61 = vld [vmem:[%s2728_s11 + $0x70] sm:$0xff]  ;;  %v383_v32 = vld [vmem:[%s2758_s15 + $0x80] sm:$0xff] }
 0x1db   : > { %v3940_v53 = vpop.f32.mrb[7].mxu0  ;;  %v1900_v46 = vpop.permute.xlu1 %1899 }
 0x1dc   : > { %v1878_v0 = vpop.permute.xlu0 %1877  ;;  %v1995_v49 = vsel %vm739_vm8, %v1987_v29, %v1900_v46  ;;  %v366_v29 = vld [vmem:[%s2728_s11 + $0x88] sm:$0x1] }
 0x1dd   : > { %1465 = vrot.lane.b32.xlu1 %v4455_v52, %s2543_s17 }
 0x1de   : > { %1443 = vrot.lane.b32.xlu0 %v2526_v24, %s2542_s16 }
 0x1df   : > { %v1390_v37 = vpop.permute.xlu1 %1389 }
 0x1e0   : > { %v1562_v58 = vsel %vm694_vm3, %v1554_v5, %v1390_v37  ;;  %v1368_v28 = vpop.permute.xlu0 %1367 }
 0x1e1   : > { %1793 = vrot.lane.b32.xlu1 %v4456_v8, %s2540_s8  ;;  %v1555_v56 = vsel %vm685_vm2, %v3822_v25, %v1368_v28 }
 0x1e2   : > { %1536 = vrot.lane.b32.xlu0 %v4449_v6, %s2546_s14 }
 0x1e3   : > { %v3953_v3 = vpop.permute.xlu1 %1481 }
 0x1e4   : > { %v3955_v23 = vpop.permute.xlu0 %1459 }
 0x1e5   : > { %1885 = vrot.lane.b32.xlu1 %v3766_v36, %s2544_s18 }
 0x1e6   : > { %1815 = vrot.lane.b32.xlu0 %v3789_v4, %s2541_s12 }
 0x1e7   : > { %v1832_v43 = vpop.permute.xlu1 %1831 }
 0x1e8   : > { %v3971_v12 = vsel %vm712_vm5, %v1965_v2, %v1832_v43  ;;  %v1810_v35 = vpop.permute.xlu0 %1809 }
 0x1e9   : > { %v1966_v4 = vsel %vm703_vm4, %v1958_v10, %v1810_v35  ;;  %1467 = vrot.lane.b32.xlu1 %v4457_v14, %s2543_s17  ;;  %v4458_v35 = vld [vmem:[#allocation35_spill] sm:$0xff] }
 0x1ea   : > { %1907 = vrot.lane.b32.xlu0 %v4445_v33, %s2545_s9 }
 0x1eb   : > { %v1924_v30 = vpop.permute.xlu1 %1923 }
 0x1ec   : > { %v2003_v2 = vsel %vm748_vm9, %v1995_v49, %v1924_v30  ;;  %v1902_v40 = vpop.permute.xlu0 %1901 }
 0x1ed   : > { %1817 = vrot.lane.b32.xlu1 %v2526_v24, %s2541_s12  ;;  %2441 = vmatprep.mubr.msk.f32.mxu1 %vm757_vm10, %v2003_v2  ;;  %v365_v24 = vld [vmem:[%s2728_s11 + $0x80] sm:$0xff] }
 0x1ee   : > { %1489 = vrot.lane.b32.xlu0 %v3986_v61, %s2544_s18  ;;  %v1354_v2 = vrot.slane %v365_v24, 1 }
 0x1ef   : > { %v1414_v33 = vpop.permute.xlu1 %1413 }
 0x1f0   : > { %v1570_v10 = vsel %vm703_vm4, %v1562_v58, %v1414_v33  ;;  %v1392_v46 = vpop.permute.xlu0 %1391 }
 0x1f1   : > { %v1563_v5 = vsel %vm694_vm3, %v1555_v56, %v1392_v46  ;;  %1909 = vrot.lane.b32.xlu1 %v4449_v6, %s2545_s9  ;;  %v1956_v6 = vsel %vm694_vm3, %v1948_v41, %v3758_v27  ;;  %v1752_v41 = vrot.slane %v383_v32, 1 }
 0x1f2   : > { %1839 = vrot.lane.b32.xlu0 %v4455_v52, %s2542_s16  ;;  %v1964_v25 = vsel %vm703_vm4, %v1956_v6, %v3804_v59 }
 0x1f3   : > { %v1507_v37 = vpop.permute.xlu1 %1506  ;;  %v1972_v58 = vsel %vm712_vm5, %v1964_v25, %v3840_v34 }
 0x1f4   : > { %v4000_v1 = vpop.permute.xlu0 %1483  ;;  %v1980_v16 = vsel %vm721_vm6, %v1972_v58, %v3882_v18  ;;  %v1552_v18 = vsel %vm685_vm2, %v2530_v57, %v3735_v44  ;;  %v1553_v58 = vsel %vm685_vm2, %v3638_v26, %v3780_v21 }
 0x1f5   : > { %1491 = vrot.lane.b32.xlu1 %v365_v24, %s2544_s18  ;;  %v1988_v27 = vsel %vm730_vm7, %v1980_v16, %v1878_v0  ;;  %v1560_v0 = vsel %vm694_vm3, %v1552_v18, %v3778_v45  ;;  %v384_v24 = vld [vmem:[%s2758_s15 + $0x88] sm:$0x1]  ;;  %s4243_s15 = scalar_lea.vmem %s4282_s6, %s2273_s28 }
 0x1f6   : > { %1931 = vrot.lane.b32.xlu0 %v4447_v20, %s2546_s14  ;;  %v1996_v20 = vsel %vm739_vm8, %v1988_v27, %v1902_v40  ;;  %v1753_v6 = vrot.slane %v384_v24, 1 }
 0x1f7   : > { %v1834_v52 = vpop.permute.xlu1 %1833 }
 0x1f8   : > { %v4015_v28 = vsel %vm712_vm5, %v1966_v4, %v1834_v52  ;;  %v1764_v38 = vpop.permute.xlu0 %1763  ;;  %v1568_v4 = vsel %vm703_vm4, %v1560_v0, %v3829_v42 }
 0x1f9   : > { %1841 = vrot.lane.b32.xlu1 %v4457_v14, %s2542_s16  ;;  %v1576_v44 = vsel %vm712_vm5, %v1568_v4, %v3853_v9  ;;  %v1355_v9 = vrot.slane %v366_v29, 1 }
 0x1fa   : > { %1514 = vrot.lane.b32.xlu0 %v3812_v13, %s2545_s9  ;;  %v1584_v30 = vsel %vm721_vm6, %v1576_v44, %v3916_v55  ;;  %v4459_v55 = vld [vmem:[#allocation2_spill] sm:$0xff] }
 0x1fb   : > { %v1926_v59 = vpop.permute.xlu1 %1925  ;;  %v1592_v42 = vsel %vm730_vm7, %v1584_v30, %v3953_v3  ;;  %v1356_v46 = vsel %vm406_vm0, %v1354_v2, %v1355_v9  ;;  %v1951_v3 = vsel %vm685_vm2, %v3731_v11, %v1764_v38  ;;  %v1561_v11 = vsel %vm694_vm3, %v1553_v58, %v3818_v22 }
 0x1fc   : > { %v2004_v34 = vsel %vm748_vm9, %v1996_v20, %v1926_v59  ;;  %v4026_v43 = vpop.permute.xlu0 %1855  ;;  %v1600_v40 = vsel %vm739_vm8, %v1592_v42, %v1507_v37  ;;  %v1754_v38 = vsel %vm406_vm0, %v1752_v41, %v1753_v6  ;;  %v1569_v16 = vsel %vm703_vm4, %v1561_v11, %v3855_v62 }
 0x1fd   : > { %1933 = vrot.lane.b32.xlu1 %v4453_v7, %s2546_s14  ;;  %2442 = vmatmul.mubr.msk.f32.vlgmr.msra.gmra.mrb[8].mxu1 %vm757_vm10, %v2004_v34  ;;  %v1577_v20 = vsel %vm712_vm5, %v1569_v16, %v3899_v47 }
 0x1fe   : > { %1863 = vrot.lane.b32.xlu0 %v4458_v35, %s2543_s17  ;;  %v1585_v21 = vsel %vm721_vm6, %v1577_v20, %v3955_v23 }
 0x1ff   : > { %v1438_v14 = vpop.permute.xlu1 %1437  ;;  %v1593_v22 = vsel %vm730_vm7, %v1585_v21, %v4000_v1 }
 0x200   : > { %v4045_v49 = vsel %vm712_vm5, %v1570_v10, %v1438_v14  ;;  %v1416_v7 = vpop.permute.xlu0 %1415 }
 0x201   : > { %v1571_v45 = vsel %vm703_vm4, %v1563_v5, %v1416_v7  ;;  %1538 = vrot.lane.b32.xlu1 %v4451_v50, %s2546_s14 }
 0x202   : > { %1516 = vrot.lane.b32.xlu0 %v383_v32, %s2545_s9 }
 0x203   : > { %v1531_v33 = vpop.permute.xlu1 %1530 }
 0x204   : > { %v1608_v56 = vsel %vm748_vm9, %v1600_v40, %v1531_v33  ;;  %v1509_v10 = vpop.permute.xlu0 %1508 }
 0x205   : > { %1887 = vrot.lane.b32.xlu1 %v3812_v13, %s2544_s18  ;;  %2422 = vmatprep.mubr.msk.f32.mxu0 %vm757_vm10, %v1608_v56 }
 0x206   : > { %1865 = vrot.lane.b32.xlu0 %v4459_v55, %s2543_s17 }
 0x207   : > { %v1788_v5 = vpop.permute.xlu1 %1787 }
 0x208   : > { %v1959_v37 = vsel %vm694_vm3, %v1951_v3, %v1788_v5  ;;  %v1766_v15 = vpop.permute.xlu0 %1765 }
 0x209   : > { %1889 = vrot.lane.b32.xlu1 %v383_v32, %s2544_s18  ;;  %v1952_v23 = vsel %vm685_vm2, %v3629_v63, %v1766_v15 }
 0x20a   : > { %1540 = vrot.lane.b32.xlu0 %v1356_v46, %s2546_s14 }
 0x20b   : > { %v1880_v25 = vpop.permute.xlu1 %1879 }
 0x20c   : > { %v1858_v52 = vpop.permute.xlu0 %1857 }
 0x20d   : > { %1913 = vrot.lane.b32.xlu1 %v1356_v46, %s2545_s9 }
 0x20e   : > { %1911 = vrot.lane.b32.xlu0 %v4451_v50, %s2545_s9  ;;  %v1601_v50 = vsel %vm739_vm8, %v1593_v22, %v1509_v10 }
 0x20f   : > { %v1440_v27 = vpop.permute.xlu1 %1439 }
 0x210   : > { %v4083_v59 = vsel %vm712_vm5, %v1571_v45, %v1440_v27  ;;  %v1370_v26 = vpop.permute.xlu0 %1369  ;;  %v1981_v45 = vsel %vm721_vm6, %v3971_v12, %v4026_v43 }
 0x211   : > { %1937 = vrot.lane.b32.xlu1 %v1754_v38, %s2546_s14  ;;  %v1556_v32 = vsel %vm685_vm2, %v3864_v19, %v1370_v26  ;;  %v1989_v2 = vsel %vm730_vm7, %v1981_v45, %v1880_v25 }
 0x212   : > { %1935 = vrot.lane.b32.xlu0 %v4456_v8, %s2546_s14 }
 0x213   : > { %v1533_v62 = vpop.permute.xlu1 %1532 }
 0x214   : > { %v1609_v47 = vsel %vm748_vm9, %v1601_v50, %v1533_v62  ;;  %v1462_v34 = vpop.permute.xlu0 %1461 }
 0x215   : > { %2423 = vmatmul.mubr.msk.f32.gmra.mrb[10].mxu0 %vm757_vm10, %v1609_v47  ;;  %v1586_v20 = vsel %vm721_vm6, %v4045_v49, %v1462_v34 }
 0x217   : > { %v1812_v57 = vpop.permute.xlu1 %1811 }
 0x218   : > { %v4098_v18 = vsel %vm703_vm4, %v1959_v37, %v1812_v57  ;;  %v1790_v35 = vpop.permute.xlu0 %1789 }
 0x219   : > { %v1960_v8 = vsel %vm694_vm3, %v1952_v23, %v1790_v35 }
 0x21b   : > { %v1904_v0 = vpop.permute.xlu1 %1903 }
 0x21c   : > { %v1882_v1 = vpop.permute.xlu0 %1881  ;;  %v1997_v19 = vsel %vm739_vm8, %v1989_v2, %v1904_v0 }
 0x21f   : > { %v1394_v4 = vpop.permute.xlu1 %1393 }
 0x220   : > { %v4104_v14 = vsel %vm694_vm3, %v1556_v32, %v1394_v4  ;;  %v1372_v29 = vpop.permute.xlu0 %1371 }
 0x221   : > { %v1557_v10 = vsel %vm685_vm2, %v3986_v61, %v1372_v29  ;;  %v1982_v61 = vsel %vm721_vm6, %v4015_v28, %v1858_v52 }
 0x222   : > { %v1990_v6 = vsel %vm730_vm7, %v1982_v61, %v1882_v1 }
 0x223   : > { %v1486_v44 = vpop.permute.xlu1 %1485 }
 0x224   : > { %v1464_v7 = vpop.permute.xlu0 %1463  ;;  %v1594_v28 = vsel %vm730_vm7, %v1586_v20, %v1486_v44 }
 0x225   : > { %v1587_v32 = vsel %vm721_vm6, %v4083_v59, %v1464_v7 }
 0x227   : > { %v4106_v30 = vpop.permute.xlu1 %1835 }
 0x228   : > { %v1814_v63 = vpop.permute.xlu0 %1813 }
 0x229   : > { %v4112_v42 = vsel %vm703_vm4, %v1960_v8, %v1814_v63 }
 0x22b   : > { %v1928_v9 = vpop.permute.xlu1 %1927 }
 0x22c   : > { %v2005_v40 = vsel %vm748_vm9, %v1997_v19, %v1928_v9  ;;  %v1906_v33 = vpop.permute.xlu0 %1905 }
 0x22d   : > { %2444 = vmatprep.mubr.msk.f32.mxu1 %vm757_vm10, %v2005_v40  ;;  %v1998_v25 = vsel %vm739_vm8, %v1990_v6, %v1906_v33 }
 0x22f   : > { %v4118_v56 = vpop.permute.xlu1 %1417 }
 0x230   : > { %v1396_v55 = vpop.permute.xlu0 %1395 }
 0x231   : > { %v4123_v12 = vsel %vm694_vm3, %v1557_v10, %v1396_v55 }
 0x233   : > { %v1511_v43 = vpop.permute.xlu1 %1510 }
 0x234   : > { %v1488_v46 = vpop.permute.xlu0 %1487  ;;  %v1602_v22 = vsel %vm739_vm8, %v1594_v28, %v1511_v43 }
 0x235   : > { %v4125_v3 = vpop.f32.mrb[0].mxu1  ;;  %v1595_v44 = vsel %vm730_vm7, %v1587_v32, %v1488_v46  ;;  %v1975_v46 = vsel %vm712_vm5, %v4098_v18, %v4106_v30  ;;  %v1572_v30 = vsel %vm703_vm4, %v4104_v14, %v4118_v56 }
 0x236   : > { %v1345_v5 = vmax.f32 %v3893_v54, %v4125_v3  ;;  %v4129_v24 = vpop.f32.mrb[1].mxu1 }
 0x237   : > { %v1344_v37 = vmax.f32 %v3897_v60, %v4129_v24  ;;  %v1838_v15 = vpop.permute.xlu1 %1837 }
 0x238   : > { %v4133_v41 = vpop.permute.xlu0 %1767 }
 0x23b   : > { %v1930_v58 = vpop.permute.xlu1 %1929 }
 0x23c   : > { %v2006_v11 = vsel %vm748_vm9, %v1998_v25, %v1930_v58  ;;  %v1860_v38 = vpop.permute.xlu0 %1859 }
 0x23d   : > { %2445 = vmatmul.mubr.msk.f32.gmra.mrb[10].mxu1 %vm757_vm10, %v2006_v11  ;;  %v1983_v6 = vsel %vm721_vm6, %v1975_v46, %v1860_v38 }
 0x23f   : > { %v1442_v16 = vpop.permute.xlu1 %1441 }
 0x240   : > { %v4141_v27 = vpop.permute.xlu0 %1419  ;;  %v1580_v32 = vsel %vm712_vm5, %v1572_v30, %v1442_v16 }
 0x241   : > { %v4145_v26 = vpop.f32.mrb[2].mxu1  ;;  %v1573_v16 = vsel %vm703_vm4, %v4123_v12, %v4141_v27  ;;  %v1953_v12 = vsel %vm685_vm2, %v3766_v36, %v4133_v41 }
 0x242   : > { %v1347_v52 = vmax.f32 %v3910_v51, %v4145_v26  ;;  %v4150_v21 = vpop.f32.mrb[3].mxu1 }
 0x243   : > { %v1346_v50 = vmax.f32 %v3913_v17, %v4150_v21  ;;  %v1535_v62 = vpop.permute.xlu1 %1534 }
 0x244   : > { %v1610_v47 = vsel %vm748_vm9, %v1602_v22, %v1535_v62  ;;  %v1513_v57 = vpop.permute.xlu0 %1512  ;;  %v1976_v62 = vsel %vm712_vm5, %v4112_v42, %v1838_v15 }
 0x245   : > { %2425 = vmatprep.mubr.msk.f32.mxu0 %vm757_vm10, %v1610_v47  ;;  %v1603_v2 = vsel %vm739_vm8, %v1595_v44, %v1513_v57 }
 0x247   : > { %v4157_v49 = vpop.permute.xlu1 %1791 }
 0x248   : > { %v1770_v34 = vpop.permute.xlu0 %1769 }
 0x24b   : > { %v1884_v23 = vpop.permute.xlu1 %1883 }
 0x24c   : > { %v1862_v35 = vpop.permute.xlu0 %1861  ;;  %v1991_v25 = vsel %vm730_vm7, %v1983_v6, %v1884_v23 }
 0x24d   : > { %v1984_v57 = vsel %vm721_vm6, %v1976_v62, %v1862_v35 }
 0x24f   : > { %v1466_v8 = vpop.permute.xlu1 %1465 }
 0x250   : > { %v1444_v0 = vpop.permute.xlu0 %1443  ;;  %v4159_v1 = vpop.f32.mrb[4].mxu1 }
 0x251   : > { %v1349_v4 = vmax.f32 %v3924_v48, %v4159_v1  ;;  %v4165_v29 = vpop.f32.mrb[5].mxu1 }
 0x252   : > { %v1348_v63 = vmax.f32 %v3928_v39, %v4165_v29 }
 0x253   : > { %v1794_v45 = vpop.permute.xlu1 %1793 }
 0x254   : > { %v1537_v19 = vpop.permute.xlu0 %1536 }
 0x255   : > { %v1611_v9 = vsel %vm748_vm9, %v1603_v2, %v1537_v19  ;;  %v1588_v19 = vsel %vm721_vm6, %v1580_v32, %v1466_v8  ;;  %v1581_v8 = vsel %vm712_vm5, %v1573_v16, %v1444_v0  ;;  %v1961_v0 = vsel %vm694_vm3, %v1953_v12, %v4157_v49 }
 0x256   : > { %2426 = vmatmul.mubr.msk.f32.gmra.mrb[12].mxu0 %vm757_vm10, %v1611_v9 }
 0x257   : > { %v1886_v40 = vpop.permute.xlu1 %1885 }
 0x258   : > { %v1816_v59 = vpop.permute.xlu0 %1815  ;;  %v1992_v18 = vsel %vm730_vm7, %v1984_v57, %v1886_v40 }
 0x25b   : > { %v1468_v7 = vpop.permute.xlu1 %1467 }
 0x25c   : > { %v1908_v33 = vpop.permute.xlu0 %1907 }
 0x25d   : > { %v1999_v11 = vsel %vm739_vm8, %v1991_v25, %v1908_v33  ;;  %v1589_v33 = vsel %vm721_vm6, %v1581_v8, %v1468_v7  ;;  %v1954_v25 = vsel %vm685_vm2, %v3812_v13, %v1770_v34 }
 0x25e   : > { %v1962_v27 = vsel %vm694_vm3, %v1954_v25, %v1794_v45 }
 0x25f   : > { %v1818_v10 = vpop.permute.xlu1 %1817 }
 0x260   : > { %v1490_v55 = vpop.permute.xlu0 %1489  ;;  %v1970_v7 = vsel %vm703_vm4, %v1962_v27, %v1818_v10 }
 0x261   : > { %v1596_v42 = vsel %vm730_vm7, %v1588_v19, %v1490_v55 }
 0x263   : > { %v1910_v43 = vpop.permute.xlu1 %1909 }
 0x264   : > { %v1840_v61 = vpop.permute.xlu0 %1839  ;;  %v2000_v38 = vsel %vm739_vm8, %v1992_v18, %v1910_v43 }
 0x267   : > { %v1492_v58 = vpop.permute.xlu1 %1491 }
 0x268   : > { %v1932_v20 = vpop.permute.xlu0 %1931  ;;  %v1597_v55 = vsel %vm730_vm7, %v1589_v33, %v1492_v58 }
 0x269   : > { %v2007_v28 = vsel %vm748_vm9, %v1999_v11, %v1932_v20  ;;  %v1969_v20 = vsel %vm703_vm4, %v1961_v0, %v1816_v59 }
 0x26a   : > { %2447 = vmatprep.mubr.msk.f32.mxu1 %vm757_vm10, %v2007_v28  ;;  %v1977_v28 = vsel %vm712_vm5, %v1969_v20, %v1840_v61 }
 0x26b   : > { %v1842_v22 = vpop.permute.xlu1 %1841 }
 0x26c   : > { %v1515_v47 = vpop.permute.xlu0 %1514  ;;  %v1978_v13 = vsel %vm712_vm5, %v1970_v7, %v1842_v22 }
 0x26d   : > { %v1604_v15 = vsel %vm739_vm8, %v1596_v42, %v1515_v47 }
 0x26f   : > { %v1934_v23 = vpop.permute.xlu1 %1933 }
 0x270   : > { %v2008_v44 = vsel %vm748_vm9, %v2000_v38, %v1934_v23  ;;  %v1864_v2 = vpop.permute.xlu0 %1863 }
 0x271   : > { %2448 = vmatmul.mubr.msk.f32.gmra.mrb[12].mxu1 %vm757_vm10, %v2008_v44  ;;  %v1985_v36 = vsel %vm721_vm6, %v1977_v28, %v1864_v2 }
 0x273   : > { %v1539_v35 = vpop.permute.xlu1 %1538 }
 0x274   : > { %v1612_v9 = vsel %vm748_vm9, %v1604_v15, %v1539_v35  ;;  %v1517_v14 = vpop.permute.xlu0 %1516 }
 0x275   : > { %2428 = vmatprep.mubr.msk.f32.mxu0 %vm757_vm10, %v1612_v9  ;;  %v1605_v46 = vsel %vm739_vm8, %v1597_v55, %v1517_v14 }
 0x277   : > { %v1888_v56 = vpop.permute.xlu1 %1887 }
 0x278   : > { %v1866_v40 = vpop.permute.xlu0 %1865  ;;  %v1993_v45 = vsel %vm730_vm7, %v1985_v36, %v1888_v56 }
 0x279   : > { %v1986_v62 = vsel %vm721_vm6, %v1978_v13, %v1866_v40 }
 0x27b   : > { %v1890_v43 = vpop.permute.xlu1 %1889 }
 0x27c   : > { %v1541_v6 = vpop.permute.xlu0 %1540  ;;  %v1994_v41 = vsel %vm730_vm7, %v1986_v62, %v1890_v43 }
 0x27d   : > { %v1613_v11 = vsel %vm748_vm9, %v1605_v46, %v1541_v6 }
 0x27e   : > { %2429 = vmatmul.mubr.msk.f32.gmra.mrb[14].mxu0 %vm757_vm10, %v1613_v11 }
 0x27f   : > { %v1914_v58 = vpop.permute.xlu1 %1913 }
 0x280   : > { %v1912_v34 = vpop.permute.xlu0 %1911  ;;  %v2002_v49 = vsel %vm739_vm8, %v1994_v41, %v1914_v58 }
 0x281   : > { %v2001_v47 = vsel %vm739_vm8, %v1993_v45, %v1912_v34 }
 0x283   : > { %v1938_v10 = vpop.permute.xlu1 %1937 }
 0x284   : > { %v2010_v59 = vsel %vm748_vm9, %v2002_v49, %v1938_v10  ;;  %v1936_v22 = vpop.permute.xlu0 %1935 }
 0x285   : > { %v2009_v57 = vsel %vm748_vm9, %v2001_v47, %v1936_v22  ;;  %v2408_v61 = vpop.f32.mrb[6].mxu1 }
 0x286   : > { %v1351_v18 = vmax.f32 %v3938_v31, %v2408_v61  ;;  %v1335_v30 = vpop.f32.mrb[7].mxu1  ;;  %2450 = vmatprep.mubr.msk.f32.mxu1 %vm757_vm10, %v2009_v57 }
 0x287   : > { %v1350_v38 = vmax.f32 %v3940_v53, %v1335_v30  ;;  %2451 = vmatmul.mubr.msk.f32.gmra.mrb[14].mxu1 %vm757_vm10, %v2010_v59  ;;  %v2310_v53 = vld [vmem:[%s4281_s5] ss:$0 sm:$0xff] }
 0x2a8   : > { %v2421_v23 = vpop.f32.mrb[8].mxu0 }
 0x2a9   : > { %v1744_v32 = vmax.f32 %v1345_v5, %v2421_v23  ;;  %v1704_v44 = vpop.f32.mrb[9].mxu0 }
 0x2aa   : > { %v1743_v2 = vmax.f32 %v1344_v37, %v1704_v44 }
 0x2d0   : > { %v2443_v31 = vpop.f32.mrb[8].mxu1 }
 0x2d1   : > { %v2141_v19 = vmax.f32 %v1744_v32, %v2443_v31  ;;  %v2101_v42 = vpop.f32.mrb[9].mxu1 }
 0x2d2   : > { %v2140_v54 = vmax.f32 %v1743_v2, %v2101_v42 }
 0x2d3   : > { %v2156_v60 = vadd.f32 %v2310_v53, %v2141_v19 }
 0x2d4   : > { %v2155_v3 = vadd.f32 %v2310_v53, %v2140_v54 }
 0x2d5   : > { %2164 = vst.msk [vmem:[%s4243_s15 + $0x8] sm:$0xff] %vm694_vm3, %v2156_v60 }
 0x2d6   : > { %2163 = vst.msk [vmem:[%s4243_s15] sm:$0xff] %vm694_vm3, %v2155_v3 }
 0x2e8   : > { %v2424_v5 = vpop.f32.mrb[10].mxu0 }
 0x2e9   : > { %v1746_v24 = vmax.f32 %v1347_v52, %v2424_v5  ;;  %v1714_v37 = vpop.f32.mrb[11].mxu0 }
 0x2ea   : > { %v1745_v15 = vmax.f32 %v1346_v50, %v1714_v37 }
 0x310   : > { %v2446_v35 = vpop.f32.mrb[10].mxu1 }
 0x311   : > { %v2143_v9 = vmax.f32 %v1746_v24, %v2446_v35  ;;  %v2111_v14 = vpop.f32.mrb[11].mxu1 }
 0x312   : > { %v2142_v56 = vmax.f32 %v1745_v15, %v2111_v14 }
 0x313   : > { %v2158_v16 = vadd.f32 %v2310_v53, %v2143_v9 }
 0x314   : > { %v2157_v40 = vadd.f32 %v2310_v53, %v2142_v56 }
 0x315   : > { %2166 = vst.msk [vmem:[%s4243_s15 + $0x18] sm:$0xff] %vm694_vm3, %v2158_v16 }
 0x316   : > { %2165 = vst.msk [vmem:[%s4243_s15 + $0x10] sm:$0xff] %vm694_vm3, %v2157_v40 }
 0x329   : > { %v2427_v8 = vpop.f32.mrb[12].mxu0 }
 0x32a   : > { %v1748_v51 = vmax.f32 %v1349_v4, %v2427_v8  ;;  %v1724_v26 = vpop.f32.mrb[13].mxu0 }
 0x32b   : > { %v1747_v17 = vmax.f32 %v1348_v63, %v1724_v26 }
 0x344   : > { %v2449_v52 = vpop.f32.mrb[12].mxu1 }
 0x345   : > { %v2145_v21 = vmax.f32 %v1748_v51, %v2449_v52  ;;  %v2121_v50 = vpop.f32.mrb[13].mxu1 }
 0x346   : > { %v2144_v33 = vmax.f32 %v1747_v17, %v2121_v50 }
 0x347   : > { %v2160_v55 = vadd.f32 %v2310_v53, %v2145_v21 }
 0x348   : > { %v2159_v43 = vadd.f32 %v2310_v53, %v2144_v33 }
 0x349   : > { %2168 = vst.msk [vmem:[%s4243_s15 + $0x28] sm:$0xff] %vm694_vm3, %v2160_v55 }
 0x34a   : > { %2167 = vst.msk [vmem:[%s4243_s15 + $0x20] sm:$0xff] %vm694_vm3, %v2159_v43 }
 0x351   : > { %v2430_v46 = vpop.f32.mrb[14].mxu0 }
 0x352   : > { %v1750_v48 = vmax.f32 %v1351_v18, %v2430_v46  ;;  %v1734_v1 = vpop.f32.mrb[15].mxu0 }
 0x353   : > { %v1749_v4 = vmax.f32 %v1350_v38, %v1734_v1 }
 0x35a   : > { %v2452_v6 = vpop.f32.mrb[14].mxu1 }
 0x35b   : > { %v2147_v25 = vmax.f32 %v1750_v48, %v2452_v6  ;;  %v2131_v39 = vpop.f32.mrb[15].mxu1 }
 0x35c   : > { %v2146_v29 = vmax.f32 %v1749_v4, %v2131_v39 }
 0x35d   : > { %v2162_v63 = vadd.f32 %v2310_v53, %v2147_v25 }
 0x35e   : > { %v2161_v11 = vadd.f32 %v2310_v53, %v2146_v29 }
 0x35f   : > { %2170 = vst.msk [vmem:[%s4243_s15 + $0x38] sm:$0xff] %vm694_vm3, %v2162_v63 }
 0x360   : > { %2169 = vst.msk [vmem:[%s4243_s15 + $0x30] sm:$0xff] %vm694_vm3, %v2161_v11 }
 0x361 PF: > { %s16_s21 = sadd.s32 1, %s2537_s21  }
 0x362   : > { %p13_p5 = scmp.ge.s32.totalorder %s16_s21, 4  }
 0x364   :  { %15 = sbr.rel (!%p13_p5) target bundleno = 1 (0x1), region = 83 }

</bundles_post_ra>
